<compile_context>
chip_gen: v7x
topology: tpu7x:2x2x1
jax: 0.10.0
libtpu: 0.0.40
codegen_flags: <defaults>
</compile_context>

<pallas_src>
from functools import partial

import jax
import jax.numpy as jnp
import numpy as np
from jax.experimental import pallas as pl
from jax.experimental.pallas import tpu as pltpu

LANE = 128
SUBLANE = 8

# torch gate rows are ordered (i, f, g, o); padded gate COLUMNS are laid out
# (i, f, o, g) so the three sigmoid gates are lane-contiguous in the kernel.
_TORCH_TO_PADDED_GATE = (0, 1, 3, 2)   # i->0, f->1, g->3, o->2


def _round_up(x, m):
    return ((x + m - 1) // m) * m


# --------------------------- fused model kernel ------------------------------
def _make_fused_kernel(num_layers, seq_len, hp):
    """hp = hidden size padded to a multiple of 128 lanes."""

    def kernel(x_ref, *refs):
        # refs = [w_ih_t, w_hh_t, b] * L + [w_fc_t, b_fc] + [out] + [preact, hseq]
        w_fc_ref = refs[3 * num_layers + 0]
        b_fc_ref = refs[3 * num_layers + 1]
        out_ref = refs[3 * num_layers + 2]
        preact_ref = refs[3 * num_layers + 3]      # (T, Bp, 4*hp) VMEM scratch
        hseq_ref = refs[3 * num_layers + 4]        # (T, Bp, hp)   VMEM scratch

        T, B, d_in = x_ref.shape

        h_last = None
        for l in range(num_layers):
            w_ih_ref = refs[3 * l + 0]             # (d_in_p, 4*hp)
            w_hh_ref = refs[3 * l + 1]             # (hp, 4*hp)
            b_ref = refs[3 * l + 2]                # (1, 4*hp)

            # --- (1) input projection for ALL timesteps: one big MXU matmul.
            # (T, B, d) -> (T*B, d) is a free reshape (B == 8 sublanes,
            # d a multiple of 128 lanes).  Bias folded in here.
            if l == 0:
                inp2d = x_ref[...].reshape(T * B, d_in)
            else:
                inp2d = hseq_ref[...].reshape(T * B, hp)
            preact_ref[...] = (
                jnp.dot(inp2d, w_ih_ref[...], preferred_element_type=jnp.float32)
                + b_ref[...]
            ).reshape(T, B, 4 * hp)

            # --- (2) serial recurrence: only h @ W_hh + preact[t] on the
            # critical path.  T is small & static here -> full unroll; for
            # long sequences switch to lax.fori_loop(0, T, step, (h, c),
            # unroll=4) carrying (h, c).
            last_layer = (l == num_layers - 1)
            h = jnp.zeros((B, hp), jnp.float32)
            c = jnp.zeros((B, hp), jnp.float32)
            for t in range(seq_len):
                gates = (
                    jnp.dot(h, w_hh_ref[...], preferred_element_type=jnp.float32)
                    + preact_ref[t]
                )                                            # (B, 4*hp)
                sig = jax.nn.sigmoid(gates[:, : 3 * hp])     # fused i, f, o
                i_g = sig[:, 0 * hp:1 * hp]
                f_g = sig[:, 1 * hp:2 * hp]
                o_g = sig[:, 2 * hp:3 * hp]
                g_g = jnp.tanh(gates[:, 3 * hp:4 * hp])
                c = f_g * c + i_g * g_g
                h = o_g * jnp.tanh(c)
                if not last_layer:
                    hseq_ref[t] = h                          # feed next layer
            h_last = h

        # Final FC on the last layer's hidden state at t = T-1
        # (== out[:, -1, :] @ W_fc^T + b_fc).  Lane-dense (Bp, cp) store.
        out_ref[...] = (
            jnp.dot(h_last, w_fc_ref[...], preferred_element_type=jnp.float32)
            + b_fc_ref[...]
        )

    return kernel


@partial(jax.jit, static_argnames=("num_classes",))
def lstm_model_forward(x_btd, kparams, *, num_classes):
    """x_btd: (B, T, input_dim) float32 -> logits (B, num_classes)."""
    B, T, D = x_btd.shape
    layers = kparams["layers"]
    num_layers = len(layers)
    hp = layers[0]["w_hh_t"].shape[0]
    d_in_p = layers[0]["w_ih_t"].shape[0]
    cp = kparams["w_fc_t"].shape[1]
    bp = _round_up(max(B, 1), SUBLANE)

    # (B, T, D) -> (T, Bp, Dp): time-major so x_ref[t] is a lane-dense tile;
    # pad batch to 8 sublanes and input_dim to 128 lanes (zero padding).
    x_tm = jnp.transpose(x_btd, (1, 0, 2))
    x_tm = jnp.pad(x_tm, ((0, 0), (0, bp - B), (0, d_in_p - D)))

    flat = []
    for lp in layers:
        flat += [lp["w_ih_t"], lp["w_hh_t"], lp["b"]]
    flat += [kparams["w_fc_t"], kparams["b_fc"]]

    # Explicit VMEM budget: everything resident + scratch, with 2x headroom,
    # capped at 64 MiB (fits v7x's physical VMEM; raises v5e's 16 MiB default).
    f32 = 4
    need = int(x_tm.size) * f32 + sum(int(a.size) * f32 for a in flat)
    need += bp * cp * f32                    # output
    need += T * bp * 4 * hp * f32            # preact scratch
    need += T * bp * hp * f32                # hseq scratch
    vmem_limit = int(min(64 * 1024 * 1024, max(4 * 1024 * 1024, 2 * need)))

    vmem = pl.BlockSpec(memory_space=pltpu.MemorySpace.VMEM)
    out_p = pl.pallas_call(
        _make_fused_kernel(num_layers, T, hp),
        out_shape=jax.ShapeDtypeStruct((bp, cp), jnp.float32),
        in_specs=[vmem] * (1 + len(flat)),
        out_specs=vmem,
        scratch_shapes=[
            pltpu.VMEM((T, bp, 4 * hp), jnp.float32),   # per-layer preact
            pltpu.VMEM((T, bp, hp), jnp.float32),       # per-layer h sequence
        ],
        compiler_params=pltpu.CompilerParams(vmem_limit_bytes=vmem_limit),
    )(x_tm, *flat)
    return out_p[:B, :num_classes]


# ------------------------------- parameters ----------------------------------
def init_params(key, input_dim, hidden_dim, num_layers, num_classes):
    """Raw (unpadded) params in torch.nn.LSTM / nn.Linear layout."""
    params = {"lstm": [], "fc": None}
    bound = 1.0 / np.sqrt(hidden_dim)
    for layer in range(num_layers):
        d_in = input_dim if layer == 0 else hidden_dim
        key, k1, k2, k3, k4 = jax.random.split(key, 5)
        params["lstm"].append(dict(
            w_ih=jax.random.uniform(k1, (4 * hidden_dim, d_in), jnp.float32, -bound, bound),
            w_hh=jax.random.uniform(k2, (4 * hidden_dim, hidden_dim), jnp.float32, -bound, bound),
            b_ih=jax.random.uniform(k3, (4 * hidden_dim,), jnp.float32, -bound, bound),
            b_hh=jax.random.uniform(k4, (4 * hidden_dim,), jnp.float32, -bound, bound),
        ))
    key, k5, k6 = jax.random.split(key, 3)
    params["fc"] = dict(
        w=jax.random.uniform(k5, (num_classes, hidden_dim), jnp.float32, -bound, bound),
        b=jax.random.uniform(k6, (num_classes,), jnp.float32, -bound, bound),
    )
    return params


def pad_params_for_kernel(params, input_dim, hidden_dim, num_classes):
    """Transpose + zero-pad; gate columns laid out (i, f, o, g), 128-lane aligned.

    Zero padding is inert: padded gate pre-activations are 0, so g=tanh(0)=0,
    hence c_pad and h_pad stay exactly 0 for all t.
    """
    hp = _round_up(hidden_dim, LANE)
    cp = _round_up(num_classes, LANE)
    dp = _round_up(input_dim, LANE)
    layers = []
    for i, lp in enumerate(params["lstm"]):
        d_in = lp["w_ih"].shape[1]
        d_in_p = dp if i == 0 else hp            # layers > 0 consume the padded h
        w_ih_t = jnp.zeros((d_in_p, 4 * hp), jnp.float32)
        w_hh_t = jnp.zeros((hp, 4 * hp), jnp.float32)
        b = jnp.zeros((1, 4 * hp), jnp.float32)
        for g_torch in range(4):
            g_pad = _TORCH_TO_PADDED_GATE[g_torch]
            rows = slice(g_torch * hidden_dim, (g_torch + 1) * hidden_dim)
            cols = slice(g_pad * hp, g_pad * hp + hidden_dim)
            w_ih_t = w_ih_t.at[:d_in, cols].set(lp["w_ih"][rows, :].T)
            w_hh_t = w_hh_t.at[:hidden_dim, cols].set(lp["w_hh"][rows, :].T)
            b = b.at[0, cols].set(lp["b_ih"][rows] + lp["b_hh"][rows])
        layers.append(dict(w_ih_t=w_ih_t, w_hh_t=w_hh_t, b=b))
    w_fc_t = jnp.zeros((hp, cp), jnp.float32).at[:hidden_dim, :num_classes].set(
        params["fc"]["w"].T)
    b_fc = jnp.zeros((1, cp), jnp.float32).at[0, :num_classes].set(params["fc"]["b"])
    return dict(layers=layers, w_fc_t=w_fc_t, b_fc=b_fc)


# --------------------------- pure-JAX reference -------------------------------
def _reference_forward(x_btd, params):
    seq = jnp.transpose(x_btd, (1, 0, 2))
    H = params["lstm"][0]["w_hh"].shape[1]
    for lp in params["lstm"]:
        T, B, _ = seq.shape
        h = jnp.zeros((B, H), jnp.float32)
        c = jnp.zeros((B, H), jnp.float32)
        w_ih_t, w_hh_t = lp["w_ih"].T, lp["w_hh"].T
        b = (lp["b_ih"] + lp["b_hh"]).reshape(1, -1)
        outs = []
        for t in range(T):
            gates = seq[t] @ w_ih_t + h @ w_hh_t + b
            i_g = jax.nn.sigmoid(gates[:, 0 * H:1 * H])
            f_g = jax.nn.sigmoid(gates[:, 1 * H:2 * H])
            g_g = jnp.tanh(gates[:, 2 * H:3 * H])
            o_g = jax.nn.sigmoid(gates[:, 3 * H:4 * H])
            c = f_g * c + i_g * g_g
            h = o_g * jnp.tanh(c)
            outs.append(h)
        seq = jnp.stack(outs, axis=0)
    return seq[-1] @ params["fc"]["w"].T + params["fc"]["b"].reshape(1, -1)


if __name__ == "__main__":
    # Shapes implied by the module: x is (batch, seq_len, input_dim).
    batch, seq_len = 2, 8
    input_dim, hidden_dim, num_layers, num_classes = 16, 32, 2, 4

    key = jax.random.PRNGKey(0)
    key, kx = jax.random.split(key)
    x = jax.random.normal(kx, (batch, seq_len, input_dim), jnp.float32)

    params = init_params(key, input_dim, hidden_dim, num_layers, num_classes)
    kparams = pad_params_for_kernel(params, input_dim, hidden_dim, num_classes)

    out = lstm_model_forward(x, kparams, num_classes=num_classes)
    out = jax.block_until_ready(out)
    assert out.shape == (batch, num_classes)

    ref = jax.block_until_ready(_reference_forward(x, params))
    np.testing.assert_allclose(np.asarray(out), np.asarray(ref), rtol=1e-4, atol=1e-4)

    print("KERNEL_OK")
</pallas_src>

<mosaic_0001>
module attributes {stable_mosaic.version = 11 : i64} {
  func.func @kernel(%arg0: memref<8x8x128xf32, #tpu.memory_space<vmem>>, %arg1: memref<128x512xf32, #tpu.memory_space<vmem>>, %arg2: memref<128x512xf32, #tpu.memory_space<vmem>>, %arg3: memref<1x512xf32, #tpu.memory_space<vmem>>, %arg4: memref<128x512xf32, #tpu.memory_space<vmem>>, %arg5: memref<128x512xf32, #tpu.memory_space<vmem>>, %arg6: memref<1x512xf32, #tpu.memory_space<vmem>>, %arg7: memref<128x128xf32, #tpu.memory_space<vmem>>, %arg8: memref<1x128xf32, #tpu.memory_space<vmem>>, %arg9: memref<8x128xf32, #tpu.memory_space<vmem>>, %arg10: memref<8x8x512xf32, #tpu.memory_space<vmem>>, %arg11: memref<8x8x128xf32, #tpu.memory_space<vmem>>) attributes {dimension_semantics = [], scalar_prefetch = 0 : i64, scratch_operands = 2 : i64, tpu.core_type = #tpu.core_type<tc>} {
    %c0 = arith.constant 0 : index
    %c0_0 = arith.constant 0 : index
    %c0_1 = arith.constant 0 : index
    %0 = vector.load %arg0[%c0, %c0_0, %c0_1] : memref<8x8x128xf32, #tpu.memory_space<vmem>>, vector<8x8x128xf32>
    %1 = vector.shape_cast %0 : vector<8x8x128xf32> to vector<64x128xf32>
    %c0_2 = arith.constant 0 : index
    %c0_3 = arith.constant 0 : index
    %2 = vector.load %arg1[%c0_2, %c0_3] : memref<128x512xf32, #tpu.memory_space<vmem>>, vector<128x512xf32>
    %cst = arith.constant dense<0.000000e+00> : vector<64x512xf32>
    %3 = tpu.matmul %1, %2, %cst {dimension_numbers = #tpu.dot_dimension_numbers<[1], [0], [0], [1], [0, 0, 1, 1], [], []>} : vector<64x128xf32>, vector<128x512xf32>, vector<64x512xf32> -> vector<64x512xf32>
    %c0_4 = arith.constant 0 : index
    %c0_5 = arith.constant 0 : index
    %4 = vector.load %arg3[%c0_4, %c0_5] : memref<1x512xf32, #tpu.memory_space<vmem>>, vector<1x512xf32>
    %5 = vector.broadcast %4 : vector<1x512xf32> to vector<64x512xf32>
    %6 = arith.addf %3, %5 : vector<64x512xf32>
    %7 = vector.shape_cast %6 : vector<64x512xf32> to vector<8x8x512xf32>
    %c0_6 = arith.constant 0 : index
    %c0_7 = arith.constant 0 : index
    %c0_8 = arith.constant 0 : index
    %8 = vector.load %arg10[%c0_6, %c0_7, %c0_8] : memref<8x8x512xf32, #tpu.memory_space<vmem>>, vector<8x8x512xf32>
    tpu.vector_store %arg10[%c0_6, %c0_7, %c0_8], %7 {strides = array<i32>} : memref<8x8x512xf32, #tpu.memory_space<vmem>>, vector<8x8x512xf32>,
    %cst_9 = arith.constant 0.000000e+00 : f32
    %9 = vector.broadcast %cst_9 : f32 to vector<8x128xf32>
    %cst_10 = arith.constant 0.000000e+00 : f32
    %10 = vector.broadcast %cst_10 : f32 to vector<8x128xf32>
    %c0_11 = arith.constant 0 : index
    %c0_12 = arith.constant 0 : index
    %11 = vector.load %arg2[%c0_11, %c0_12] : memref<128x512xf32, #tpu.memory_space<vmem>>, vector<128x512xf32>
    %cst_13 = arith.constant dense<0.000000e+00> : vector<8x512xf32>
    %12 = tpu.matmul %9, %11, %cst_13 {dimension_numbers = #tpu.dot_dimension_numbers<[1], [0], [0], [1], [0, 0, 1, 1], [], []>} : vector<8x128xf32>, vector<128x512xf32>, vector<8x512xf32> -> vector<8x512xf32>
    %c0_14 = arith.constant 0 : index
    %c0_15 = arith.constant 0 : index
    %c0_16 = arith.constant 0 : index
    %13 = vector.load %arg10[%c0_14, %c0_15, %c0_16] : memref<8x8x512xf32, #tpu.memory_space<vmem>>, vector<1x8x512xf32>
    %14 = vector.shape_cast %13 : vector<1x8x512xf32> to vector<8x512xf32>
    %15 = arith.addf %12, %14 : vector<8x512xf32>
    %16 = vector.extract_strided_slice %15 {offsets = [0, 0], sizes = [8, 384], strides = [1, 1]} : vector<8x512xf32> to vector<8x384xf32>
    %17 = arith.negf %16 : vector<8x384xf32>
    %18 = math.exp %17 : vector<8x384xf32>
    %cst_17 = arith.constant 1.000000e+00 : f32
    %19 = vector.broadcast %cst_17 : f32 to vector<8x384xf32>
    %20 = arith.addf %19, %18 : vector<8x384xf32>
    %21 = arith.divf %19, %20 : vector<8x384xf32>
    %22 = vector.extract_strided_slice %21 {offsets = [0, 0], sizes = [8, 128], strides = [1, 1]} : vector<8x384xf32> to vector<8x128xf32>
    %23 = vector.extract_strided_slice %21 {offsets = [0, 128], sizes = [8, 128], strides = [1, 1]} : vector<8x384xf32> to vector<8x128xf32>
    %24 = vector.extract_strided_slice %21 {offsets = [0, 256], sizes = [8, 128], strides = [1, 1]} : vector<8x384xf32> to vector<8x128xf32>
    %25 = vector.extract_strided_slice %15 {offsets = [0, 384], sizes = [8, 128], strides = [1, 1]} : vector<8x512xf32> to vector<8x128xf32>
    %26 = math.tanh %25 : vector<8x128xf32>
    %27 = arith.mulf %23, %10 : vector<8x128xf32>
    %28 = arith.mulf %22, %26 : vector<8x128xf32>
    %29 = arith.addf %27, %28 : vector<8x128xf32>
    %30 = math.tanh %29 : vector<8x128xf32>
    %31 = arith.mulf %24, %30 : vector<8x128xf32>
    %c0_18 = arith.constant 0 : index
    %c0_19 = arith.constant 0 : index
    %c0_20 = arith.constant 0 : index
    %32 = vector.load %arg11[%c0_18, %c0_19, %c0_20] : memref<8x8x128xf32, #tpu.memory_space<vmem>>, vector<1x8x128xf32>
    %33 = vector.shape_cast %32 : vector<1x8x128xf32> to vector<8x128xf32>
    %34 = vector.shape_cast %31 : vector<8x128xf32> to vector<1x8x128xf32>
    tpu.vector_store %arg11[%c0_18, %c0_19, %c0_20], %34 {strides = array<i32>} : memref<8x8x128xf32, #tpu.memory_space<vmem>>, vector<1x8x128xf32>,
    %c0_21 = arith.constant 0 : index
    %c0_22 = arith.constant 0 : index
    %35 = vector.load %arg2[%c0_21, %c0_22] : memref<128x512xf32, #tpu.memory_space<vmem>>, vector<128x512xf32>
    %cst_23 = arith.constant dense<0.000000e+00> : vector<8x512xf32>
    %36 = tpu.matmul %31, %35, %cst_23 {dimension_numbers = #tpu.dot_dimension_numbers<[1], [0], [0], [1], [0, 0, 1, 1], [], []>} : vector<8x128xf32>, vector<128x512xf32>, vector<8x512xf32> -> vector<8x512xf32>
    %c1 = arith.constant 1 : index
    %c0_24 = arith.constant 0 : index
    %c0_25 = arith.constant 0 : index
    %37 = vector.load %arg10[%c1, %c0_24, %c0_25] : memref<8x8x512xf32, #tpu.memory_space<vmem>>, vector<1x8x512xf32>
    %38 = vector.shape_cast %37 : vector<1x8x512xf32> to vector<8x512xf32>
    %39 = arith.addf %36, %38 : vector<8x512xf32>
    %40 = vector.extract_strided_slice %39 {offsets = [0, 0], sizes = [8, 384], strides = [1, 1]} : vector<8x512xf32> to vector<8x384xf32>
    %41 = arith.negf %40 : vector<8x384xf32>
    %42 = math.exp %41 : vector<8x384xf32>
    %cst_26 = arith.constant 1.000000e+00 : f32
    %43 = vector.broadcast %cst_26 : f32 to vector<8x384xf32>
    %44 = arith.addf %43, %42 : vector<8x384xf32>
    %45 = arith.divf %43, %44 : vector<8x384xf32>
    %46 = vector.extract_strided_slice %45 {offsets = [0, 0], sizes = [8, 128], strides = [1, 1]} : vector<8x384xf32> to vector<8x128xf32>
    %47 = vector.extract_strided_slice %45 {offsets = [0, 128], sizes = [8, 128], strides = [1, 1]} : vector<8x384xf32> to vector<8x128xf32>
    %48 = vector.extract_strided_slice %45 {offsets = [0, 256], sizes = [8, 128], strides = [1, 1]} : vector<8x384xf32> to vector<8x128xf32>
    %49 = vector.extract_strided_slice %39 {offsets = [0, 384], sizes = [8, 128], strides = [1, 1]} : vector<8x512xf32> to vector<8x128xf32>
    %50 = math.tanh %49 : vector<8x128xf32>
    %51 = arith.mulf %47, %29 : vector<8x128xf32>
    %52 = arith.mulf %46, %50 : vector<8x128xf32>
    %53 = arith.addf %51, %52 : vector<8x128xf32>
    %54 = math.tanh %53 : vector<8x128xf32>
    %55 = arith.mulf %48, %54 : vector<8x128xf32>
    %c1_27 = arith.constant 1 : index
    %c0_28 = arith.constant 0 : index
    %c0_29 = arith.constant 0 : index
    %56 = vector.load %arg11[%c1_27, %c0_28, %c0_29] : memref<8x8x128xf32, #tpu.memory_space<vmem>>, vector<1x8x128xf32>
    %57 = vector.shape_cast %56 : vector<1x8x128xf32> to vector<8x128xf32>
    %58 = vector.shape_cast %55 : vector<8x128xf32> to vector<1x8x128xf32>
    tpu.vector_store %arg11[%c1_27, %c0_28, %c0_29], %58 {strides = array<i32>} : memref<8x8x128xf32, #tpu.memory_space<vmem>>, vector<1x8x128xf32>,
    %c0_30 = arith.constant 0 : index
    %c0_31 = arith.constant 0 : index
    %59 = vector.load %arg2[%c0_30, %c0_31] : memref<128x512xf32, #tpu.memory_space<vmem>>, vector<128x512xf32>
    %cst_32 = arith.constant dense<0.000000e+00> : vector<8x512xf32>
    %60 = tpu.matmul %55, %59, %cst_32 {dimension_numbers = #tpu.dot_dimension_numbers<[1], [0], [0], [1], [0, 0, 1, 1], [], []>} : vector<8x128xf32>, vector<128x512xf32>, vector<8x512xf32> -> vector<8x512xf32>
    %c2 = arith.constant 2 : index
    %c0_33 = arith.constant 0 : index
    %c0_34 = arith.constant 0 : index
    %61 = vector.load %arg10[%c2, %c0_33, %c0_34] : memref<8x8x512xf32, #tpu.memory_space<vmem>>, vector<1x8x512xf32>
    %62 = vector.shape_cast %61 : vector<1x8x512xf32> to vector<8x512xf32>
    %63 = arith.addf %60, %62 : vector<8x512xf32>
    %64 = vector.extract_strided_slice %63 {offsets = [0, 0], sizes = [8, 384], strides = [1, 1]} : vector<8x512xf32> to vector<8x384xf32>
    %65 = arith.negf %64 : vector<8x384xf32>
    %66 = math.exp %65 : vector<8x384xf32>
    %cst_35 = arith.constant 1.000000e+00 : f32
    %67 = vector.broadcast %cst_35 : f32 to vector<8x384xf32>
    %68 = arith.addf %67, %66 : vector<8x384xf32>
    %69 = arith.divf %67, %68 : vector<8x384xf32>
    %70 = vector.extract_strided_slice %69 {offsets = [0, 0], sizes = [8, 128], strides = [1, 1]} : vector<8x384xf32> to vector<8x128xf32>
    %71 = vector.extract_strided_slice %69 {offsets = [0, 128], sizes = [8, 128], strides = [1, 1]} : vector<8x384xf32> to vector<8x128xf32>
    %72 = vector.extract_strided_slice %69 {offsets = [0, 256], sizes = [8, 128], strides = [1, 1]} : vector<8x384xf32> to vector<8x128xf32>
    %73 = vector.extract_strided_slice %63 {offsets = [0, 384], sizes = [8, 128], strides = [1, 1]} : vector<8x512xf32> to vector<8x128xf32>
    %74 = math.tanh %73 : vector<8x128xf32>
    %75 = arith.mulf %71, %53 : vector<8x128xf32>
    %76 = arith.mulf %70, %74 : vector<8x128xf32>
    %77 = arith.addf %75, %76 : vector<8x128xf32>
    %78 = math.tanh %77 : vector<8x128xf32>
    %79 = arith.mulf %72, %78 : vector<8x128xf32>
    %c2_36 = arith.constant 2 : index
    %c0_37 = arith.constant 0 : index
    %c0_38 = arith.constant 0 : index
    %80 = vector.load %arg11[%c2_36, %c0_37, %c0_38] : memref<8x8x128xf32, #tpu.memory_space<vmem>>, vector<1x8x128xf32>
    %81 = vector.shape_cast %80 : vector<1x8x128xf32> to vector<8x128xf32>
    %82 = vector.shape_cast %79 : vector<8x128xf32> to vector<1x8x128xf32>
    tpu.vector_store %arg11[%c2_36, %c0_37, %c0_38], %82 {strides = array<i32>} : memref<8x8x128xf32, #tpu.memory_space<vmem>>, vector<1x8x128xf32>,
    %c0_39 = arith.constant 0 : index
    %c0_40 = arith.constant 0 : index
    %83 = vector.load %arg2[%c0_39, %c0_40] : memref<128x512xf32, #tpu.memory_space<vmem>>, vector<128x512xf32>
    %cst_41 = arith.constant dense<0.000000e+00> : vector<8x512xf32>
    %84 = tpu.matmul %79, %83, %cst_41 {dimension_numbers = #tpu.dot_dimension_numbers<[1], [0], [0], [1], [0, 0, 1, 1], [], []>} : vector<8x128xf32>, vector<128x512xf32>, vector<8x512xf32> -> vector<8x512xf32>
    %c3 = arith.constant 3 : index
    %c0_42 = arith.constant 0 : index
    %c0_43 = arith.constant 0 : index
    %85 = vector.load %arg10[%c3, %c0_42, %c0_43] : memref<8x8x512xf32, #tpu.memory_space<vmem>>, vector<1x8x512xf32>
    %86 = vector.shape_cast %85 : vector<1x8x512xf32> to vector<8x512xf32>
    %87 = arith.addf %84, %86 : vector<8x512xf32>
    %88 = vector.extract_strided_slice %87 {offsets = [0, 0], sizes = [8, 384], strides = [1, 1]} : vector<8x512xf32> to vector<8x384xf32>
    %89 = arith.negf %88 : vector<8x384xf32>
    %90 = math.exp %89 : vector<8x384xf32>
    %cst_44 = arith.constant 1.000000e+00 : f32
    %91 = vector.broadcast %cst_44 : f32 to vector<8x384xf32>
    %92 = arith.addf %91, %90 : vector<8x384xf32>
    %93 = arith.divf %91, %92 : vector<8x384xf32>
    %94 = vector.extract_strided_slice %93 {offsets = [0, 0], sizes = [8, 128], strides = [1, 1]} : vector<8x384xf32> to vector<8x128xf32>
    %95 = vector.extract_strided_slice %93 {offsets = [0, 128], sizes = [8, 128], strides = [1, 1]} : vector<8x384xf32> to vector<8x128xf32>
    %96 = vector.extract_strided_slice %93 {offsets = [0, 256], sizes = [8, 128], strides = [1, 1]} : vector<8x384xf32> to vector<8x128xf32>
    %97 = vector.extract_strided_slice %87 {offsets = [0, 384], sizes = [8, 128], strides = [1, 1]} : vector<8x512xf32> to vector<8x128xf32>
    %98 = math.tanh %97 : vector<8x128xf32>
    %99 = arith.mulf %95, %77 : vector<8x128xf32>
    %100 = arith.mulf %94, %98 : vector<8x128xf32>
    %101 = arith.addf %99, %100 : vector<8x128xf32>
    %102 = math.tanh %101 : vector<8x128xf32>
    %103 = arith.mulf %96, %102 : vector<8x128xf32>
    %c3_45 = arith.constant 3 : index
    %c0_46 = arith.constant 0 : index
    %c0_47 = arith.constant 0 : index
    %104 = vector.load %arg11[%c3_45, %c0_46, %c0_47] : memref<8x8x128xf32, #tpu.memory_space<vmem>>, vector<1x8x128xf32>
    %105 = vector.shape_cast %104 : vector<1x8x128xf32> to vector<8x128xf32>
    %106 = vector.shape_cast %103 : vector<8x128xf32> to vector<1x8x128xf32>
    tpu.vector_store %arg11[%c3_45, %c0_46, %c0_47], %106 {strides = array<i32>} : memref<8x8x128xf32, #tpu.memory_space<vmem>>, vector<1x8x128xf32>,
    %c0_48 = arith.constant 0 : index
    %c0_49 = arith.constant 0 : index
    %107 = vector.load %arg2[%c0_48, %c0_49] : memref<128x512xf32, #tpu.memory_space<vmem>>, vector<128x512xf32>
    %cst_50 = arith.constant dense<0.000000e+00> : vector<8x512xf32>
    %108 = tpu.matmul %103, %107, %cst_50 {dimension_numbers = #tpu.dot_dimension_numbers<[1], [0], [0], [1], [0, 0, 1, 1], [], []>} : vector<8x128xf32>, vector<128x512xf32>, vector<8x512xf32> -> vector<8x512xf32>
    %c4 = arith.constant 4 : index
    %c0_51 = arith.constant 0 : index
    %c0_52 = arith.constant 0 : index
    %109 = vector.load %arg10[%c4, %c0_51, %c0_52] : memref<8x8x512xf32, #tpu.memory_space<vmem>>, vector<1x8x512xf32>
    %110 = vector.shape_cast %109 : vector<1x8x512xf32> to vector<8x512xf32>
    %111 = arith.addf %108, %110 : vector<8x512xf32>
    %112 = vector.extract_strided_slice %111 {offsets = [0, 0], sizes = [8, 384], strides = [1, 1]} : vector<8x512xf32> to vector<8x384xf32>
    %113 = arith.negf %112 : vector<8x384xf32>
    %114 = math.exp %113 : vector<8x384xf32>
    %cst_53 = arith.constant 1.000000e+00 : f32
    %115 = vector.broadcast %cst_53 : f32 to vector<8x384xf32>
    %116 = arith.addf %115, %114 : vector<8x384xf32>
    %117 = arith.divf %115, %116 : vector<8x384xf32>
    %118 = vector.extract_strided_slice %117 {offsets = [0, 0], sizes = [8, 128], strides = [1, 1]} : vector<8x384xf32> to vector<8x128xf32>
    %119 = vector.extract_strided_slice %117 {offsets = [0, 128], sizes = [8, 128], strides = [1, 1]} : vector<8x384xf32> to vector<8x128xf32>
    %120 = vector.extract_strided_slice %117 {offsets = [0, 256], sizes = [8, 128], strides = [1, 1]} : vector<8x384xf32> to vector<8x128xf32>
    %121 = vector.extract_strided_slice %111 {offsets = [0, 384], sizes = [8, 128], strides = [1, 1]} : vector<8x512xf32> to vector<8x128xf32>
    %122 = math.tanh %121 : vector<8x128xf32>
    %123 = arith.mulf %119, %101 : vector<8x128xf32>
    %124 = arith.mulf %118, %122 : vector<8x128xf32>
    %125 = arith.addf %123, %124 : vector<8x128xf32>
    %126 = math.tanh %125 : vector<8x128xf32>
    %127 = arith.mulf %120, %126 : vector<8x128xf32>
    %c4_54 = arith.constant 4 : index
    %c0_55 = arith.constant 0 : index
    %c0_56 = arith.constant 0 : index
    %128 = vector.load %arg11[%c4_54, %c0_55, %c0_56] : memref<8x8x128xf32, #tpu.memory_space<vmem>>, vector<1x8x128xf32>
    %129 = vector.shape_cast %128 : vector<1x8x128xf32> to vector<8x128xf32>
    %130 = vector.shape_cast %127 : vector<8x128xf32> to vector<1x8x128xf32>
    tpu.vector_store %arg11[%c4_54, %c0_55, %c0_56], %130 {strides = array<i32>} : memref<8x8x128xf32, #tpu.memory_space<vmem>>, vector<1x8x128xf32>,
    %c0_57 = arith.constant 0 : index
    %c0_58 = arith.constant 0 : index
    %131 = vector.load %arg2[%c0_57, %c0_58] : memref<128x512xf32, #tpu.memory_space<vmem>>, vector<128x512xf32>
    %cst_59 = arith.constant dense<0.000000e+00> : vector<8x512xf32>
    %132 = tpu.matmul %127, %131, %cst_59 {dimension_numbers = #tpu.dot_dimension_numbers<[1], [0], [0], [1], [0, 0, 1, 1], [], []>} : vector<8x128xf32>, vector<128x512xf32>, vector<8x512xf32> -> vector<8x512xf32>
    %c5 = arith.constant 5 : index
    %c0_60 = arith.constant 0 : index
    %c0_61 = arith.constant 0 : index
    %133 = vector.load %arg10[%c5, %c0_60, %c0_61] : memref<8x8x512xf32, #tpu.memory_space<vmem>>, vector<1x8x512xf32>
    %134 = vector.shape_cast %133 : vector<1x8x512xf32> to vector<8x512xf32>
    %135 = arith.addf %132, %134 : vector<8x512xf32>
    %136 = vector.extract_strided_slice %135 {offsets = [0, 0], sizes = [8, 384], strides = [1, 1]} : vector<8x512xf32> to vector<8x384xf32>
    %137 = arith.negf %136 : vector<8x384xf32>
    %138 = math.exp %137 : vector<8x384xf32>
    %cst_62 = arith.constant 1.000000e+00 : f32
    %139 = vector.broadcast %cst_62 : f32 to vector<8x384xf32>
    %140 = arith.addf %139, %138 : vector<8x384xf32>
    %141 = arith.divf %139, %140 : vector<8x384xf32>
    %142 = vector.extract_strided_slice %141 {offsets = [0, 0], sizes = [8, 128], strides = [1, 1]} : vector<8x384xf32> to vector<8x128xf32>
    %143 = vector.extract_strided_slice %141 {offsets = [0, 128], sizes = [8, 128], strides = [1, 1]} : vector<8x384xf32> to vector<8x128xf32>
    %144 = vector.extract_strided_slice %141 {offsets = [0, 256], sizes = [8, 128], strides = [1, 1]} : vector<8x384xf32> to vector<8x128xf32>
    %145 = vector.extract_strided_slice %135 {offsets = [0, 384], sizes = [8, 128], strides = [1, 1]} : vector<8x512xf32> to vector<8x128xf32>
    %146 = math.tanh %145 : vector<8x128xf32>
    %147 = arith.mulf %143, %125 : vector<8x128xf32>
    %148 = arith.mulf %142, %146 : vector<8x128xf32>
    %149 = arith.addf %147, %148 : vector<8x128xf32>
    %150 = math.tanh %149 : vector<8x128xf32>
    %151 = arith.mulf %144, %150 : vector<8x128xf32>
    %c5_63 = arith.constant 5 : index
    %c0_64 = arith.constant 0 : index
    %c0_65 = arith.constant 0 : index
    %152 = vector.load %arg11[%c5_63, %c0_64, %c0_65] : memref<8x8x128xf32, #tpu.memory_space<vmem>>, vector<1x8x128xf32>
    %153 = vector.shape_cast %152 : vector<1x8x128xf32> to vector<8x128xf32>
    %154 = vector.shape_cast %151 : vector<8x128xf32> to vector<1x8x128xf32>
    tpu.vector_store %arg11[%c5_63, %c0_64, %c0_65], %154 {strides = array<i32>} : memref<8x8x128xf32, #tpu.memory_space<vmem>>, vector<1x8x128xf32>,
    %c0_66 = arith.constant 0 : index
    %c0_67 = arith.constant 0 : index
    %155 = vector.load %arg2[%c0_66, %c0_67] : memref<128x512xf32, #tpu.memory_space<vmem>>, vector<128x512xf32>
    %cst_68 = arith.constant dense<0.000000e+00> : vector<8x512xf32>
    %156 = tpu.matmul %151, %155, %cst_68 {dimension_numbers = #tpu.dot_dimension_numbers<[1], [0], [0], [1], [0, 0, 1, 1], [], []>} : vector<8x128xf32>, vector<128x512xf32>, vector<8x512xf32> -> vector<8x512xf32>
    %c6 = arith.constant 6 : index
    %c0_69 = arith.constant 0 : index
    %c0_70 = arith.constant 0 : index
    %157 = vector.load %arg10[%c6, %c0_69, %c0_70] : memref<8x8x512xf32, #tpu.memory_space<vmem>>, vector<1x8x512xf32>
    %158 = vector.shape_cast %157 : vector<1x8x512xf32> to vector<8x512xf32>
    %159 = arith.addf %156, %158 : vector<8x512xf32>
    %160 = vector.extract_strided_slice %159 {offsets = [0, 0], sizes = [8, 384], strides = [1, 1]} : vector<8x512xf32> to vector<8x384xf32>
    %161 = arith.negf %160 : vector<8x384xf32>
    %162 = math.exp %161 : vector<8x384xf32>
    %cst_71 = arith.constant 1.000000e+00 : f32
    %163 = vector.broadcast %cst_71 : f32 to vector<8x384xf32>
    %164 = arith.addf %163, %162 : vector<8x384xf32>
    %165 = arith.divf %163, %164 : vector<8x384xf32>
    %166 = vector.extract_strided_slice %165 {offsets = [0, 0], sizes = [8, 128], strides = [1, 1]} : vector<8x384xf32> to vector<8x128xf32>
    %167 = vector.extract_strided_slice %165 {offsets = [0, 128], sizes = [8, 128], strides = [1, 1]} : vector<8x384xf32> to vector<8x128xf32>
    %168 = vector.extract_strided_slice %165 {offsets = [0, 256], sizes = [8, 128], strides = [1, 1]} : vector<8x384xf32> to vector<8x128xf32>
    %169 = vector.extract_strided_slice %159 {offsets = [0, 384], sizes = [8, 128], strides = [1, 1]} : vector<8x512xf32> to vector<8x128xf32>
    %170 = math.tanh %169 : vector<8x128xf32>
    %171 = arith.mulf %167, %149 : vector<8x128xf32>
    %172 = arith.mulf %166, %170 : vector<8x128xf32>
    %173 = arith.addf %171, %172 : vector<8x128xf32>
    %174 = math.tanh %173 : vector<8x128xf32>
    %175 = arith.mulf %168, %174 : vector<8x128xf32>
    %c6_72 = arith.constant 6 : index
    %c0_73 = arith.constant 0 : index
    %c0_74 = arith.constant 0 : index
    %176 = vector.load %arg11[%c6_72, %c0_73, %c0_74] : memref<8x8x128xf32, #tpu.memory_space<vmem>>, vector<1x8x128xf32>
    %177 = vector.shape_cast %176 : vector<1x8x128xf32> to vector<8x128xf32>
    %178 = vector.shape_cast %175 : vector<8x128xf32> to vector<1x8x128xf32>
    tpu.vector_store %arg11[%c6_72, %c0_73, %c0_74], %178 {strides = array<i32>} : memref<8x8x128xf32, #tpu.memory_space<vmem>>, vector<1x8x128xf32>,
    %c0_75 = arith.constant 0 : index
    %c0_76 = arith.constant 0 : index
    %179 = vector.load %arg2[%c0_75, %c0_76] : memref<128x512xf32, #tpu.memory_space<vmem>>, vector<128x512xf32>
    %cst_77 = arith.constant dense<0.000000e+00> : vector<8x512xf32>
    %180 = tpu.matmul %175, %179, %cst_77 {dimension_numbers = #tpu.dot_dimension_numbers<[1], [0], [0], [1], [0, 0, 1, 1], [], []>} : vector<8x128xf32>, vector<128x512xf32>, vector<8x512xf32> -> vector<8x512xf32>
    %c7 = arith.constant 7 : index
    %c0_78 = arith.constant 0 : index
    %c0_79 = arith.constant 0 : index
    %181 = vector.load %arg10[%c7, %c0_78, %c0_79] : memref<8x8x512xf32, #tpu.memory_space<vmem>>, vector<1x8x512xf32>
    %182 = vector.shape_cast %181 : vector<1x8x512xf32> to vector<8x512xf32>
    %183 = arith.addf %180, %182 : vector<8x512xf32>
    %184 = vector.extract_strided_slice %183 {offsets = [0, 0], sizes = [8, 384], strides = [1, 1]} : vector<8x512xf32> to vector<8x384xf32>
    %185 = arith.negf %184 : vector<8x384xf32>
    %186 = math.exp %185 : vector<8x384xf32>
    %cst_80 = arith.constant 1.000000e+00 : f32
    %187 = vector.broadcast %cst_80 : f32 to vector<8x384xf32>
    %188 = arith.addf %187, %186 : vector<8x384xf32>
    %189 = arith.divf %187, %188 : vector<8x384xf32>
    %190 = vector.extract_strided_slice %189 {offsets = [0, 0], sizes = [8, 128], strides = [1, 1]} : vector<8x384xf32> to vector<8x128xf32>
    %191 = vector.extract_strided_slice %189 {offsets = [0, 128], sizes = [8, 128], strides = [1, 1]} : vector<8x384xf32> to vector<8x128xf32>
    %192 = vector.extract_strided_slice %189 {offsets = [0, 256], sizes = [8, 128], strides = [1, 1]} : vector<8x384xf32> to vector<8x128xf32>
    %193 = vector.extract_strided_slice %183 {offsets = [0, 384], sizes = [8, 128], strides = [1, 1]} : vector<8x512xf32> to vector<8x128xf32>
    %194 = math.tanh %193 : vector<8x128xf32>
    %195 = arith.mulf %191, %173 : vector<8x128xf32>
    %196 = arith.mulf %190, %194 : vector<8x128xf32>
    %197 = arith.addf %195, %196 : vector<8x128xf32>
    %198 = math.tanh %197 : vector<8x128xf32>
    %199 = arith.mulf %192, %198 : vector<8x128xf32>
    %c7_81 = arith.constant 7 : index
    %c0_82 = arith.constant 0 : index
    %c0_83 = arith.constant 0 : index
    %200 = vector.load %arg11[%c7_81, %c0_82, %c0_83] : memref<8x8x128xf32, #tpu.memory_space<vmem>>, vector<1x8x128xf32>
    %201 = vector.shape_cast %200 : vector<1x8x128xf32> to vector<8x128xf32>
    %202 = vector.shape_cast %199 : vector<8x128xf32> to vector<1x8x128xf32>
    tpu.vector_store %arg11[%c7_81, %c0_82, %c0_83], %202 {strides = array<i32>} : memref<8x8x128xf32, #tpu.memory_space<vmem>>, vector<1x8x128xf32>,
    %c0_84 = arith.constant 0 : index
    %c0_85 = arith.constant 0 : index
    %c0_86 = arith.constant 0 : index
    %203 = vector.load %arg11[%c0_84, %c0_85, %c0_86] : memref<8x8x128xf32, #tpu.memory_space<vmem>>, vector<8x8x128xf32>
    %204 = vector.shape_cast %203 : vector<8x8x128xf32> to vector<64x128xf32>
    %c0_87 = arith.constant 0 : index
    %c0_88 = arith.constant 0 : index
    %205 = vector.load %arg4[%c0_87, %c0_88] : memref<128x512xf32, #tpu.memory_space<vmem>>, vector<128x512xf32>
    %cst_89 = arith.constant dense<0.000000e+00> : vector<64x512xf32>
    %206 = tpu.matmul %204, %205, %cst_89 {dimension_numbers = #tpu.dot_dimension_numbers<[1], [0], [0], [1], [0, 0, 1, 1], [], []>} : vector<64x128xf32>, vector<128x512xf32>, vector<64x512xf32> -> vector<64x512xf32>
    %c0_90 = arith.constant 0 : index
    %c0_91 = arith.constant 0 : index
    %207 = vector.load %arg6[%c0_90, %c0_91] : memref<1x512xf32, #tpu.memory_space<vmem>>, vector<1x512xf32>
    %208 = vector.broadcast %207 : vector<1x512xf32> to vector<64x512xf32>
    %209 = arith.addf %206, %208 : vector<64x512xf32>
    %210 = vector.shape_cast %209 : vector<64x512xf32> to vector<8x8x512xf32>
    %c0_92 = arith.constant 0 : index
    %c0_93 = arith.constant 0 : index
    %c0_94 = arith.constant 0 : index
    %211 = vector.load %arg10[%c0_92, %c0_93, %c0_94] : memref<8x8x512xf32, #tpu.memory_space<vmem>>, vector<8x8x512xf32>
    tpu.vector_store %arg10[%c0_92, %c0_93, %c0_94], %210 {strides = array<i32>} : memref<8x8x512xf32, #tpu.memory_space<vmem>>, vector<8x8x512xf32>,
    %cst_95 = arith.constant 0.000000e+00 : f32
    %212 = vector.broadcast %cst_95 : f32 to vector<8x128xf32>
    %cst_96 = arith.constant 0.000000e+00 : f32
    %213 = vector.broadcast %cst_96 : f32 to vector<8x128xf32>
    %c0_97 = arith.constant 0 : index
    %c0_98 = arith.constant 0 : index
    %214 = vector.load %arg5[%c0_97, %c0_98] : memref<128x512xf32, #tpu.memory_space<vmem>>, vector<128x512xf32>
    %cst_99 = arith.constant dense<0.000000e+00> : vector<8x512xf32>
    %215 = tpu.matmul %212, %214, %cst_99 {dimension_numbers = #tpu.dot_dimension_numbers<[1], [0], [0], [1], [0, 0, 1, 1], [], []>} : vector<8x128xf32>, vector<128x512xf32>, vector<8x512xf32> -> vector<8x512xf32>
    %c0_100 = arith.constant 0 : index
    %c0_101 = arith.constant 0 : index
    %c0_102 = arith.constant 0 : index
    %216 = vector.load %arg10[%c0_100, %c0_101, %c0_102] : memref<8x8x512xf32, #tpu.memory_space<vmem>>, vector<1x8x512xf32>
    %217 = vector.shape_cast %216 : vector<1x8x512xf32> to vector<8x512xf32>
    %218 = arith.addf %215, %217 : vector<8x512xf32>
    %219 = vector.extract_strided_slice %218 {offsets = [0, 0], sizes = [8, 384], strides = [1, 1]} : vector<8x512xf32> to vector<8x384xf32>
    %220 = arith.negf %219 : vector<8x384xf32>
    %221 = math.exp %220 : vector<8x384xf32>
    %cst_103 = arith.constant 1.000000e+00 : f32
    %222 = vector.broadcast %cst_103 : f32 to vector<8x384xf32>
    %223 = arith.addf %222, %221 : vector<8x384xf32>
    %224 = arith.divf %222, %223 : vector<8x384xf32>
    %225 = vector.extract_strided_slice %224 {offsets = [0, 0], sizes = [8, 128], strides = [1, 1]} : vector<8x384xf32> to vector<8x128xf32>
    %226 = vector.extract_strided_slice %224 {offsets = [0, 128], sizes = [8, 128], strides = [1, 1]} : vector<8x384xf32> to vector<8x128xf32>
    %227 = vector.extract_strided_slice %224 {offsets = [0, 256], sizes = [8, 128], strides = [1, 1]} : vector<8x384xf32> to vector<8x128xf32>
    %228 = vector.extract_strided_slice %218 {offsets = [0, 384], sizes = [8, 128], strides = [1, 1]} : vector<8x512xf32> to vector<8x128xf32>
    %229 = math.tanh %228 : vector<8x128xf32>
    %230 = arith.mulf %226, %213 : vector<8x128xf32>
    %231 = arith.mulf %225, %229 : vector<8x128xf32>
    %232 = arith.addf %230, %231 : vector<8x128xf32>
    %233 = math.tanh %232 : vector<8x128xf32>
    %234 = arith.mulf %227, %233 : vector<8x128xf32>
    %c0_104 = arith.constant 0 : index
    %c0_105 = arith.constant 0 : index
    %235 = vector.load %arg5[%c0_104, %c0_105] : memref<128x512xf32, #tpu.memory_space<vmem>>, vector<128x512xf32>
    %cst_106 = arith.constant dense<0.000000e+00> : vector<8x512xf32>
    %236 = tpu.matmul %234, %235, %cst_106 {dimension_numbers = #tpu.dot_dimension_numbers<[1], [0], [0], [1], [0, 0, 1, 1], [], []>} : vector<8x128xf32>, vector<128x512xf32>, vector<8x512xf32> -> vector<8x512xf32>
    %c1_107 = arith.constant 1 : index
    %c0_108 = arith.constant 0 : index
    %c0_109 = arith.constant 0 : index
    %237 = vector.load %arg10[%c1_107, %c0_108, %c0_109] : memref<8x8x512xf32, #tpu.memory_space<vmem>>, vector<1x8x512xf32>
    %238 = vector.shape_cast %237 : vector<1x8x512xf32> to vector<8x512xf32>
    %239 = arith.addf %236, %238 : vector<8x512xf32>
    %240 = vector.extract_strided_slice %239 {offsets = [0, 0], sizes = [8, 384], strides = [1, 1]} : vector<8x512xf32> to vector<8x384xf32>
    %241 = arith.negf %240 : vector<8x384xf32>
    %242 = math.exp %241 : vector<8x384xf32>
    %cst_110 = arith.constant 1.000000e+00 : f32
    %243 = vector.broadcast %cst_110 : f32 to vector<8x384xf32>
    %244 = arith.addf %243, %242 : vector<8x384xf32>
    %245 = arith.divf %243, %244 : vector<8x384xf32>
    %246 = vector.extract_strided_slice %245 {offsets = [0, 0], sizes = [8, 128], strides = [1, 1]} : vector<8x384xf32> to vector<8x128xf32>
    %247 = vector.extract_strided_slice %245 {offsets = [0, 128], sizes = [8, 128], strides = [1, 1]} : vector<8x384xf32> to vector<8x128xf32>
    %248 = vector.extract_strided_slice %245 {offsets = [0, 256], sizes = [8, 128], strides = [1, 1]} : vector<8x384xf32> to vector<8x128xf32>
    %249 = vector.extract_strided_slice %239 {offsets = [0, 384], sizes = [8, 128], strides = [1, 1]} : vector<8x512xf32> to vector<8x128xf32>
    %250 = math.tanh %249 : vector<8x128xf32>
    %251 = arith.mulf %247, %232 : vector<8x128xf32>
    %252 = arith.mulf %246, %250 : vector<8x128xf32>
    %253 = arith.addf %251, %252 : vector<8x128xf32>
    %254 = math.tanh %253 : vector<8x128xf32>
    %255 = arith.mulf %248, %254 : vector<8x128xf32>
    %c0_111 = arith.constant 0 : index
    %c0_112 = arith.constant 0 : index
    %256 = vector.load %arg5[%c0_111, %c0_112] : memref<128x512xf32, #tpu.memory_space<vmem>>, vector<128x512xf32>
    %cst_113 = arith.constant dense<0.000000e+00> : vector<8x512xf32>
    %257 = tpu.matmul %255, %256, %cst_113 {dimension_numbers = #tpu.dot_dimension_numbers<[1], [0], [0], [1], [0, 0, 1, 1], [], []>} : vector<8x128xf32>, vector<128x512xf32>, vector<8x512xf32> -> vector<8x512xf32>
    %c2_114 = arith.constant 2 : index
    %c0_115 = arith.constant 0 : index
    %c0_116 = arith.constant 0 : index
    %258 = vector.load %arg10[%c2_114, %c0_115, %c0_116] : memref<8x8x512xf32, #tpu.memory_space<vmem>>, vector<1x8x512xf32>
    %259 = vector.shape_cast %258 : vector<1x8x512xf32> to vector<8x512xf32>
    %260 = arith.addf %257, %259 : vector<8x512xf32>
    %261 = vector.extract_strided_slice %260 {offsets = [0, 0], sizes = [8, 384], strides = [1, 1]} : vector<8x512xf32> to vector<8x384xf32>
    %262 = arith.negf %261 : vector<8x384xf32>
    %263 = math.exp %262 : vector<8x384xf32>
    %cst_117 = arith.constant 1.000000e+00 : f32
    %264 = vector.broadcast %cst_117 : f32 to vector<8x384xf32>
    %265 = arith.addf %264, %263 : vector<8x384xf32>
    %266 = arith.divf %264, %265 : vector<8x384xf32>
    %267 = vector.extract_strided_slice %266 {offsets = [0, 0], sizes = [8, 128], strides = [1, 1]} : vector<8x384xf32> to vector<8x128xf32>
    %268 = vector.extract_strided_slice %266 {offsets = [0, 128], sizes = [8, 128], strides = [1, 1]} : vector<8x384xf32> to vector<8x128xf32>
    %269 = vector.extract_strided_slice %266 {offsets = [0, 256], sizes = [8, 128], strides = [1, 1]} : vector<8x384xf32> to vector<8x128xf32>
    %270 = vector.extract_strided_slice %260 {offsets = [0, 384], sizes = [8, 128], strides = [1, 1]} : vector<8x512xf32> to vector<8x128xf32>
    %271 = math.tanh %270 : vector<8x128xf32>
    %272 = arith.mulf %268, %253 : vector<8x128xf32>
    %273 = arith.mulf %267, %271 : vector<8x128xf32>
    %274 = arith.addf %272, %273 : vector<8x128xf32>
    %275 = math.tanh %274 : vector<8x128xf32>
    %276 = arith.mulf %269, %275 : vector<8x128xf32>
    %c0_118 = arith.constant 0 : index
    %c0_119 = arith.constant 0 : index
    %277 = vector.load %arg5[%c0_118, %c0_119] : memref<128x512xf32, #tpu.memory_space<vmem>>, vector<128x512xf32>
    %cst_120 = arith.constant dense<0.000000e+00> : vector<8x512xf32>
    %278 = tpu.matmul %276, %277, %cst_120 {dimension_numbers = #tpu.dot_dimension_numbers<[1], [0], [0], [1], [0, 0, 1, 1], [], []>} : vector<8x128xf32>, vector<128x512xf32>, vector<8x512xf32> -> vector<8x512xf32>
    %c3_121 = arith.constant 3 : index
    %c0_122 = arith.constant 0 : index
    %c0_123 = arith.constant 0 : index
    %279 = vector.load %arg10[%c3_121, %c0_122, %c0_123] : memref<8x8x512xf32, #tpu.memory_space<vmem>>, vector<1x8x512xf32>
    %280 = vector.shape_cast %279 : vector<1x8x512xf32> to vector<8x512xf32>
    %281 = arith.addf %278, %280 : vector<8x512xf32>
    %282 = vector.extract_strided_slice %281 {offsets = [0, 0], sizes = [8, 384], strides = [1, 1]} : vector<8x512xf32> to vector<8x384xf32>
    %283 = arith.negf %282 : vector<8x384xf32>
    %284 = math.exp %283 : vector<8x384xf32>
    %cst_124 = arith.constant 1.000000e+00 : f32
    %285 = vector.broadcast %cst_124 : f32 to vector<8x384xf32>
    %286 = arith.addf %285, %284 : vector<8x384xf32>
    %287 = arith.divf %285, %286 : vector<8x384xf32>
    %288 = vector.extract_strided_slice %287 {offsets = [0, 0], sizes = [8, 128], strides = [1, 1]} : vector<8x384xf32> to vector<8x128xf32>
    %289 = vector.extract_strided_slice %287 {offsets = [0, 128], sizes = [8, 128], strides = [1, 1]} : vector<8x384xf32> to vector<8x128xf32>
    %290 = vector.extract_strided_slice %287 {offsets = [0, 256], sizes = [8, 128], strides = [1, 1]} : vector<8x384xf32> to vector<8x128xf32>
    %291 = vector.extract_strided_slice %281 {offsets = [0, 384], sizes = [8, 128], strides = [1, 1]} : vector<8x512xf32> to vector<8x128xf32>
    %292 = math.tanh %291 : vector<8x128xf32>
    %293 = arith.mulf %289, %274 : vector<8x128xf32>
    %294 = arith.mulf %288, %292 : vector<8x128xf32>
    %295 = arith.addf %293, %294 : vector<8x128xf32>
    %296 = math.tanh %295 : vector<8x128xf32>
    %297 = arith.mulf %290, %296 : vector<8x128xf32>
    %c0_125 = arith.constant 0 : index
    %c0_126 = arith.constant 0 : index
    %298 = vector.load %arg5[%c0_125, %c0_126] : memref<128x512xf32, #tpu.memory_space<vmem>>, vector<128x512xf32>
    %cst_127 = arith.constant dense<0.000000e+00> : vector<8x512xf32>
    %299 = tpu.matmul %297, %298, %cst_127 {dimension_numbers = #tpu.dot_dimension_numbers<[1], [0], [0], [1], [0, 0, 1, 1], [], []>} : vector<8x128xf32>, vector<128x512xf32>, vector<8x512xf32> -> vector<8x512xf32>
    %c4_128 = arith.constant 4 : index
    %c0_129 = arith.constant 0 : index
    %c0_130 = arith.constant 0 : index
    %300 = vector.load %arg10[%c4_128, %c0_129, %c0_130] : memref<8x8x512xf32, #tpu.memory_space<vmem>>, vector<1x8x512xf32>
    %301 = vector.shape_cast %300 : vector<1x8x512xf32> to vector<8x512xf32>
    %302 = arith.addf %299, %301 : vector<8x512xf32>
    %303 = vector.extract_strided_slice %302 {offsets = [0, 0], sizes = [8, 384], strides = [1, 1]} : vector<8x512xf32> to vector<8x384xf32>
    %304 = arith.negf %303 : vector<8x384xf32>
    %305 = math.exp %304 : vector<8x384xf32>
    %cst_131 = arith.constant 1.000000e+00 : f32
    %306 = vector.broadcast %cst_131 : f32 to vector<8x384xf32>
    %307 = arith.addf %306, %305 : vector<8x384xf32>
    %308 = arith.divf %306, %307 : vector<8x384xf32>
    %309 = vector.extract_strided_slice %308 {offsets = [0, 0], sizes = [8, 128], strides = [1, 1]} : vector<8x384xf32> to vector<8x128xf32>
    %310 = vector.extract_strided_slice %308 {offsets = [0, 128], sizes = [8, 128], strides = [1, 1]} : vector<8x384xf32> to vector<8x128xf32>
    %311 = vector.extract_strided_slice %308 {offsets = [0, 256], sizes = [8, 128], strides = [1, 1]} : vector<8x384xf32> to vector<8x128xf32>
    %312 = vector.extract_strided_slice %302 {offsets = [0, 384], sizes = [8, 128], strides = [1, 1]} : vector<8x512xf32> to vector<8x128xf32>
    %313 = math.tanh %312 : vector<8x128xf32>
    %314 = arith.mulf %310, %295 : vector<8x128xf32>
    %315 = arith.mulf %309, %313 : vector<8x128xf32>
    %316 = arith.addf %314, %315 : vector<8x128xf32>
    %317 = math.tanh %316 : vector<8x128xf32>
    %318 = arith.mulf %311, %317 : vector<8x128xf32>
    %c0_132 = arith.constant 0 : index
    %c0_133 = arith.constant 0 : index
    %319 = vector.load %arg5[%c0_132, %c0_133] : memref<128x512xf32, #tpu.memory_space<vmem>>, vector<128x512xf32>
    %cst_134 = arith.constant dense<0.000000e+00> : vector<8x512xf32>
    %320 = tpu.matmul %318, %319, %cst_134 {dimension_numbers = #tpu.dot_dimension_numbers<[1], [0], [0], [1], [0, 0, 1, 1], [], []>} : vector<8x128xf32>, vector<128x512xf32>, vector<8x512xf32> -> vector<8x512xf32>
    %c5_135 = arith.constant 5 : index
    %c0_136 = arith.constant 0 : index
    %c0_137 = arith.constant 0 : index
    %321 = vector.load %arg10[%c5_135, %c0_136, %c0_137] : memref<8x8x512xf32, #tpu.memory_space<vmem>>, vector<1x8x512xf32>
    %322 = vector.shape_cast %321 : vector<1x8x512xf32> to vector<8x512xf32>
    %323 = arith.addf %320, %322 : vector<8x512xf32>
    %324 = vector.extract_strided_slice %323 {offsets = [0, 0], sizes = [8, 384], strides = [1, 1]} : vector<8x512xf32> to vector<8x384xf32>
    %325 = arith.negf %324 : vector<8x384xf32>
    %326 = math.exp %325 : vector<8x384xf32>
    %cst_138 = arith.constant 1.000000e+00 : f32
    %327 = vector.broadcast %cst_138 : f32 to vector<8x384xf32>
    %328 = arith.addf %327, %326 : vector<8x384xf32>
    %329 = arith.divf %327, %328 : vector<8x384xf32>
    %330 = vector.extract_strided_slice %329 {offsets = [0, 0], sizes = [8, 128], strides = [1, 1]} : vector<8x384xf32> to vector<8x128xf32>
    %331 = vector.extract_strided_slice %329 {offsets = [0, 128], sizes = [8, 128], strides = [1, 1]} : vector<8x384xf32> to vector<8x128xf32>
    %332 = vector.extract_strided_slice %329 {offsets = [0, 256], sizes = [8, 128], strides = [1, 1]} : vector<8x384xf32> to vector<8x128xf32>
    %333 = vector.extract_strided_slice %323 {offsets = [0, 384], sizes = [8, 128], strides = [1, 1]} : vector<8x512xf32> to vector<8x128xf32>
    %334 = math.tanh %333 : vector<8x128xf32>
    %335 = arith.mulf %331, %316 : vector<8x128xf32>
    %336 = arith.mulf %330, %334 : vector<8x128xf32>
    %337 = arith.addf %335, %336 : vector<8x128xf32>
    %338 = math.tanh %337 : vector<8x128xf32>
    %339 = arith.mulf %332, %338 : vector<8x128xf32>
    %c0_139 = arith.constant 0 : index
    %c0_140 = arith.constant 0 : index
    %340 = vector.load %arg5[%c0_139, %c0_140] : memref<128x512xf32, #tpu.memory_space<vmem>>, vector<128x512xf32>
    %cst_141 = arith.constant dense<0.000000e+00> : vector<8x512xf32>
    %341 = tpu.matmul %339, %340, %cst_141 {dimension_numbers = #tpu.dot_dimension_numbers<[1], [0], [0], [1], [0, 0, 1, 1], [], []>} : vector<8x128xf32>, vector<128x512xf32>, vector<8x512xf32> -> vector<8x512xf32>
    %c6_142 = arith.constant 6 : index
    %c0_143 = arith.constant 0 : index
    %c0_144 = arith.constant 0 : index
    %342 = vector.load %arg10[%c6_142, %c0_143, %c0_144] : memref<8x8x512xf32, #tpu.memory_space<vmem>>, vector<1x8x512xf32>
    %343 = vector.shape_cast %342 : vector<1x8x512xf32> to vector<8x512xf32>
    %344 = arith.addf %341, %343 : vector<8x512xf32>
    %345 = vector.extract_strided_slice %344 {offsets = [0, 0], sizes = [8, 384], strides = [1, 1]} : vector<8x512xf32> to vector<8x384xf32>
    %346 = arith.negf %345 : vector<8x384xf32>
    %347 = math.exp %346 : vector<8x384xf32>
    %cst_145 = arith.constant 1.000000e+00 : f32
    %348 = vector.broadcast %cst_145 : f32 to vector<8x384xf32>
    %349 = arith.addf %348, %347 : vector<8x384xf32>
    %350 = arith.divf %348, %349 : vector<8x384xf32>
    %351 = vector.extract_strided_slice %350 {offsets = [0, 0], sizes = [8, 128], strides = [1, 1]} : vector<8x384xf32> to vector<8x128xf32>
    %352 = vector.extract_strided_slice %350 {offsets = [0, 128], sizes = [8, 128], strides = [1, 1]} : vector<8x384xf32> to vector<8x128xf32>
    %353 = vector.extract_strided_slice %350 {offsets = [0, 256], sizes = [8, 128], strides = [1, 1]} : vector<8x384xf32> to vector<8x128xf32>
    %354 = vector.extract_strided_slice %344 {offsets = [0, 384], sizes = [8, 128], strides = [1, 1]} : vector<8x512xf32> to vector<8x128xf32>
    %355 = math.tanh %354 : vector<8x128xf32>
    %356 = arith.mulf %352, %337 : vector<8x128xf32>
    %357 = arith.mulf %351, %355 : vector<8x128xf32>
    %358 = arith.addf %356, %357 : vector<8x128xf32>
    %359 = math.tanh %358 : vector<8x128xf32>
    %360 = arith.mulf %353, %359 : vector<8x128xf32>
    %c0_146 = arith.constant 0 : index
    %c0_147 = arith.constant 0 : index
    %361 = vector.load %arg5[%c0_146, %c0_147] : memref<128x512xf32, #tpu.memory_space<vmem>>, vector<128x512xf32>
    %cst_148 = arith.constant dense<0.000000e+00> : vector<8x512xf32>
    %362 = tpu.matmul %360, %361, %cst_148 {dimension_numbers = #tpu.dot_dimension_numbers<[1], [0], [0], [1], [0, 0, 1, 1], [], []>} : vector<8x128xf32>, vector<128x512xf32>, vector<8x512xf32> -> vector<8x512xf32>
    %c7_149 = arith.constant 7 : index
    %c0_150 = arith.constant 0 : index
    %c0_151 = arith.constant 0 : index
    %363 = vector.load %arg10[%c7_149, %c0_150, %c0_151] : memref<8x8x512xf32, #tpu.memory_space<vmem>>, vector<1x8x512xf32>
    %364 = vector.shape_cast %363 : vector<1x8x512xf32> to vector<8x512xf32>
    %365 = arith.addf %362, %364 : vector<8x512xf32>
    %366 = vector.extract_strided_slice %365 {offsets = [0, 0], sizes = [8, 384], strides = [1, 1]} : vector<8x512xf32> to vector<8x384xf32>
    %367 = arith.negf %366 : vector<8x384xf32>
    %368 = math.exp %367 : vector<8x384xf32>
    %cst_152 = arith.constant 1.000000e+00 : f32
    %369 = vector.broadcast %cst_152 : f32 to vector<8x384xf32>
    %370 = arith.addf %369, %368 : vector<8x384xf32>
    %371 = arith.divf %369, %370 : vector<8x384xf32>
    %372 = vector.extract_strided_slice %371 {offsets = [0, 0], sizes = [8, 128], strides = [1, 1]} : vector<8x384xf32> to vector<8x128xf32>
    %373 = vector.extract_strided_slice %371 {offsets = [0, 128], sizes = [8, 128], strides = [1, 1]} : vector<8x384xf32> to vector<8x128xf32>
    %374 = vector.extract_strided_slice %371 {offsets = [0, 256], sizes = [8, 128], strides = [1, 1]} : vector<8x384xf32> to vector<8x128xf32>
    %375 = vector.extract_strided_slice %365 {offsets = [0, 384], sizes = [8, 128], strides = [1, 1]} : vector<8x512xf32> to vector<8x128xf32>
    %376 = math.tanh %375 : vector<8x128xf32>
    %377 = arith.mulf %373, %358 : vector<8x128xf32>
    %378 = arith.mulf %372, %376 : vector<8x128xf32>
    %379 = arith.addf %377, %378 : vector<8x128xf32>
    %380 = math.tanh %379 : vector<8x128xf32>
    %381 = arith.mulf %374, %380 : vector<8x128xf32>
    %c0_153 = arith.constant 0 : index
    %c0_154 = arith.constant 0 : index
    %382 = vector.load %arg7[%c0_153, %c0_154] : memref<128x128xf32, #tpu.memory_space<vmem>>, vector<128x128xf32>
    %cst_155 = arith.constant dense<0.000000e+00> : vector<8x128xf32>
    %383 = tpu.matmul %381, %382, %cst_155 {dimension_numbers = #tpu.dot_dimension_numbers<[1], [0], [0], [1], [0, 0, 1, 1], [], []>} : vector<8x128xf32>, vector<128x128xf32>, vector<8x128xf32> -> vector<8x128xf32>
    %c0_156 = arith.constant 0 : index
    %c0_157 = arith.constant 0 : index
    %384 = vector.load %arg8[%c0_156, %c0_157] : memref<1x128xf32, #tpu.memory_space<vmem>>, vector<1x128xf32>
    %385 = vector.broadcast %384 : vector<1x128xf32> to vector<8x128xf32>
    %386 = arith.addf %383, %385 : vector<8x128xf32>
    %c0_158 = arith.constant 0 : index
    %c0_159 = arith.constant 0 : index
    %387 = vector.load %arg9[%c0_158, %c0_159] : memref<8x128xf32, #tpu.memory_space<vmem>>, vector<8x128xf32>
    tpu.vector_store %arg9[%c0_158, %c0_159], %386 {strides = array<i32>} : memref<8x128xf32, #tpu.memory_space<vmem>>, vector<8x128xf32>,
    return
  }
}

</mosaic_0001>

<bundles_post_ra>
// kernel: lstm_model_forward.1
= control target key start
LH: loop header
LB: loop body
LE: loop exit
PB: predicated region body
PF: predicated region fallthrough
CT: control target
= control target key end

     0   :  { %14 = vsyncpa [#allocation5], 0  ;;  %s7156_s0 = inlined_call_operand.vmem [shape: f32[8,8,128], index: 0, kind: input, shape index: {}]   ;;  %s7157_s1 = inlined_call_operand.hbm [shape: f32[128,512], index: 1, kind: input, shape index: {}]   ;;  %s7158_s2 = inlined_call_operand.hbm [shape: f32[128,512], index: 2, kind: input, shape index: {}]   ;;  %s7159_s3 = inlined_call_operand.vmem [shape: f32[1,512], index: 3, kind: input, shape index: {}]   ;;  %s7160_s4 = inlined_call_operand.hbm [shape: f32[128,512], index: 4, kind: input, shape index: {}]   ;;  %s7161_s5 = inlined_call_operand.hbm [shape: f32[128,512], index: 5, kind: input, shape index: {}]   ;;  %s7162_s6 = inlined_call_operand.vmem [shape: f32[1,512], index: 6, kind: input, shape index: {}]   ;;  %s7163_s7 = inlined_call_operand.vmem [shape: f32[128,128], index: 7, kind: input, shape index: {}]   ;;  %s7164_s8 = inlined_call_operand.vmem [shape: f32[1,128], index: 8, kind: input, shape index: {}]   ;;  %s7165_s9 = inlined_call_operand.vmem [shape: f32[8,128], index: 9, kind: output, shape index: {}]  }
   0x1   :  { %15 = vsyncpa [#allocation7], 0 }
   0x2   :  { %16 = vsyncpa [#allocation10], 0  ;;  %s5974_s30 = smov [#allocation6]   ;;  %s5975_s11 = smov [#allocation4]  }
   0x3   :  { %s36_s10 = sshll.u32 %s5974_s30, 4  ;;  %s24_s12 = sshll.u32 %s5975_s11, 4  ;;  %s37_s10 = int_to_ptr.vmem [resolvable:$true] %s36_s10  ;;  %s6033_s12 = int_to_ptr.vmem [resolvable:$true] %s24_s12 }
   0x4   :  { %s5880_s15 = scalar_lea.hbm %s7158_s2, 8192 }
   0x5   :  { %p5881_p0 = scmp.ne.s32.totalorder %s7158_s2, %s5880_s15  ;;  %p5884_p1 = scmp.lt.u32.totalorder %s5880_s15, %s7158_s2 }
   0x7   :  { %p5886_p2 = pnand %p5884_p1, %p5881_p0 }
   0x9   :  { %5889 = shalt.err (!%p5886_p2)
}
   0xa   :  { %s5890_s20 = scalar_lea.vmem %s37_s10, 8192  ;;  %p5895_p4 = scmp.lt.s32.totalorder %s37_s10, %s37_s10 }
   0xb   :  { %p5891_p3 = scmp.ne.s32.totalorder %s37_s10, %s5890_s20  ;;  %p5896_p5 = scmp.lt.s32.totalorder %s5890_s20, %s5890_s20 }
   0xd   :  { %p5897_p6 = por %p5896_p5, %p5895_p4 }
   0xf   :  { %p5898_p7 = pnand %p5897_p6, %p5891_p3 }
  0x11   :  { %5901 = shalt.err (!%p5898_p7)
}
  0x12   :  { %s5976_s21 = smov 512   ;;  %s5977_s22 = smov 32  }
  0x13   :  { %42 = dma.hbm_to_vmem [thread:$0]  %s7158_s2, 8192, %s37_s10, [#allocation7], %s5976_s21, %s5976_s21, %s5977_s22  }
  0x14   :  { %s5902_s27 = scalar_lea.hbm %s7157_s1, 8192 }
  0x15   :  { %p5903_p8 = scmp.ne.s32.totalorder %s7157_s1, %s5902_s27  ;;  %p5906_p9 = scmp.lt.u32.totalorder %s5902_s27, %s7157_s1 }
  0x17   :  { %p5908_p10 = pnand %p5906_p9, %p5903_p8 }
  0x19   :  { %5911 = shalt.err (!%p5908_p10)
}
  0x1a   :  { %s5912_s13 = scalar_lea.vmem %s6033_s12, 8192  ;;  %p5917_p12 = scmp.lt.s32.totalorder %s6033_s12, %s6033_s12 }
  0x1b   :  { %p5913_p11 = scmp.ne.s32.totalorder %s6033_s12, %s5912_s13  ;;  %p5918_p13 = scmp.lt.s32.totalorder %s5912_s13, %s5912_s13 }
  0x1d   :  { %p5919_p0 = por %p5918_p13, %p5917_p12 }
  0x1f   :  { %p5920_p1 = pnand %p5919_p0, %p5913_p11 }
  0x21   :  { %5923 = shalt.err (!%p5920_p1)
}
  0x22   :  { %30 = dma.hbm_to_vmem [thread:$0]  %s7157_s1, 8192, %s6033_s12, [#allocation5], %s5976_s21, %s5976_s21, %s5977_s22  }
  0x23   :  { %s5978_s14 = smov [#allocation8]   ;;  %s5979_s16 = smov [#allocation9]  }
  0x24   :  { %s50_s15 = sshll.u32 %s5978_s14, 4  ;;  %s62_s17 = sshll.u32 %s5979_s16, 4  ;;  %s51_s15 = int_to_ptr.vmem [resolvable:$true] %s50_s15  ;;  %s6070_s17 = int_to_ptr.vmem [resolvable:$true] %s62_s17 }
  0x25   :  { %s5924_s20 = scalar_lea.hbm %s7160_s4, 8192 }
  0x26   :  { %p5925_p2 = scmp.ne.s32.totalorder %s7160_s4, %s5924_s20  ;;  %p5928_p3 = scmp.lt.u32.totalorder %s5924_s20, %s7160_s4 }
  0x28   :  { %p5930_p4 = pnand %p5928_p3, %p5925_p2 }
  0x2a   :  { %5933 = shalt.err (!%p5930_p4)
}
  0x2b   :  { %s5934_s1 = scalar_lea.vmem %s51_s15, 8192  ;;  %p5939_p6 = scmp.lt.s32.totalorder %s51_s15, %s51_s15 }
  0x2c   :  { %p5935_p5 = scmp.ne.s32.totalorder %s51_s15, %s5934_s1  ;;  %p5940_p7 = scmp.lt.s32.totalorder %s5934_s1, %s5934_s1 }
  0x2e   :  { %p5941_p8 = por %p5940_p7, %p5939_p6 }
  0x30   :  { %p5942_p9 = pnand %p5941_p8, %p5935_p5 }
  0x32   :  { %5945 = shalt.err (!%p5942_p9)
}
  0x33   :  { %56 = dma.hbm_to_vmem [thread:$0]  %s7160_s4, 8192, %s51_s15, [#allocation7], %s5976_s21, %s5976_s21, %s5977_s22  }
  0x34   :  { %s5946_s30 = scalar_lea.hbm %s7161_s5, 8192 }
  0x35   :  { %p5947_p10 = scmp.ne.s32.totalorder %s7161_s5, %s5946_s30  ;;  %p5950_p11 = scmp.lt.u32.totalorder %s5946_s30, %s7161_s5 }
  0x37   :  { %p5952_p12 = pnand %p5950_p11, %p5947_p10 }
  0x39   :  { %5955 = shalt.err (!%p5952_p12)
}
  0x3a   :  { %s5956_s14 = scalar_lea.vmem %s6070_s17, 8192  ;;  %p5961_p0 = scmp.lt.s32.totalorder %s6070_s17, %s6070_s17 }
  0x3b   :  { %p5957_p13 = scmp.ne.s32.totalorder %s6070_s17, %s5956_s14  ;;  %p5962_p1 = scmp.lt.s32.totalorder %s5956_s14, %s5956_s14 }
  0x3d   :  { %p5963_p2 = por %p5962_p1, %p5961_p0 }
  0x3f   :  { %p5964_p3 = pnand %p5963_p2, %p5957_p13 }
  0x41   :  { %5967 = shalt.err (!%p5964_p3)
}
  0x42   :  { %68 = dma.hbm_to_vmem [thread:$0]  %s7161_s5, 8192, %s6070_s17, [#allocation10], %s5976_s21, %s5976_s21, %s5977_s22  }
  0x43   :  { %5968 = dma.done.wait [#allocation5], 8192  }
  0x44   :  { %5969 = vsyncadd [#allocation5], 4294959104 }
  0x45   :  { %5970 = dma.done.wait [#allocation7], 16384  }
  0x46   :  { %5971 = vsyncadd [#allocation7], 4294950912 }
  0x47   :  { %5972 = dma.done.wait [#allocation10], 8192  }
  0x48   :  { %5973 = vsyncadd [#allocation10], 4294959104  ;;  %v5980_v0 = vmov 0.0   ;;  %v96_v1 = vld [vmem:[#allocation4 + $0x8] sm:$0xff]  ;;  %v98_v3 = vld [vmem:[#allocation4 + $0x18] sm:$0xff]  ;;  %vm5982_vm0 = vmmov 0  }
  0x49   :  { %245 = vmatprep.mubr.f32.mxu0 %v5980_v0  ;;  %358 = vmatprep.mubr.f32.mxu1 %v5980_v0  ;;  %v100_v2 = vld [vmem:[#allocation4 + $0x28] sm:$0xff]  ;;  %v102_v5 = vld [vmem:[#allocation4 + $0x38] sm:$0xff]  ;;  %v95_v6 = vld [vmem:[#allocation4] sm:$0xff] }
  0x4a   :  { %v4311_v4 = vpack.c.bf16 %v100_v2, %v96_v1  ;;  %v99_v7 = vld [vmem:[#allocation4 + $0x20] sm:$0xff]  ;;  %v4343_v8 = vpack.c.bf16 %v102_v5, %v98_v3  ;;  %v97_v10 = vld [vmem:[#allocation4 + $0x10] sm:$0xff]  ;;  %v104_v12 = vld [vmem:[#allocation4 + $0x48] sm:$0xff] }
  0x4b   :  { %v4313_v9 = vpack.c.bf16 %v99_v7, %v95_v6  ;;  %v101_v11 = vld [vmem:[#allocation4 + $0x30] sm:$0xff]  ;;  %v108_v14 = vld [vmem:[#allocation4 + $0x68] sm:$0xff]  ;;  %v106_v15 = vld [vmem:[#allocation4 + $0x58] sm:$0xff] }
  0x4c   :  { %4312 = vmatprep.subr.bf16.mxu0 %v4311_v4  ;;  %v4345_v13 = vpack.c.bf16 %v101_v11, %v97_v10  ;;  %v110_v16 = vld [vmem:[#allocation4 + $0x78] sm:$0xff]  ;;  %4344 = vmatprep.subr.bf16.mxu1 %v4343_v8  ;;  %v4315_v17 = vpack.c.bf16 %v108_v14, %v104_v12  ;;  %v103_v19 = vld [vmem:[#allocation4 + $0x40] sm:$0xff]  ;;  %v105_v21 = vld [vmem:[#allocation4 + $0x50] sm:$0xff] }
  0x4d   :  { %4314 = vmatpush1.bf16.msra.mxu0 %v4313_v9  ;;  %v4347_v18 = vpack.c.bf16 %v110_v16, %v106_v15  ;;  %v107_v20 = vld [vmem:[#allocation4 + $0x60] sm:$0xff]  ;;  %v109_v23 = vld [vmem:[#allocation4 + $0x70] sm:$0xff]  ;;  %v112_v24 = vld [vmem:[#allocation4 + $0x88] sm:$0xff] }
  0x4e   :  { %4346 = vmatpush1.bf16.msra.mxu1 %v4345_v13  ;;  %v4317_v22 = vpack.c.bf16 %v107_v20, %v103_v19  ;;  %v116_v25 = vld [vmem:[#allocation4 + $0xa8] sm:$0xff]  ;;  %4316 = vmatprep.subr.bf16.mxu0 %v4315_v17  ;;  %v4349_v26 = vpack.c.bf16 %v109_v23, %v105_v21  ;;  %v114_v28 = vld [vmem:[#allocation4 + $0x98] sm:$0xff]  ;;  %v111_v30 = vld [vmem:[#allocation4 + $0x80] sm:$0xff] }
  0x4f   :  { %4348 = vmatprep.subr.bf16.mxu1 %v4347_v18  ;;  %v4319_v27 = vpack.c.bf16 %v116_v25, %v112_v24  ;;  %v118_v29 = vld [vmem:[#allocation4 + $0xb8] sm:$0xff]  ;;  %v115_v32 = vld [vmem:[#allocation4 + $0xa0] sm:$0xff]  ;;  %v113_v33 = vld [vmem:[#allocation4 + $0x90] sm:$0xff] }
  0x50   :  { %v4351_v31 = vpack.c.bf16 %v118_v29, %v114_v28  ;;  %v117_v34 = vld [vmem:[#allocation4 + $0xb0] sm:$0xff]  ;;  %v4321_v35 = vpack.c.bf16 %v115_v32, %v111_v30  ;;  %v120_v36 = vld [vmem:[#allocation4 + $0xc8] sm:$0xff]  ;;  %v122_v38 = vld [vmem:[#allocation4 + $0xd8] sm:$0xff] }
  0x51   :  { %4318 = vmatpush1.bf16.msra.mxu0 %v4317_v22  ;;  %v124_v37 = vld [vmem:[#allocation4 + $0xe8] sm:$0xff]  ;;  %v4353_v39 = vpack.c.bf16 %v117_v34, %v113_v33  ;;  %v126_v41 = vld [vmem:[#allocation4 + $0xf8] sm:$0xff]  ;;  %v119_v42 = vld [vmem:[#allocation4 + $0xc0] sm:$0xff] }
  0x52   :  { %4350 = vmatpush1.bf16.msra.mxu1 %v4349_v26  ;;  %4320 = vmatprep.subr.bf16.mxu0 %v4319_v27  ;;  %v4323_v40 = vpack.c.bf16 %v124_v37, %v120_v36  ;;  %v123_v43 = vld [vmem:[#allocation4 + $0xe0] sm:$0xff]  ;;  %v4355_v44 = vpack.c.bf16 %v126_v41, %v122_v38  ;;  %v121_v45 = vld [vmem:[#allocation4 + $0xd0] sm:$0xff]  ;;  %v128_v47 = vld [vmem:[#allocation4 + $0x108] sm:$0xff] }
  0x53   :  { %4352 = vmatprep.subr.bf16.mxu1 %v4351_v31  ;;  %v125_v46 = vld [vmem:[#allocation4 + $0xf0] sm:$0xff]  ;;  %v132_v48 = vld [vmem:[#allocation4 + $0x128] sm:$0xff]  ;;  %v130_v49 = vld [vmem:[#allocation4 + $0x118] sm:$0xff]  ;;  %v4325_v51 = vpack.c.bf16 %v123_v43, %v119_v42 }
  0x54   :  { %v134_v50 = vld [vmem:[#allocation4 + $0x138] sm:$0xff]  ;;  %v4357_v52 = vpack.c.bf16 %v125_v46, %v121_v45  ;;  %v4327_v53 = vpack.c.bf16 %v132_v48, %v128_v47  ;;  %v127_v54 = vld [vmem:[#allocation4 + $0x100] sm:$0xff]  ;;  %v129_v56 = vld [vmem:[#allocation4 + $0x110] sm:$0xff] }
  0x55   :  { %4322 = vmatpush1.bf16.msra.mxu0 %v4321_v35  ;;  %v131_v55 = vld [vmem:[#allocation4 + $0x120] sm:$0xff]  ;;  %v4359_v57 = vpack.c.bf16 %v134_v50, %v130_v49  ;;  %v133_v58 = vld [vmem:[#allocation4 + $0x130] sm:$0xff]  ;;  %v136_v59 = vld [vmem:[#allocation4 + $0x148] sm:$0xff] }
  0x56   :  { %4354 = vmatpush1.bf16.msra.mxu1 %v4353_v39  ;;  %4324 = vmatprep.subr.bf16.mxu0 %v4323_v40  ;;  %v140_v60 = vld [vmem:[#allocation4 + $0x168] sm:$0xff]  ;;  %v138_v61 = vld [vmem:[#allocation4 + $0x158] sm:$0xff]  ;;  %v4329_v63 = vpack.c.bf16 %v131_v55, %v127_v54  ;;  %v4361_v1 = vpack.c.bf16 %v133_v58, %v129_v56  ;;  %v135_v3 = vld [vmem:[#allocation4 + $0x140] sm:$0xff] }
  0x57   :  { %4356 = vmatprep.subr.bf16.mxu1 %v4355_v44  ;;  %v142_v62 = vld [vmem:[#allocation4 + $0x178] sm:$0xff]  ;;  %v4331_v2 = vpack.c.bf16 %v140_v60, %v136_v59  ;;  %v139_v4 = vld [vmem:[#allocation4 + $0x160] sm:$0xff]  ;;  %v137_v5 = vld [vmem:[#allocation4 + $0x150] sm:$0xff] }
  0x58   :  { %v4363_v6 = vpack.c.bf16 %v142_v62, %v138_v61  ;;  %v141_v7 = vld [vmem:[#allocation4 + $0x170] sm:$0xff]  ;;  %v144_v8 = vld [vmem:[#allocation4 + $0x188] sm:$0xff]  ;;  %v146_v10 = vld [vmem:[#allocation4 + $0x198] sm:$0xff]  ;;  %v4333_v12 = vpack.c.bf16 %v139_v4, %v135_v3 }
  0x59   :  { %4326 = vmatpush1.bf16.msra.mxu0 %v4325_v51  ;;  %v148_v9 = vld [vmem:[#allocation4 + $0x1a8] sm:$0xff]  ;;  %v150_v11 = vld [vmem:[#allocation4 + $0x1b8] sm:$0xff]  ;;  %v4365_v13 = vpack.c.bf16 %v141_v7, %v137_v5  ;;  %v143_v15 = vld [vmem:[#allocation4 + $0x180] sm:$0xff] }
  0x5a   :  { %4358 = vmatpush1.bf16.msra.mxu1 %v4357_v52  ;;  %4328 = vmatprep.subr.bf16.mxu0 %v4327_v53  ;;  %v4335_v14 = vpack.c.bf16 %v148_v9, %v144_v8  ;;  %v147_v16 = vld [vmem:[#allocation4 + $0x1a0] sm:$0xff]  ;;  %v145_v17 = vld [vmem:[#allocation4 + $0x190] sm:$0xff]  ;;  %v4367_v18 = vpack.c.bf16 %v150_v11, %v146_v10  ;;  %v152_v20 = vld [vmem:[#allocation4 + $0x1c8] sm:$0xff] }
  0x5b   :  { %4360 = vmatprep.subr.bf16.mxu1 %v4359_v57  ;;  %v149_v19 = vld [vmem:[#allocation4 + $0x1b0] sm:$0xff]  ;;  %v156_v21 = vld [vmem:[#allocation4 + $0x1e8] sm:$0xff]  ;;  %v154_v22 = vld [vmem:[#allocation4 + $0x1d8] sm:$0xff]  ;;  %v4337_v24 = vpack.c.bf16 %v147_v16, %v143_v15 }
  0x5c   :  { %v158_v23 = vld [vmem:[#allocation4 + $0x1f8] sm:$0xff]  ;;  %v4369_v25 = vpack.c.bf16 %v149_v19, %v145_v17  ;;  %v4339_v26 = vpack.c.bf16 %v156_v21, %v152_v20  ;;  %v151_v27 = vld [vmem:[#allocation4 + $0x1c0] sm:$0xff]  ;;  %v153_v29 = vld [vmem:[#allocation4 + $0x1d0] sm:$0xff] }
  0x5d   :  { %4330 = vmatpush1.bf16.msra.mxu0 %v4329_v63  ;;  %v155_v28 = vld [vmem:[#allocation4 + $0x1e0] sm:$0xff]  ;;  %v4371_v30 = vpack.c.bf16 %v158_v23, %v154_v22  ;;  %v157_v31 = vld [vmem:[#allocation4 + $0x1f0] sm:$0xff]  ;;  %v440_v32 = vld [vmem:[#allocation6 + $0x8] sm:$0xff] }
  0x5e   :  { %4362 = vmatpush1.bf16.msra.mxu1 %v4361_v1  ;;  %4332 = vmatprep.subr.bf16.mxu0 %v4331_v2  ;;  %v444_v33 = vld [vmem:[#allocation6 + $0x28] sm:$0xff]  ;;  %v442_v34 = vld [vmem:[#allocation6 + $0x18] sm:$0xff]  ;;  %v4341_v36 = vpack.c.bf16 %v155_v28, %v151_v27  ;;  %v4373_v37 = vpack.c.bf16 %v157_v31, %v153_v29  ;;  %v439_v39 = vld [vmem:[#allocation6] sm:$0xff] }
  0x5f   :  { %4364 = vmatprep.subr.bf16.mxu1 %v4363_v6  ;;  %v446_v35 = vld [vmem:[#allocation6 + $0x38] sm:$0xff]  ;;  %v6109_v38 = vpack.c.bf16 %v444_v33, %v440_v32  ;;  %v443_v40 = vld [vmem:[#allocation6 + $0x20] sm:$0xff]  ;;  %v441_v42 = vld [vmem:[#allocation6 + $0x10] sm:$0xff] }
  0x60   :  { %v6111_v41 = vpack.c.bf16 %v446_v35, %v442_v34  ;;  %v445_v43 = vld [vmem:[#allocation6 + $0x30] sm:$0xff]  ;;  %v448_v44 = vld [vmem:[#allocation6 + $0x48] sm:$0xff]  ;;  %v87_v46 = vld [vmem:[%s7156_s0] sm:$0xff]  ;;  %v6116_v47 = vpack.c.bf16 %v443_v40, %v439_v39 }
  0x61   :  { %4334 = vmatpush1.bf16.msra.mxu0 %v4333_v12  ;;  %v452_v45 = vld [vmem:[#allocation6 + $0x68] sm:$0xff]  ;;  %v450_v48 = vld [vmem:[#allocation6 + $0x58] sm:$0xff]  ;;  %v6119_v50 = vpack.c.bf16 %v445_v43, %v441_v42  ;;  %v447_v51 = vld [vmem:[#allocation6 + $0x40] sm:$0xff] }
  0x62   :  { %4366 = vmatpush1.bf16.msra.mxu1 %v4365_v13  ;;  %4336 = vmatprep.subr.bf16.mxu0 %v4335_v14  ;;  %v454_v49 = vld [vmem:[#allocation6 + $0x78] sm:$0xff]  ;;  %v451_v52 = vld [vmem:[#allocation6 + $0x60] sm:$0xff]  ;;  %v6122_v53 = vpack.c.bf16 %v452_v45, %v448_v44  ;;  %v449_v54 = vld [vmem:[#allocation6 + $0x50] sm:$0xff] }
  0x63   :  { %4368 = vmatprep.subr.bf16.mxu1 %v4367_v18  ;;  %v453_v55 = vld [vmem:[#allocation6 + $0x70] sm:$0xff]  ;;  %v6124_v56 = vpack.c.bf16 %v454_v49, %v450_v48  ;;  %v456_v57 = vld [vmem:[#allocation6 + $0x88] sm:$0xff]  ;;  %v6130_v60 = vpack.c.bf16 %v451_v52, %v447_v51  ;;  %v458_v61 = vld [vmem:[#allocation6 + $0x98] sm:$0xff] }
  0x64   :  { %v460_v58 = vld [vmem:[#allocation6 + $0xa8] sm:$0xff]  ;;  %v462_v62 = vld [vmem:[#allocation6 + $0xb8] sm:$0xff]  ;;  %v6134_v63 = vpack.c.bf16 %v453_v55, %v449_v54  ;;  %v455_v1 = vld [vmem:[#allocation6 + $0x80] sm:$0xff] }
  0x65   :  { %4338 = vmatpush1.bf16.msra.mxu0 %v4337_v24  ;;  %v88_v59 = vld [vmem:[%s7156_s0 + $0x8] sm:$0xff]  ;;  %v459_v2 = vld [vmem:[#allocation6 + $0xa0] sm:$0xff]  ;;  %v6138_v3 = vpack.c.bf16 %v460_v58, %v456_v57  ;;  %v457_v4 = vld [vmem:[#allocation6 + $0x90] sm:$0xff]  ;;  %v6141_v6 = vpack.c.bf16 %v462_v62, %v458_v61 }
  0x66   :  { %4370 = vmatpush1.bf16.msra.mxu1 %v4369_v25  ;;  %4340 = vmatprep.subr.bf16.mxu0 %v4339_v26  ;;  %v461_v5 = vld [vmem:[#allocation6 + $0xb0] sm:$0xff]  ;;  %v464_v7 = vld [vmem:[#allocation6 + $0xc8] sm:$0xff]  ;;  %v6147_v10 = vpack.c.bf16 %v459_v2, %v455_v1  ;;  %v466_v11 = vld [vmem:[#allocation6 + $0xd8] sm:$0xff] }
  0x67   :  { %4372 = vmatprep.subr.bf16.mxu1 %v4371_v30  ;;  %v468_v8 = vld [vmem:[#allocation6 + $0xe8] sm:$0xff]  ;;  %v89_v9 = vld [vmem:[%s7156_s0 + $0x10] sm:$0xff]  ;;  %v470_v12 = vld [vmem:[#allocation6 + $0xf8] sm:$0xff]  ;;  %v6151_v13 = vpack.c.bf16 %v461_v5, %v457_v4 }
  0x68   :  { %v463_v14 = vld [vmem:[#allocation6 + $0xc0] sm:$0xff]  ;;  %v6155_v16 = vpack.c.bf16 %v468_v8, %v464_v7  ;;  %v465_v17 = vld [vmem:[#allocation6 + $0xd0] sm:$0xff]  ;;  %v6158_v19 = vpack.c.bf16 %v470_v12, %v466_v11  ;;  %v472_v20 = vld [vmem:[#allocation6 + $0x108] sm:$0xff] }
  0x69   :  { %4342 = vmatpush1.bf16.msra.mxu0 %v4341_v36  ;;  %v467_v15 = vld [vmem:[#allocation6 + $0xe0] sm:$0xff]  ;;  %v469_v18 = vld [vmem:[#allocation6 + $0xf0] sm:$0xff]  ;;  %v476_v21 = vld [vmem:[#allocation6 + $0x128] sm:$0xff] }
  0x6a   :  { %4374 = vmatpush1.bf16.msra.mxu1 %v4373_v37  ;;  %4376 = vmatprep.subr.bf16.mxu0 %v6109_v38  ;;  %v90_v22 = vld [vmem:[%s7156_s0 + $0x18] sm:$0xff]  ;;  %v6164_v23 = vpack.c.bf16 %v467_v15, %v463_v14  ;;  %v6168_v26 = vpack.c.bf16 %v469_v18, %v465_v17  ;;  %v471_v27 = vld [vmem:[#allocation6 + $0x100] sm:$0xff]  ;;  %v6172_v29 = vpack.c.bf16 %v476_v21, %v472_v20  ;;  %v473_v30 = vld [vmem:[#allocation6 + $0x110] sm:$0xff] }
  0x6b   :  { %4408 = vmatprep.subr.bf16.mxu1 %v6111_v41  ;;  %v474_v24 = vld [vmem:[#allocation6 + $0x118] sm:$0xff]  ;;  %v475_v28 = vld [vmem:[#allocation6 + $0x120] sm:$0xff]  ;;  %v477_v31 = vld [vmem:[#allocation6 + $0x130] sm:$0xff] }
  0x6c   :  { %246 = vmatmul.mubr.f32.vlgmr.msra.gmra.mrb[0].mxu0 %v87_v46  ;;  %v478_v25 = vld [vmem:[#allocation6 + $0x138] sm:$0xff]  ;;  %v480_v33 = vld [vmem:[#allocation6 + $0x148] sm:$0xff]  ;;  %v91_v35 = vld [vmem:[%s7156_s0 + $0x20] sm:$0xff]  ;;  %v6181_v36 = vpack.c.bf16 %v475_v28, %v471_v27  ;;  %v6185_v40 = vpack.c.bf16 %v477_v31, %v473_v30  ;;  %v161_v28 = vlaneseq }
  0x6d   :  { %359 = vmatmul.mubr.f32.vlgmr.msra.gmra.mrb[0].mxu1 %v87_v46  ;;  %4378 = vmatpush1.bf16.msra.mxu0 %v6116_v47  ;;  %v6175_v32 = vpack.c.bf16 %v478_v25, %v474_v24  ;;  %v484_v34 = vld [vmem:[#allocation6 + $0x168] sm:$0xff]  ;;  %v482_v37 = vld [vmem:[#allocation6 + $0x158] sm:$0xff]  ;;  %v479_v42 = vld [vmem:[#allocation6 + $0x140] sm:$0xff] }
  0x6e   :  { %4410 = vmatpush1.bf16.msra.mxu1 %v6119_v50  ;;  %251 = vmatprep.mubr.f32.mxu0 %v5980_v0  ;;  %v486_v39 = vld [vmem:[#allocation6 + $0x178] sm:$0xff]  ;;  %v483_v43 = vld [vmem:[#allocation6 + $0x160] sm:$0xff]  ;;  %v6189_v44 = vpack.c.bf16 %v484_v34, %v480_v33  ;;  %v481_v45 = vld [vmem:[#allocation6 + $0x150] sm:$0xff]  ;;  %v6283_v30 = vshrl.u32 %v161_v28, 7 }
  0x6f   :  { %364 = vmatprep.mubr.f32.mxu1 %v5980_v0  ;;  %4380 = vmatprep.subr.bf16.mxu0 %v6122_v53  ;;  %v485_v46 = vld [vmem:[#allocation6 + $0x170] sm:$0xff]  ;;  %v6192_v48 = vpack.c.bf16 %v486_v39, %v482_v37  ;;  %v488_v49 = vld [vmem:[#allocation6 + $0x188] sm:$0xff]  ;;  %v6198_v54 = vpack.c.bf16 %v483_v43, %v479_v42  ;;  %v490_v55 = vld [vmem:[#allocation6 + $0x198] sm:$0xff] }
  0x70   :  { %252 = vmatmul.mubr.f32.gmra.mrb[2].mxu0 %v88_v59  ;;  %4412 = vmatprep.subr.bf16.mxu1 %v6124_v56  ;;  %v492_v51 = vld [vmem:[#allocation6 + $0x1a8] sm:$0xff]  ;;  %v494_v57 = vld [vmem:[#allocation6 + $0x1b8] sm:$0xff]  ;;  %v6202_v58 = vpack.c.bf16 %v485_v46, %v481_v45  ;;  %v491_v61 = vld [vmem:[#allocation6 + $0x1a0] sm:$0xff]  ;;  %v163_v31 = vsub.s32 0, %v6283_v30  ;;  %v167_v34 = vsub.s32 1, %v6283_v30  ;;  %v171_v37 = vsub.s32 2, %v6283_v30 }
  0x71   :  { %365 = vmatmul.mubr.f32.gmra.mrb[2].mxu1 %v88_v59  ;;  %4382 = vmatpush1.bf16.msra.mxu0 %v6130_v60  ;;  %v92_v52 = vld [vmem:[%s7156_s0 + $0x28] sm:$0xff]  ;;  %v487_v59 = vld [vmem:[#allocation6 + $0x180] sm:$0xff]  ;;  %v6206_v62 = vpack.c.bf16 %v492_v51, %v488_v49  ;;  %v489_v1 = vld [vmem:[#allocation6 + $0x190] sm:$0xff]  ;;  %v6209_v4 = vpack.c.bf16 %v494_v57, %v490_v55  ;;  %v175_v55 = vsub.s32 3, %v6283_v30 }
  0x72   :  { %4414 = vmatpush1.bf16.msra.mxu1 %v6134_v63  ;;  %257 = vmatprep.mubr.f32.mxu0 %v5980_v0  ;;  %v493_v2 = vld [vmem:[#allocation6 + $0x1b0] sm:$0xff]  ;;  %v496_v5 = vld [vmem:[#allocation6 + $0x1c8] sm:$0xff]  ;;  %v498_v11 = vld [vmem:[#allocation6 + $0x1d8] sm:$0xff] }
  0x73   :  { %370 = vmatprep.mubr.f32.mxu1 %v5980_v0  ;;  %4384 = vmatprep.subr.bf16.mxu0 %v6138_v3  ;;  %v500_v7 = vld [vmem:[#allocation6 + $0x1e8] sm:$0xff]  ;;  %v93_v8 = vld [vmem:[%s7156_s0 + $0x30] sm:$0xff]  ;;  %v502_v12 = vld [vmem:[#allocation6 + $0x1f8] sm:$0xff]  ;;  %v6219_v14 = vpack.c.bf16 %v493_v2, %v489_v1 }
  0x74   :  { %258 = vmatmul.mubr.f32.gmra.mrb[4].mxu0 %v89_v9  ;;  %4416 = vmatprep.subr.bf16.mxu1 %v6141_v6  ;;  %v495_v15 = vld [vmem:[#allocation6 + $0x1c0] sm:$0xff]  ;;  %v6223_v18 = vpack.c.bf16 %v500_v7, %v496_v5  ;;  %v497_v20 = vld [vmem:[#allocation6 + $0x1d0] sm:$0xff]  ;;  %v94_v24 = vld [vmem:[%s7156_s0 + $0x38] sm:$0xff] }
  0x75   :  { %371 = vmatmul.mubr.f32.gmra.mrb[4].mxu1 %v89_v9  ;;  %4386 = vmatpush1.bf16.msra.mxu0 %v6147_v10  ;;  %v6215_v9 = vpack.c.bf16 %v491_v61, %v487_v59  ;;  %v499_v17 = vld [vmem:[#allocation6 + $0x1e0] sm:$0xff]  ;;  %v501_v21 = vld [vmem:[#allocation6 + $0x1f0] sm:$0xff] }
  0x76   :  { %4418 = vmatpush1.bf16.msra.mxu1 %v6151_v13  ;;  %263 = vmatprep.mubr.f32.mxu0 %v5980_v0  ;;  %v6232_v25 = vpack.c.bf16 %v499_v17, %v495_v15  ;;  %v6236_v27 = vpack.c.bf16 %v501_v21, %v497_v20  ;;  %v159_v33 = vld [vmem:[%s7159_s3] sm:$0xf] }
  0x77   :  { %376 = vmatprep.mubr.f32.mxu1 %v5980_v0  ;;  %4388 = vmatprep.subr.bf16.mxu0 %v6155_v16  ;;  %v6303_v51 = vrot.slane %v159_v33, %v171_v37  ;;  %v6309_v59 = vrot.slane %v159_v33, %v175_v55 }
  0x78   :  { %264 = vmatmul.mubr.f32.gmra.mrb[6].mxu0 %v90_v22  ;;  %4420 = vmatprep.subr.bf16.mxu1 %v6158_v19 }
  0x79   :  { %377 = vmatmul.mubr.f32.gmra.mrb[6].mxu1 %v90_v22  ;;  %4390 = vmatpush1.bf16.msra.mxu0 %v6164_v23  ;;  %v6226_v22 = vpack.c.bf16 %v502_v12, %v498_v11 }
  0x7a   :  { %4422 = vmatpush1.bf16.msra.mxu1 %v6168_v26  ;;  %269 = vmatprep.mubr.f32.mxu0 %v5980_v0 }
  0x7b   :  { %382 = vmatprep.mubr.f32.mxu1 %v5980_v0  ;;  %4392 = vmatprep.subr.bf16.mxu0 %v6172_v29 }
  0x7c   :  { %270 = vmatmul.mubr.f32.gmra.mrb[8].mxu0 %v91_v35  ;;  %4424 = vmatprep.subr.bf16.mxu1 %v6175_v32 }
  0x7d   :  { %383 = vmatmul.mubr.f32.gmra.mrb[8].mxu1 %v91_v35  ;;  %4394 = vmatpush1.bf16.msra.mxu0 %v6181_v36  ;;  %v6292_v35 = vrot.slane %v159_v33, %v163_v31 }
  0x7e   :  { %4426 = vmatpush1.bf16.msra.mxu1 %v6185_v40  ;;  %275 = vmatprep.mubr.f32.mxu0 %v5980_v0 }
  0x7f   :  { %388 = vmatprep.mubr.f32.mxu1 %v5980_v0  ;;  %4396 = vmatprep.subr.bf16.mxu0 %v6189_v44 }
  0x80   :  { %276 = vmatmul.mubr.f32.gmra.mrb[10].mxu0 %v92_v52  ;;  %4428 = vmatprep.subr.bf16.mxu1 %v6192_v48 }
  0x81   :  { %389 = vmatmul.mubr.f32.gmra.mrb[10].mxu1 %v92_v52  ;;  %4398 = vmatpush1.bf16.msra.mxu0 %v6198_v54 }
  0x82   :  { %4430 = vmatpush1.bf16.msra.mxu1 %v6202_v58  ;;  %281 = vmatprep.mubr.f32.mxu0 %v5980_v0 }
  0x83   :  { %394 = vmatprep.mubr.f32.mxu1 %v5980_v0  ;;  %4400 = vmatprep.subr.bf16.mxu0 %v6206_v62 }
  0x84   :  { %282 = vmatmul.mubr.f32.gmra.mrb[12].mxu0 %v93_v8  ;;  %4432 = vmatprep.subr.bf16.mxu1 %v6209_v4 }
  0x85   :  { %395 = vmatmul.mubr.f32.gmra.mrb[12].mxu1 %v93_v8  ;;  %4402 = vmatpush1.bf16.msra.mxu0 %v6215_v9 }
  0x86   :  { %4434 = vmatpush1.bf16.msra.mxu1 %v6219_v14  ;;  %287 = vmatprep.mubr.f32.mxu0 %v5980_v0 }
  0x87   :  { %400 = vmatprep.mubr.f32.mxu1 %v5980_v0  ;;  %4404 = vmatprep.subr.bf16.mxu0 %v6223_v18 }
  0x88   :  { %288 = vmatmul.mubr.f32.gmra.mrb[14].mxu0 %v94_v24  ;;  %4436 = vmatprep.subr.bf16.mxu1 %v6226_v22 }
  0x89   :  { %401 = vmatmul.mubr.f32.gmra.mrb[14].mxu1 %v94_v24  ;;  %4406 = vmatpush1.bf16.msra.mxu0 %v6232_v25 }
  0x8a   :  { %4438 = vmatpush1.bf16.msra.mxu1 %v6236_v27  ;;  %571 = vmatprep.mubr.f32.mxu0 %v5980_v0 }
  0x8b   :  { %642 = vmatprep.mubr.f32.mxu1 %v5980_v0  ;;  %4440 = vmatprep.subr.bf16.mxu0 %v6109_v38 }
  0x8c   :  { %572 = vmatmul.mubr.f32.vlgmr.msra.gmra.mrb[0].mxu0 %v5980_v0  ;;  %4472 = vmatprep.subr.bf16.mxu1 %v6111_v41 }
  0x8d   :  { %643 = vmatmul.mubr.f32.vlgmr.msra.gmra.mrb[0].mxu1 %v5980_v0  ;;  %4442 = vmatpush1.bf16.msra.mxu0 %v6116_v47 }
  0x8e   :  { %4474 = vmatpush1.bf16.msra.mxu1 %v6119_v50  ;;  %4444 = vmatprep.subr.bf16.mxu0 %v6122_v53 }
  0x8f   :  { %4476 = vmatprep.subr.bf16.mxu1 %v6124_v56  ;;  %807 = vmatprep.mubr.f32.mxu0 %v5980_v0 }
  0x90   :  { %878 = vmatprep.mubr.f32.mxu1 %v5980_v0 }
  0x91   :  { %4446 = vmatpush1.bf16.msra.mxu0 %v6130_v60 }
  0x92   :  { %4478 = vmatpush1.bf16.msra.mxu1 %v6134_v63  ;;  %4448 = vmatprep.subr.bf16.mxu0 %v6138_v3 }
  0x93   :  { %4480 = vmatprep.subr.bf16.mxu1 %v6141_v6 }
  0x95   :  { %4450 = vmatpush1.bf16.msra.mxu0 %v6147_v10 }
  0x96   :  { %4482 = vmatpush1.bf16.msra.mxu1 %v6151_v13  ;;  %4452 = vmatprep.subr.bf16.mxu0 %v6155_v16 }
  0x97   :  { %4484 = vmatprep.subr.bf16.mxu1 %v6158_v19 }
  0x99   :  { %4454 = vmatpush1.bf16.msra.mxu0 %v6164_v23 }
  0x9a   :  { %4486 = vmatpush1.bf16.msra.mxu1 %v6168_v26  ;;  %4456 = vmatprep.subr.bf16.mxu0 %v6172_v29 }
  0x9b   :  { %4488 = vmatprep.subr.bf16.mxu1 %v6175_v32 }
  0x9d   :  { %4458 = vmatpush1.bf16.msra.mxu0 %v6181_v36 }
  0x9e   :  { %4490 = vmatpush1.bf16.msra.mxu1 %v6185_v40  ;;  %4460 = vmatprep.subr.bf16.mxu0 %v6189_v44 }
  0x9f   :  { %4492 = vmatprep.subr.bf16.mxu1 %v6192_v48 }
  0xa1   :  { %4462 = vmatpush1.bf16.msra.mxu0 %v6198_v54 }
  0xa2   :  { %4494 = vmatpush1.bf16.msra.mxu1 %v6202_v58  ;;  %4464 = vmatprep.subr.bf16.mxu0 %v6206_v62 }
  0xa3   :  { %4496 = vmatprep.subr.bf16.mxu1 %v6209_v4 }
  0xa5   :  { %4466 = vmatpush1.bf16.msra.mxu0 %v6215_v9 }
  0xa6   :  { %4498 = vmatpush1.bf16.msra.mxu1 %v6219_v14  ;;  %4468 = vmatprep.subr.bf16.mxu0 %v6223_v18 }
  0xa7   :  { %4500 = vmatprep.subr.bf16.mxu1 %v6226_v22 }
  0xa9   :  { %4470 = vmatpush1.bf16.msra.mxu0 %v6232_v25 }
  0xaa   :  { %4502 = vmatpush1.bf16.msra.mxu1 %v6236_v27  ;;  %4504 = vmatprep.subr.bf16.mxu0 %v6109_v38  ;;  %v6296_v38 = vrot.slane %v159_v33, %v167_v34 }
  0xab   :  { %4536 = vmatprep.subr.bf16.mxu1 %v6111_v41 }
 0x15f   :  { %v573_v41 = vpop.f32.mrb[0].mxu0 }
 0x160   :  { %v5487_v39 = vadd.f32 %v573_v41, %v6292_v35  ;;  %v644_v42 = vpop.f32.mrb[0].mxu1  ;;  %v575_v43 = vpop.f32.mrb[1].mxu0 }
 0x161   :  { %v5488_v45 = vadd.f32 %v575_v43, %v6296_v38  ;;  %v646_v46 = vpop.f32.mrb[1].mxu1  ;;  %v5503_v57 = vadd.f32 %v644_v42, %v6303_v51 }
 0x162   :  { %v4210_v49 = vmul.f32 -1.442695, %v5487_v39  ;;  %v5504_v1 = vadd.f32 %v646_v46, %v6309_v59 }
 0x163   :  { %v4211_v52 = vmul.f32 -1.442695, %v5488_v45  ;;  %v4212_v61 = vmul.f32 -1.442695, %v5503_v57 }
 0x164   :  { %5624 = vpow2.f32 %v4210_v49 }
 0x165   :  { %5626 = vpow2.f32 %v4211_v52 }
 0x166   :  { %5628 = vpow2.f32 %v4212_v61 }
 0x167   :  { %5630 = vtanh.f32 %v5504_v1 }
 0x16e   :  { %v5625_v2 = vpop.eup %5624 }
 0x16f   :  { %v658_v5 = vadd.f32 1.0, %v5625_v2  ;;  %v5627_v7 = vpop.eup %5626 }
 0x170   :  { %v659_v8 = vadd.f32 1.0, %v5627_v7  ;;  %v5629_v11 = vpop.eup %5628 }
 0x171   :  { %5632 = vrcp.f32 %v658_v5  ;;  %v5631_v12 = vpop.eup %5630  ;;  %v660_v21 = vadd.f32 1.0, %v5629_v11 }
 0x172   :  { %5634 = vrcp.f32 %v659_v8 }
 0x173   :  { %5636 = vrcp.f32 %v660_v21 }
 0x17b   :  { %v5633_v15 = vpop.eup %5632 }
 0x17c   :  { %v669_v17 = vmul.f32 %v5633_v15, %v5631_v12  ;;  %v5635_v20 = vpop.eup %5634 }
 0x17d   :  { %v668_v24 = vmul.f32 0.0, %v5635_v20  ;;  %v5637_v33 = vpop.eup %5636 }
 0x17f   :  { %v6312_v28 = vadd.f32 %v669_v17, %v668_v24 }
 0x181   :  { %5638 = vtanh.f32 %v6312_v28 }
 0x18b   :  { %v5639_v41 = vpop.eup %5638 }
 0x18c   :  { %v6315_v39 = vmul.f32 %v5639_v41, %v5637_v33  ;;  %v1149_v33 = vld [vmem:[#allocation6 + $0x8] sm:$0xff] }
 0x18d   :  { %v1153_v41 = vld [vmem:[#allocation6 + $0x28] sm:$0xff] }
 0x18e   :  { %808 = vmatmul.mubr.f32.vlgmr.msra.gmra.mrb[2].mxu0 %v6315_v39  ;;  %879 = vmatmul.mubr.f32.vlgmr.msra.gmra.mrb[2].mxu1 %v6315_v39 }
 0x18f   :  { %4506 = vmatpush1.bf16.msra.mxu0 %v6116_v47  ;;  %4538 = vmatpush1.bf16.msra.mxu1 %v6119_v50 }
 0x190   :  { %4508 = vmatprep.subr.bf16.mxu0 %v6122_v53  ;;  %4540 = vmatprep.subr.bf16.mxu1 %v6124_v56 }
 0x191   :  { %1044 = vmatprep.mubr.f32.mxu0 %v5980_v0  ;;  %1115 = vmatprep.mubr.f32.mxu1 %v5980_v0 }
 0x193   :  { %4510 = vmatpush1.bf16.msra.mxu0 %v6130_v60  ;;  %4542 = vmatpush1.bf16.msra.mxu1 %v6134_v63 }
 0x194   :  { %4512 = vmatprep.subr.bf16.mxu0 %v6138_v3  ;;  %4544 = vmatprep.subr.bf16.mxu1 %v6141_v6 }
 0x197   :  { %4514 = vmatpush1.bf16.msra.mxu0 %v6147_v10  ;;  %4546 = vmatpush1.bf16.msra.mxu1 %v6151_v13 }
 0x198   :  { %4516 = vmatprep.subr.bf16.mxu0 %v6155_v16  ;;  %4548 = vmatprep.subr.bf16.mxu1 %v6158_v19 }
 0x19b   :  { %4518 = vmatpush1.bf16.msra.mxu0 %v6164_v23  ;;  %4550 = vmatpush1.bf16.msra.mxu1 %v6168_v26 }
 0x19c   :  { %4520 = vmatprep.subr.bf16.mxu0 %v6172_v29  ;;  %4552 = vmatprep.subr.bf16.mxu1 %v6175_v32 }
 0x19f   :  { %4522 = vmatpush1.bf16.msra.mxu0 %v6181_v36  ;;  %4554 = vmatpush1.bf16.msra.mxu1 %v6185_v40 }
 0x1a0   :  { %4524 = vmatprep.subr.bf16.mxu0 %v6189_v44  ;;  %4556 = vmatprep.subr.bf16.mxu1 %v6192_v48 }
 0x1a3   :  { %4526 = vmatpush1.bf16.msra.mxu0 %v6198_v54  ;;  %4558 = vmatpush1.bf16.msra.mxu1 %v6202_v58 }
 0x1a4   :  { %4528 = vmatprep.subr.bf16.mxu0 %v6206_v62  ;;  %4560 = vmatprep.subr.bf16.mxu1 %v6209_v4 }
 0x1a7   :  { %4530 = vmatpush1.bf16.msra.mxu0 %v6215_v9  ;;  %4562 = vmatpush1.bf16.msra.mxu1 %v6219_v14 }
 0x1a8   :  { %4532 = vmatprep.subr.bf16.mxu0 %v6223_v18  ;;  %4564 = vmatprep.subr.bf16.mxu1 %v6226_v22 }
 0x1ab   :  { %4534 = vmatpush1.bf16.msra.mxu0 %v6232_v25  ;;  %4566 = vmatpush1.bf16.msra.mxu1 %v6236_v27 }
 0x261   :  { %v809_v47 = vpop.f32.mrb[2].mxu0  ;;  %v880_v50 = vpop.f32.mrb[2].mxu1 }
 0x262   :  { %v5489_v53 = vadd.f32 %v809_v47, %v6292_v35  ;;  %v811_v56 = vpop.f32.mrb[3].mxu0  ;;  %v882_v60 = vpop.f32.mrb[3].mxu1  ;;  %v5505_v45 = vadd.f32 %v880_v50, %v6303_v51  ;;  %v6365_v47 = vpack.c.bf16 %v1153_v41, %v1149_v33  ;;  %v1155_v50 = vld [vmem:[#allocation6 + $0x38] sm:$0xff] }
 0x263   :  { %v5490_v63 = vadd.f32 %v811_v56, %v6296_v38  ;;  %v5506_v46 = vadd.f32 %v882_v60, %v6309_v59  ;;  %v1152_v56 = vld [vmem:[#allocation6 + $0x20] sm:$0xff]  ;;  %v1404_v33 = vld [vmem:[#allocation6 + $0x98] sm:$0xff] }
 0x264   :  { %v4213_v42 = vmul.f32 -1.442695, %v5489_v53  ;;  %v4215_v49 = vmul.f32 -1.442695, %v5505_v45  ;;  %v1148_v53 = vld [vmem:[#allocation6] sm:$0xff]  ;;  %4568 = vmatprep.subr.bf16.mxu0 %v6365_v47 }
 0x265   :  { %v4214_v43 = vmul.f32 -1.442695, %v5490_v63  ;;  %v6369_v63 = vpack.c.bf16 %v1152_v56, %v1148_v53  ;;  %v1405_v53 = vld [vmem:[#allocation6 + $0xa0] sm:$0xff] }
 0x266   :  { %5640 = vpow2.f32 %v4213_v42  ;;  %v1150_v42 = vld [vmem:[#allocation6 + $0x10] sm:$0xff] }
 0x267   :  { %5642 = vpow2.f32 %v4214_v43  ;;  %v1154_v43 = vld [vmem:[#allocation6 + $0x30] sm:$0xff] }
 0x268   :  { %5644 = vtanh.f32 %v5506_v46  ;;  %v6372_v45 = vpack.c.bf16 %v1154_v43, %v1150_v42  ;;  %v1157_v46 = vld [vmem:[#allocation6 + $0x48] sm:$0xff]  ;;  %v1403_v43 = vld [vmem:[#allocation6 + $0x90] sm:$0xff] }
 0x269   :  { %5646 = vpow2.f32 %v4215_v49  ;;  %v1161_v49 = vld [vmem:[#allocation6 + $0x68] sm:$0xff] }
 0x270   :  { %v5641_v52 = vpop.eup %5640 }
 0x271   :  { %v894_v57 = vadd.f32 1.0, %v5641_v52  ;;  %v5643_v61 = vpop.eup %5642  ;;  %v1159_v52 = vld [vmem:[#allocation6 + $0x58] sm:$0xff] }
 0x272   :  { %v895_v1 = vadd.f32 1.0, %v5643_v61  ;;  %v5645_v2 = vpop.eup %5644  ;;  %v1163_v61 = vld [vmem:[#allocation6 + $0x78] sm:$0xff] }
 0x273   :  { %5648 = vrcp.f32 %v894_v57  ;;  %v5647_v5 = vpop.eup %5646  ;;  %v6377_v57 = vpack.c.bf16 %v1161_v49, %v1157_v46  ;;  %v1407_v46 = vld [vmem:[#allocation6 + $0xb0] sm:$0xff] }
 0x274   :  { %5650 = vrcp.f32 %v895_v1  ;;  %v896_v12 = vadd.f32 1.0, %v5647_v5  ;;  %v1156_v1 = vld [vmem:[#allocation6 + $0x40] sm:$0xff]  ;;  %v6379_v5 = vpack.c.bf16 %v1163_v61, %v1159_v52  ;;  %v6442_v49 = vpack.c.bf16 %v1407_v46, %v1403_v43  ;;  %v1410_v52 = vld [vmem:[#allocation6 + $0xc8] sm:$0xff] }
 0x275   :  { %v1414_v61 = vld [vmem:[#allocation6 + $0xe8] sm:$0xff] }
 0x276   :  { %5652 = vrcp.f32 %v896_v12  ;;  %v1438_v46 = vld [vmem:[#allocation6 + $0x1a8] sm:$0xff] }
 0x27d   :  { %v5649_v7 = vpop.eup %5648 }
 0x27e   :  { %v905_v8 = vmul.f32 %v5649_v7, %v5645_v2  ;;  %v5651_v11 = vpop.eup %5650  ;;  %v1160_v2 = vld [vmem:[#allocation6 + $0x60] sm:$0xff] }
 0x27f   :  { %v904_v15 = vmul.f32 %v5651_v11, %v6312_v28  ;;  %v1151_v28 = vld [vmem:[#allocation6 + $0x18] sm:$0xff]  ;;  %v6381_v7 = vpack.c.bf16 %v1160_v2, %v1156_v1  ;;  %v1162_v11 = vld [vmem:[#allocation6 + $0x70] sm:$0xff]  ;;  %v6447_v2 = vpack.c.bf16 %v1414_v61, %v1410_v52 }
 0x280   :  { %v5653_v20 = vpop.eup %5652  ;;  %v6367_v60 = vpack.c.bf16 %v1155_v50, %v1151_v28  ;;  %v1408_v28 = vld [vmem:[#allocation6 + $0xb8] sm:$0xff]  ;;  %v1401_v50 = vld [vmem:[#allocation6 + $0x80] sm:$0xff] }
 0x281   :  { %v6356_v17 = vadd.f32 %v905_v8, %v904_v15  ;;  %v1158_v8 = vld [vmem:[#allocation6 + $0x50] sm:$0xff]  ;;  %v6437_v56 = vpack.c.bf16 %v1408_v28, %v1404_v33  ;;  %v6439_v42 = vpack.c.bf16 %v1405_v53, %v1401_v50  ;;  %v1412_v1 = vld [vmem:[#allocation6 + $0xd8] sm:$0xff]  ;;  %v1434_v53 = vld [vmem:[#allocation6 + $0x188] sm:$0xff] }
 0x282   :  { %4600 = vmatprep.subr.bf16.mxu1 %v6367_v60  ;;  %v6384_v12 = vpack.c.bf16 %v1162_v11, %v1158_v8  ;;  %v1416_v8 = vld [vmem:[#allocation6 + $0xf8] sm:$0xff]  ;;  %v1409_v11 = vld [vmem:[#allocation6 + $0xc0] sm:$0xff]  ;;  %v1427_v28 = vld [vmem:[#allocation6 + $0x150] sm:$0xff] }
 0x283   :  { %5654 = vtanh.f32 %v6356_v17  ;;  %v1431_v50 = vld [vmem:[#allocation6 + $0x170] sm:$0xff]  ;;  %v1436_v52 = vld [vmem:[#allocation6 + $0x198] sm:$0xff] }
 0x284   :  { %v6478_v43 = vpack.c.bf16 %v1431_v50, %v1427_v28  ;;  %v1440_v61 = vld [vmem:[#allocation6 + $0x1b8] sm:$0xff] }
 0x28d   :  { %v5655_v21 = vpop.eup %5654 }
 0x28e   :  { %v6359_v24 = vmul.f32 %v5655_v21, %v5653_v20  ;;  %v1406_v21 = vld [vmem:[#allocation6 + $0xa8] sm:$0xff] }
 0x290   :  { %1045 = vmatmul.mubr.f32.vlgmr.msra.gmra.mrb[4].mxu0 %v6359_v24  ;;  %1116 = vmatmul.mubr.f32.vlgmr.msra.gmra.mrb[4].mxu1 %v6359_v24 }
 0x291   :  { %1281 = vmatprep.mubr.f32.mxu0 %v5980_v0  ;;  %1352 = vmatprep.mubr.f32.mxu1 %v5980_v0 }
 0x292   :  { %4570 = vmatpush1.bf16.msra.mxu0 %v6369_v63  ;;  %4602 = vmatpush1.bf16.msra.mxu1 %v6372_v45 }
 0x293   :  { %4572 = vmatprep.subr.bf16.mxu0 %v6377_v57  ;;  %4604 = vmatprep.subr.bf16.mxu1 %v6379_v5 }
 0x296   :  { %4574 = vmatpush1.bf16.msra.mxu0 %v6381_v7  ;;  %4606 = vmatpush1.bf16.msra.mxu1 %v6384_v12 }
 0x297   :  { %4576 = vmatprep.subr.bf16.mxu0 %v6138_v3  ;;  %4608 = vmatprep.subr.bf16.mxu1 %v6141_v6 }
 0x29a   :  { %4578 = vmatpush1.bf16.msra.mxu0 %v6147_v10  ;;  %4610 = vmatpush1.bf16.msra.mxu1 %v6151_v13 }
 0x29b   :  { %4580 = vmatprep.subr.bf16.mxu0 %v6155_v16  ;;  %4612 = vmatprep.subr.bf16.mxu1 %v6158_v19 }
 0x29e   :  { %4582 = vmatpush1.bf16.msra.mxu0 %v6164_v23  ;;  %4614 = vmatpush1.bf16.msra.mxu1 %v6168_v26 }
 0x29f   :  { %4584 = vmatprep.subr.bf16.mxu0 %v6172_v29  ;;  %4616 = vmatprep.subr.bf16.mxu1 %v6175_v32 }
 0x2a2   :  { %4586 = vmatpush1.bf16.msra.mxu0 %v6181_v36  ;;  %4618 = vmatpush1.bf16.msra.mxu1 %v6185_v40 }
 0x2a3   :  { %4588 = vmatprep.subr.bf16.mxu0 %v6189_v44  ;;  %4620 = vmatprep.subr.bf16.mxu1 %v6192_v48 }
 0x2a6   :  { %4590 = vmatpush1.bf16.msra.mxu0 %v6198_v54  ;;  %4622 = vmatpush1.bf16.msra.mxu1 %v6202_v58 }
 0x2a7   :  { %4592 = vmatprep.subr.bf16.mxu0 %v6206_v62  ;;  %4624 = vmatprep.subr.bf16.mxu1 %v6209_v4 }
 0x2aa   :  { %4594 = vmatpush1.bf16.msra.mxu0 %v6215_v9  ;;  %4626 = vmatpush1.bf16.msra.mxu1 %v6219_v14 }
 0x2ab   :  { %4596 = vmatprep.subr.bf16.mxu0 %v6223_v18  ;;  %4628 = vmatprep.subr.bf16.mxu1 %v6226_v22 }
 0x2ae   :  { %4598 = vmatpush1.bf16.msra.mxu0 %v6232_v25  ;;  %4630 = vmatpush1.bf16.msra.mxu1 %v6236_v27 }
 0x2af   :  { %4632 = vmatprep.subr.bf16.mxu0 %v6365_v47  ;;  %4664 = vmatprep.subr.bf16.mxu1 %v6367_v60 }
 0x363   :  { %v1046_v3 = vpop.f32.mrb[4].mxu0  ;;  %v1117_v6 = vpop.f32.mrb[4].mxu1 }
 0x364   :  { %v5491_v10 = vadd.f32 %v1046_v3, %v6292_v35  ;;  %v1048_v13 = vpop.f32.mrb[5].mxu0  ;;  %v1119_v16 = vpop.f32.mrb[5].mxu1  ;;  %v5507_v29 = vadd.f32 %v1117_v6, %v6303_v51  ;;  %v1413_v3 = vld [vmem:[#allocation6 + $0xe0] sm:$0xff]  ;;  %v6449_v6 = vpack.c.bf16 %v1416_v8, %v1412_v1  ;;  %v6482_v1 = vpack.c.bf16 %v1438_v46, %v1434_v53 }
 0x365   :  { %v5492_v19 = vadd.f32 %v1048_v13, %v6296_v38  ;;  %v5508_v32 = vadd.f32 %v1119_v16, %v6309_v59  ;;  %v1411_v13 = vld [vmem:[#allocation6 + $0xd0] sm:$0xff]  ;;  %v6484_v8 = vpack.c.bf16 %v1440_v61, %v1436_v52 }
 0x366   :  { %v4216_v23 = vmul.f32 -1.442695, %v5491_v10  ;;  %v4218_v36 = vmul.f32 -1.442695, %v5507_v29  ;;  %v6451_v10 = vpack.c.bf16 %v1413_v3, %v1409_v11  ;;  %v1415_v16 = vld [vmem:[#allocation6 + $0xf0] sm:$0xff]  ;;  %v1420_v29 = vld [vmem:[#allocation6 + $0x118] sm:$0xff] }
 0x367   :  { %v4217_v26 = vmul.f32 -1.442695, %v5492_v19  ;;  %v6454_v19 = vpack.c.bf16 %v1415_v16, %v1411_v13  ;;  %v1433_v11 = vld [vmem:[#allocation6 + $0x180] sm:$0xff]  ;;  %v1435_v13 = vld [vmem:[#allocation6 + $0x190] sm:$0xff] }
 0x368   :  { %5656 = vpow2.f32 %v4216_v23  ;;  %v1418_v23 = vld [vmem:[#allocation6 + $0x108] sm:$0xff]  ;;  %v1437_v3 = vld [vmem:[#allocation6 + $0x1a0] sm:$0xff] }
 0x369   :  { %5658 = vpow2.f32 %v4217_v26  ;;  %v1422_v26 = vld [vmem:[#allocation6 + $0x128] sm:$0xff]  ;;  %v6487_v16 = vpack.c.bf16 %v1437_v3, %v1433_v11 }
 0x36a   :  { %5660 = vtanh.f32 %v5508_v32  ;;  %v6459_v32 = vpack.c.bf16 %v1422_v26, %v1418_v23  ;;  %v1439_v23 = vld [vmem:[#allocation6 + $0x1b0] sm:$0xff]  ;;  %v1442_v26 = vld [vmem:[#allocation6 + $0x1c8] sm:$0xff] }
 0x36b   :  { %5662 = vpow2.f32 %v4218_v36  ;;  %v1424_v36 = vld [vmem:[#allocation6 + $0x138] sm:$0xff] }
 0x372   :  { %v5657_v40 = vpop.eup %5656 }
 0x373   :  { %v1131_v44 = vadd.f32 1.0, %v5657_v40  ;;  %v5659_v48 = vpop.eup %5658  ;;  %v1417_v40 = vld [vmem:[#allocation6 + $0x100] sm:$0xff] }
 0x374   :  { %v1132_v54 = vadd.f32 1.0, %v5659_v48  ;;  %v5661_v58 = vpop.eup %5660  ;;  %v6461_v48 = vpack.c.bf16 %v1424_v36, %v1420_v29  ;;  %v1446_v29 = vld [vmem:[#allocation6 + $0x1e8] sm:$0xff]  ;;  %v6491_v36 = vpack.c.bf16 %v1439_v23, %v1435_v13 }
 0x375   :  { %5664 = vrcp.f32 %v1131_v44  ;;  %v5663_v62 = vpop.eup %5662  ;;  %v1421_v44 = vld [vmem:[#allocation6 + $0x120] sm:$0xff] }
 0x376   :  { %5666 = vrcp.f32 %v1132_v54  ;;  %v1133_v18 = vadd.f32 1.0, %v5663_v62  ;;  %v6463_v54 = vpack.c.bf16 %v1421_v44, %v1417_v40  ;;  %v1423_v62 = vld [vmem:[#allocation6 + $0x130] sm:$0xff]  ;;  %v6493_v40 = vpack.c.bf16 %v1446_v29, %v1442_v26  ;;  %v1444_v44 = vld [vmem:[#allocation6 + $0x1d8] sm:$0xff] }
 0x378   :  { %5668 = vrcp.f32 %v1133_v18  ;;  %v1428_v18 = vld [vmem:[#allocation6 + $0x158] sm:$0xff] }
 0x37f   :  { %v5665_v4 = vpop.eup %5664 }
 0x380   :  { %v1142_v9 = vmul.f32 %v5665_v4, %v5661_v58  ;;  %v5667_v14 = vpop.eup %5666  ;;  %v1419_v58 = vld [vmem:[#allocation6 + $0x110] sm:$0xff] }
 0x381   :  { %v1141_v22 = vmul.f32 %v5667_v14, %v6356_v17  ;;  %v1402_v17 = vld [vmem:[#allocation6 + $0x88] sm:$0xff]  ;;  %v6466_v4 = vpack.c.bf16 %v1423_v62, %v1419_v58  ;;  %v1448_v58 = vld [vmem:[#allocation6 + $0x1f8] sm:$0xff]  ;;  %v1441_v62 = vld [vmem:[#allocation6 + $0x1c0] sm:$0xff] }
 0x382   :  { %v5669_v27 = vpop.eup %5668  ;;  %v6435_v41 = vpack.c.bf16 %v1406_v21, %v1402_v17  ;;  %v1430_v14 = vld [vmem:[#allocation6 + $0x168] sm:$0xff]  ;;  %v1429_v17 = vld [vmem:[#allocation6 + $0x160] sm:$0xff] }
 0x383   :  { %v6420_v25 = vadd.f32 %v1142_v9, %v1141_v22  ;;  %v1426_v9 = vld [vmem:[#allocation6 + $0x148] sm:$0xff] }
 0x384   :  { %v6471_v22 = vpack.c.bf16 %v1430_v14, %v1426_v9  ;;  %v6495_v9 = vpack.c.bf16 %v1448_v58, %v1444_v44  ;;  %v1445_v14 = vld [vmem:[#allocation6 + $0x1e0] sm:$0xff] }
 0x385   :  { %5670 = vtanh.f32 %v6420_v25 }
 0x38f   :  { %v5671_v15 = vpop.eup %5670 }
 0x390   :  { %v6423_v20 = vmul.f32 %v5671_v15, %v5669_v27  ;;  %v1432_v27 = vld [vmem:[#allocation6 + $0x178] sm:$0xff]  ;;  %v1425_v15 = vld [vmem:[#allocation6 + $0x140] sm:$0xff] }
 0x391   :  { %v6473_v21 = vpack.c.bf16 %v1432_v27, %v1428_v18  ;;  %v6475_v33 = vpack.c.bf16 %v1429_v17, %v1425_v15  ;;  %v1443_v18 = vld [vmem:[#allocation6 + $0x1d0] sm:$0xff]  ;;  %v6498_v15 = vpack.c.bf16 %v1445_v14, %v1441_v62 }
 0x392   :  { %1282 = vmatmul.mubr.f32.vlgmr.msra.gmra.mrb[6].mxu0 %v6423_v20  ;;  %1353 = vmatmul.mubr.f32.vlgmr.msra.gmra.mrb[6].mxu1 %v6423_v20  ;;  %v1447_v27 = vld [vmem:[#allocation6 + $0x1f0] sm:$0xff] }
 0x393   :  { %4634 = vmatpush1.bf16.msra.mxu0 %v6369_v63  ;;  %4666 = vmatpush1.bf16.msra.mxu1 %v6372_v45  ;;  %v6502_v17 = vpack.c.bf16 %v1447_v27, %v1443_v18 }
 0x394   :  { %4636 = vmatprep.subr.bf16.mxu0 %v6377_v57  ;;  %4668 = vmatprep.subr.bf16.mxu1 %v6379_v5 }
 0x395   :  { %1518 = vmatprep.mubr.f32.mxu0 %v5980_v0  ;;  %1589 = vmatprep.mubr.f32.mxu1 %v5980_v0 }
 0x397   :  { %4638 = vmatpush1.bf16.msra.mxu0 %v6381_v7  ;;  %4670 = vmatpush1.bf16.msra.mxu1 %v6384_v12 }
 0x398   :  { %4640 = vmatprep.subr.bf16.mxu0 %v6435_v41  ;;  %4672 = vmatprep.subr.bf16.mxu1 %v6437_v56 }
 0x39b   :  { %4642 = vmatpush1.bf16.msra.mxu0 %v6439_v42  ;;  %4674 = vmatpush1.bf16.msra.mxu1 %v6442_v49 }
 0x39c   :  { %4644 = vmatprep.subr.bf16.mxu0 %v6447_v2  ;;  %4676 = vmatprep.subr.bf16.mxu1 %v6449_v6 }
 0x39f   :  { %4646 = vmatpush1.bf16.msra.mxu0 %v6451_v10  ;;  %4678 = vmatpush1.bf16.msra.mxu1 %v6454_v19 }
 0x3a0   :  { %4648 = vmatprep.subr.bf16.mxu0 %v6459_v32  ;;  %4680 = vmatprep.subr.bf16.mxu1 %v6461_v48 }
 0x3a3   :  { %4650 = vmatpush1.bf16.msra.mxu0 %v6463_v54  ;;  %4682 = vmatpush1.bf16.msra.mxu1 %v6466_v4 }
 0x3a4   :  { %4652 = vmatprep.subr.bf16.mxu0 %v6471_v22  ;;  %4684 = vmatprep.subr.bf16.mxu1 %v6473_v21 }
 0x3a7   :  { %4654 = vmatpush1.bf16.msra.mxu0 %v6475_v33  ;;  %4686 = vmatpush1.bf16.msra.mxu1 %v6478_v43 }
 0x3a8   :  { %4656 = vmatprep.subr.bf16.mxu0 %v6482_v1  ;;  %4688 = vmatprep.subr.bf16.mxu1 %v6484_v8 }
 0x3ab   :  { %4658 = vmatpush1.bf16.msra.mxu0 %v6487_v16  ;;  %4690 = vmatpush1.bf16.msra.mxu1 %v6491_v36 }
 0x3ac   :  { %4660 = vmatprep.subr.bf16.mxu0 %v6493_v40  ;;  %4692 = vmatprep.subr.bf16.mxu1 %v6495_v9 }
 0x3af   :  { %4662 = vmatpush1.bf16.msra.mxu0 %v6498_v15  ;;  %4694 = vmatpush1.bf16.msra.mxu1 %v6502_v17 }
 0x3b0   :  { %4696 = vmatprep.subr.bf16.mxu0 %v6365_v47  ;;  %4728 = vmatprep.subr.bf16.mxu1 %v6367_v60 }
 0x465   :  { %v1283_v28 = vpop.f32.mrb[6].mxu0  ;;  %v1354_v50 = vpop.f32.mrb[6].mxu1 }
 0x466   :  { %v5493_v53 = vadd.f32 %v1283_v28, %v6292_v35  ;;  %v1285_v46 = vpop.f32.mrb[7].mxu0  ;;  %v1356_v52 = vpop.f32.mrb[7].mxu1  ;;  %v5509_v13 = vadd.f32 %v1354_v50, %v6303_v51 }
 0x467   :  { %v5494_v61 = vadd.f32 %v1285_v46, %v6296_v38  ;;  %v5510_v23 = vadd.f32 %v1356_v52, %v6309_v59 }
 0x468   :  { %v4219_v11 = vmul.f32 -1.442695, %v5493_v53  ;;  %v4221_v26 = vmul.f32 -1.442695, %v5509_v13 }
 0x469   :  { %v4220_v3 = vmul.f32 -1.442695, %v5494_v61 }
 0x46a   :  { %5672 = vpow2.f32 %v4219_v11 }
 0x46b   :  { %5674 = vpow2.f32 %v4220_v3 }
 0x46c   :  { %5676 = vtanh.f32 %v5510_v23 }
 0x46d   :  { %5678 = vpow2.f32 %v4221_v26 }
 0x474   :  { %v5673_v29 = vpop.eup %5672 }
 0x475   :  { %v1368_v44 = vadd.f32 1.0, %v5673_v29  ;;  %v5675_v58 = vpop.eup %5674 }
 0x476   :  { %v1369_v62 = vadd.f32 1.0, %v5675_v58  ;;  %v5677_v14 = vpop.eup %5676 }
 0x477   :  { %5680 = vrcp.f32 %v1368_v44  ;;  %v5679_v18 = vpop.eup %5678 }
 0x478   :  { %5682 = vrcp.f32 %v1369_v62  ;;  %v1370_v46 = vadd.f32 1.0, %v5679_v18 }
 0x47a   :  { %5684 = vrcp.f32 %v1370_v46 }
 0x481   :  { %v5681_v27 = vpop.eup %5680 }
 0x482   :  { %v1379_v28 = vmul.f32 %v5681_v27, %v5677_v14  ;;  %v5683_v53 = vpop.eup %5682 }
 0x483   :  { %v1378_v61 = vmul.f32 %v5683_v53, %v6420_v25 }
 0x484   :  { %v5685_v52 = vpop.eup %5684 }
 0x485   :  { %v6514_v50 = vadd.f32 %v1379_v28, %v1378_v61 }
 0x487   :  { %5686 = vtanh.f32 %v6514_v50 }
 0x491   :  { %v5687_v11 = vpop.eup %5686 }
 0x492   :  { %v6517_v3 = vmul.f32 %v5687_v11, %v5685_v52 }
 0x494   :  { %1519 = vmatmul.mubr.f32.vlgmr.msra.gmra.mrb[8].mxu0 %v6517_v3  ;;  %1590 = vmatmul.mubr.f32.vlgmr.msra.gmra.mrb[8].mxu1 %v6517_v3 }
 0x495   :  { %4698 = vmatpush1.bf16.msra.mxu0 %v6369_v63  ;;  %4730 = vmatpush1.bf16.msra.mxu1 %v6372_v45 }
 0x496   :  { %4700 = vmatprep.subr.bf16.mxu0 %v6377_v57  ;;  %4732 = vmatprep.subr.bf16.mxu1 %v6379_v5 }
 0x497   :  { %1755 = vmatprep.mubr.f32.mxu0 %v5980_v0  ;;  %1826 = vmatprep.mubr.f32.mxu1 %v5980_v0 }
 0x499   :  { %4702 = vmatpush1.bf16.msra.mxu0 %v6381_v7  ;;  %4734 = vmatpush1.bf16.msra.mxu1 %v6384_v12 }
 0x49a   :  { %4704 = vmatprep.subr.bf16.mxu0 %v6435_v41  ;;  %4736 = vmatprep.subr.bf16.mxu1 %v6437_v56 }
 0x49d   :  { %4706 = vmatpush1.bf16.msra.mxu0 %v6439_v42  ;;  %4738 = vmatpush1.bf16.msra.mxu1 %v6442_v49 }
 0x49e   :  { %4708 = vmatprep.subr.bf16.mxu0 %v6447_v2  ;;  %4740 = vmatprep.subr.bf16.mxu1 %v6449_v6 }
 0x4a1   :  { %4710 = vmatpush1.bf16.msra.mxu0 %v6451_v10  ;;  %4742 = vmatpush1.bf16.msra.mxu1 %v6454_v19 }
 0x4a2   :  { %4712 = vmatprep.subr.bf16.mxu0 %v6459_v32  ;;  %4744 = vmatprep.subr.bf16.mxu1 %v6461_v48 }
 0x4a5   :  { %4714 = vmatpush1.bf16.msra.mxu0 %v6463_v54  ;;  %4746 = vmatpush1.bf16.msra.mxu1 %v6466_v4 }
 0x4a6   :  { %4716 = vmatprep.subr.bf16.mxu0 %v6471_v22  ;;  %4748 = vmatprep.subr.bf16.mxu1 %v6473_v21 }
 0x4a9   :  { %4718 = vmatpush1.bf16.msra.mxu0 %v6475_v33  ;;  %4750 = vmatpush1.bf16.msra.mxu1 %v6478_v43 }
 0x4aa   :  { %4720 = vmatprep.subr.bf16.mxu0 %v6482_v1  ;;  %4752 = vmatprep.subr.bf16.mxu1 %v6484_v8 }
 0x4ad   :  { %4722 = vmatpush1.bf16.msra.mxu0 %v6487_v16  ;;  %4754 = vmatpush1.bf16.msra.mxu1 %v6491_v36 }
 0x4ae   :  { %4724 = vmatprep.subr.bf16.mxu0 %v6493_v40  ;;  %4756 = vmatprep.subr.bf16.mxu1 %v6495_v9 }
 0x4b1   :  { %4726 = vmatpush1.bf16.msra.mxu0 %v6498_v15  ;;  %4758 = vmatpush1.bf16.msra.mxu1 %v6502_v17 }
 0x4b2   :  { %4760 = vmatprep.subr.bf16.mxu0 %v6365_v47  ;;  %4792 = vmatprep.subr.bf16.mxu1 %v6367_v60 }
 0x567   :  { %v1520_v25 = vpop.f32.mrb[8].mxu0  ;;  %v1591_v13 = vpop.f32.mrb[8].mxu1 }
 0x568   :  { %v5495_v23 = vadd.f32 %v1520_v25, %v6292_v35  ;;  %v1522_v26 = vpop.f32.mrb[9].mxu0  ;;  %v1593_v29 = vpop.f32.mrb[9].mxu1  ;;  %v5511_v14 = vadd.f32 %v1591_v13, %v6303_v51 }
 0x569   :  { %v5496_v44 = vadd.f32 %v1522_v26, %v6296_v38  ;;  %v5512_v18 = vadd.f32 %v1593_v29, %v6309_v59 }
 0x56a   :  { %v4222_v58 = vmul.f32 -1.442695, %v5495_v23  ;;  %v4224_v27 = vmul.f32 -1.442695, %v5511_v14 }
 0x56b   :  { %v4223_v62 = vmul.f32 -1.442695, %v5496_v44 }
 0x56c   :  { %5688 = vpow2.f32 %v4222_v58 }
 0x56d   :  { %5690 = vpow2.f32 %v4223_v62 }
 0x56e   :  { %5692 = vtanh.f32 %v5512_v18 }
 0x56f   :  { %5694 = vpow2.f32 %v4224_v27 }
 0x576   :  { %v5689_v47 = vpop.eup %5688 }
 0x577   :  { %v1605_v28 = vadd.f32 1.0, %v5689_v47  ;;  %v5691_v60 = vpop.eup %5690 }
 0x578   :  { %v1606_v53 = vadd.f32 1.0, %v5691_v60  ;;  %v5693_v46 = vpop.eup %5692 }
 0x579   :  { %5696 = vrcp.f32 %v1605_v28  ;;  %v5695_v61 = vpop.eup %5694 }
 0x57a   :  { %5698 = vrcp.f32 %v1606_v53  ;;  %v1607_v23 = vadd.f32 1.0, %v5695_v61 }
 0x57c   :  { %5700 = vrcp.f32 %v1607_v23 }
 0x583   :  { %v5697_v52 = vpop.eup %5696 }
 0x584   :  { %v1616_v11 = vmul.f32 %v5697_v52, %v5693_v46  ;;  %v5699_v25 = vpop.eup %5698 }
 0x585   :  { %v1615_v26 = vmul.f32 %v5699_v25, %v6514_v50 }
 0x586   :  { %v5701_v29 = vpop.eup %5700 }
 0x587   :  { %v6560_v13 = vadd.f32 %v1616_v11, %v1615_v26 }
 0x589   :  { %5702 = vtanh.f32 %v6560_v13 }
 0x593   :  { %v5703_v44 = vpop.eup %5702 }
 0x594   :  { %v6563_v58 = vmul.f32 %v5703_v44, %v5701_v29 }
 0x596   :  { %1756 = vmatmul.mubr.f32.vlgmr.msra.gmra.mrb[10].mxu0 %v6563_v58  ;;  %1827 = vmatmul.mubr.f32.vlgmr.msra.gmra.mrb[10].mxu1 %v6563_v58 }
 0x597   :  { %4762 = vmatpush1.bf16.msra.mxu0 %v6369_v63  ;;  %4794 = vmatpush1.bf16.msra.mxu1 %v6372_v45 }
 0x598   :  { %4764 = vmatprep.subr.bf16.mxu0 %v6377_v57  ;;  %4796 = vmatprep.subr.bf16.mxu1 %v6379_v5 }
 0x599   :  { %1992 = vmatprep.mubr.f32.mxu0 %v5980_v0  ;;  %2063 = vmatprep.mubr.f32.mxu1 %v5980_v0 }
 0x59b   :  { %4766 = vmatpush1.bf16.msra.mxu0 %v6381_v7  ;;  %4798 = vmatpush1.bf16.msra.mxu1 %v6384_v12 }
 0x59c   :  { %4768 = vmatprep.subr.bf16.mxu0 %v6435_v41  ;;  %4800 = vmatprep.subr.bf16.mxu1 %v6437_v56 }
 0x59f   :  { %4770 = vmatpush1.bf16.msra.mxu0 %v6439_v42  ;;  %4802 = vmatpush1.bf16.msra.mxu1 %v6442_v49 }
 0x5a0   :  { %4772 = vmatprep.subr.bf16.mxu0 %v6447_v2  ;;  %4804 = vmatprep.subr.bf16.mxu1 %v6449_v6 }
 0x5a3   :  { %4774 = vmatpush1.bf16.msra.mxu0 %v6451_v10  ;;  %4806 = vmatpush1.bf16.msra.mxu1 %v6454_v19 }
 0x5a4   :  { %4776 = vmatprep.subr.bf16.mxu0 %v6459_v32  ;;  %4808 = vmatprep.subr.bf16.mxu1 %v6461_v48 }
 0x5a7   :  { %4778 = vmatpush1.bf16.msra.mxu0 %v6463_v54  ;;  %4810 = vmatpush1.bf16.msra.mxu1 %v6466_v4 }
 0x5a8   :  { %4780 = vmatprep.subr.bf16.mxu0 %v6471_v22  ;;  %4812 = vmatprep.subr.bf16.mxu1 %v6473_v21 }
 0x5ab   :  { %4782 = vmatpush1.bf16.msra.mxu0 %v6475_v33  ;;  %4814 = vmatpush1.bf16.msra.mxu1 %v6478_v43 }
 0x5ac   :  { %4784 = vmatprep.subr.bf16.mxu0 %v6482_v1  ;;  %4816 = vmatprep.subr.bf16.mxu1 %v6484_v8 }
 0x5af   :  { %4786 = vmatpush1.bf16.msra.mxu0 %v6487_v16  ;;  %4818 = vmatpush1.bf16.msra.mxu1 %v6491_v36 }
 0x5b0   :  { %4788 = vmatprep.subr.bf16.mxu0 %v6493_v40  ;;  %4820 = vmatprep.subr.bf16.mxu1 %v6495_v9 }
 0x5b3   :  { %4790 = vmatpush1.bf16.msra.mxu0 %v6498_v15  ;;  %4822 = vmatpush1.bf16.msra.mxu1 %v6502_v17 }
 0x669   :  { %v1757_v63 = vpop.f32.mrb[10].mxu0  ;;  %v1828_v45 = vpop.f32.mrb[10].mxu1 }
 0x66a   :  { %v5497_v57 = vadd.f32 %v1757_v63, %v6292_v35  ;;  %v1759_v5 = vpop.f32.mrb[11].mxu0  ;;  %v1830_v7 = vpop.f32.mrb[11].mxu1  ;;  %v5513_v14 = vadd.f32 %v1828_v45, %v6303_v51 }
 0x66b   :  { %v5498_v12 = vadd.f32 %v1759_v5, %v6296_v38  ;;  %v5514_v18 = vadd.f32 %v1830_v7, %v6309_v59  ;;  %v2101_v5 = vld [vmem:[#allocation6 + $0x28] sm:$0xff] }
 0x66c   :  { %v4225_v50 = vmul.f32 -1.442695, %v5497_v57  ;;  %v4227_v27 = vmul.f32 -1.442695, %v5513_v14  ;;  %v2097_v57 = vld [vmem:[#allocation6 + $0x8] sm:$0xff] }
 0x66d   :  { %v4226_v62 = vmul.f32 -1.442695, %v5498_v12  ;;  %v4823_v7 = vpack.c.bf16 %v2101_v5, %v2097_v57  ;;  %v2103_v12 = vld [vmem:[#allocation6 + $0x38] sm:$0xff] }
 0x66e   :  { %5704 = vpow2.f32 %v4225_v50  ;;  %v2096_v50 = vld [vmem:[#allocation6] sm:$0xff] }
 0x66f   :  { %5706 = vpow2.f32 %v4226_v62  ;;  %v2100_v62 = vld [vmem:[#allocation6 + $0x20] sm:$0xff]  ;;  %4824 = vmatprep.subr.bf16.mxu0 %v4823_v7 }
 0x670   :  { %5708 = vtanh.f32 %v5514_v18  ;;  %v4825_v18 = vpack.c.bf16 %v2100_v62, %v2096_v50  ;;  %v2341_v62 = vld [vmem:[#allocation8] sm:$0xff] }
 0x671   :  { %5710 = vpow2.f32 %v4227_v27  ;;  %v2098_v27 = vld [vmem:[#allocation6 + $0x10] sm:$0xff] }
 0x678   :  { %v5705_v47 = vpop.eup %5704 }
 0x679   :  { %v1842_v28 = vadd.f32 1.0, %v5705_v47  ;;  %v5707_v60 = vpop.eup %5706  ;;  %v2102_v47 = vld [vmem:[#allocation6 + $0x30] sm:$0xff] }
 0x67a   :  { %v1843_v53 = vadd.f32 1.0, %v5707_v60  ;;  %v5709_v46 = vpop.eup %5708  ;;  %v2105_v60 = vld [vmem:[#allocation6 + $0x48] sm:$0xff] }
 0x67b   :  { %5712 = vrcp.f32 %v1842_v28  ;;  %v5711_v61 = vpop.eup %5710  ;;  %v4857_v28 = vpack.c.bf16 %v2102_v47, %v2098_v27  ;;  %v2347_v27 = vld [vmem:[#allocation8 + $0x30] sm:$0xff]  ;;  %v2350_v47 = vld [vmem:[#allocation8 + $0x48] sm:$0xff] }
 0x67c   :  { %5714 = vrcp.f32 %v1843_v53  ;;  %v1844_v23 = vadd.f32 1.0, %v5711_v61  ;;  %v2109_v53 = vld [vmem:[#allocation6 + $0x68] sm:$0xff] }
 0x67d   :  { %v4827_v61 = vpack.c.bf16 %v2109_v53, %v2105_v60  ;;  %v2352_v60 = vld [vmem:[#allocation8 + $0x58] sm:$0xff] }
 0x67e   :  { %5716 = vrcp.f32 %v1844_v23  ;;  %v2356_v53 = vld [vmem:[#allocation8 + $0x78] sm:$0xff] }
 0x685   :  { %v5713_v52 = vpop.eup %5712 }
 0x686   :  { %v1853_v11 = vmul.f32 %v5713_v52, %v5709_v46  ;;  %v5715_v25 = vpop.eup %5714  ;;  %v2107_v46 = vld [vmem:[#allocation6 + $0x58] sm:$0xff] }
 0x687   :  { %v1852_v26 = vmul.f32 %v5715_v25, %v6560_v13  ;;  %v2099_v13 = vld [vmem:[#allocation6 + $0x18] sm:$0xff]  ;;  %v2108_v25 = vld [vmem:[#allocation6 + $0x60] sm:$0xff] }
 0x688   :  { %v5717_v44 = vpop.eup %5716  ;;  %v4855_v14 = vpack.c.bf16 %v2103_v12, %v2099_v13  ;;  %v2111_v52 = vld [vmem:[#allocation6 + $0x78] sm:$0xff] }
 0x689   :  { %v6604_v29 = vadd.f32 %v1853_v11, %v1852_v26  ;;  %v2104_v11 = vld [vmem:[#allocation6 + $0x40] sm:$0xff]  ;;  %v4859_v23 = vpack.c.bf16 %v2111_v52, %v2107_v46 }
 0x68a   :  { %4856 = vmatprep.subr.bf16.mxu1 %v4855_v14  ;;  %v4829_v26 = vpack.c.bf16 %v2108_v25, %v2104_v11  ;;  %v2345_v14 = vld [vmem:[#allocation8 + $0x20] sm:$0xff] }
 0x68b   :  { %5718 = vtanh.f32 %v6604_v29  ;;  %v4889_v52 = vpack.c.bf16 %v2345_v14, %v2341_v62  ;;  %v2349_v25 = vld [vmem:[#allocation8 + $0x40] sm:$0xff] }
 0x695   :  { %v5719_v63 = vpop.eup %5718 }
 0x696   :  { %v6607_v45 = vmul.f32 %v5719_v63, %v5717_v44  ;;  %v2106_v44 = vld [vmem:[#allocation6 + $0x50] sm:$0xff] }
 0x697   :  { %v2110_v63 = vld [vmem:[#allocation6 + $0x70] sm:$0xff] }
 0x698   :  { %1993 = vmatmul.mubr.f32.vlgmr.msra.gmra.mrb[12].mxu0 %v6607_v45  ;;  %2064 = vmatmul.mubr.f32.vlgmr.msra.gmra.mrb[12].mxu1 %v6607_v45  ;;  %v4861_v57 = vpack.c.bf16 %v2110_v63, %v2106_v44  ;;  %v4923_v44 = vpack.c.bf16 %v2356_v53, %v2352_v60  ;;  %v2351_v63 = vld [vmem:[#allocation8 + $0x50] sm:$0xff] }
 0x699   :  { %2229 = vmatprep.mubr.f32.mxu0 %v5980_v0  ;;  %2300 = vmatprep.mubr.f32.mxu1 %v5980_v0  ;;  %v2375_v60 = vld [vmem:[#allocation8 + $0x110] sm:$0xff] }
 0x69a   :  { %4826 = vmatpush1.bf16.msra.mxu0 %v4825_v18  ;;  %4858 = vmatpush1.bf16.msra.mxu1 %v4857_v28  ;;  %v2343_v18 = vld [vmem:[#allocation8 + $0x10] sm:$0xff]  ;;  %v2354_v28 = vld [vmem:[#allocation8 + $0x68] sm:$0xff] }
 0x69b   :  { %4828 = vmatprep.subr.bf16.mxu0 %v4827_v61  ;;  %4860 = vmatprep.subr.bf16.mxu1 %v4859_v23  ;;  %v4921_v11 = vpack.c.bf16 %v2347_v27, %v2343_v18  ;;  %v2353_v23 = vld [vmem:[#allocation8 + $0x60] sm:$0xff]  ;;  %v2379_v53 = vld [vmem:[#allocation8 + $0x130] sm:$0xff] }
 0x69c   :  { %v2373_v18 = vld [vmem:[#allocation8 + $0x100] sm:$0xff] }
 0x69d   :  { %v2377_v27 = vld [vmem:[#allocation8 + $0x120] sm:$0xff] }
 0x69e   :  { %4830 = vmatpush1.bf16.msra.mxu0 %v4829_v26  ;;  %4862 = vmatpush1.bf16.msra.mxu1 %v4861_v57  ;;  %v4891_v26 = vpack.c.bf16 %v2354_v28, %v2350_v47  ;;  %v2355_v57 = vld [vmem:[#allocation8 + $0x70] sm:$0xff] }
 0x69f   :  { %4832 = vmatprep.subr.bf16.mxu0 %v6435_v41  ;;  %4864 = vmatprep.subr.bf16.mxu1 %v6437_v56  ;;  %v2342_v41 = vld [vmem:[#allocation8 + $0x8] sm:$0xff] }
 0x6a0   :  { %v2346_v56 = vld [vmem:[#allocation8 + $0x28] sm:$0xff] }
 0x6a2   :  { %4834 = vmatpush1.bf16.msra.mxu0 %v6439_v42  ;;  %4866 = vmatpush1.bf16.msra.mxu1 %v6442_v49  ;;  %v2344_v42 = vld [vmem:[#allocation8 + $0x18] sm:$0xff] }
 0x6a3   :  { %4836 = vmatprep.subr.bf16.mxu0 %v6447_v2  ;;  %4868 = vmatprep.subr.bf16.mxu1 %v6449_v6  ;;  %v2348_v49 = vld [vmem:[#allocation8 + $0x38] sm:$0xff]  ;;  %v4887_v2 = vpack.c.bf16 %v2346_v56, %v2342_v41  ;;  %v2358_v41 = vld [vmem:[#allocation8 + $0x88] sm:$0xff] }
 0x6a4   :  { %v4919_v6 = vpack.c.bf16 %v2348_v49, %v2344_v42  ;;  %v2362_v56 = vld [vmem:[#allocation8 + $0xa8] sm:$0xff]  ;;  %v2360_v42 = vld [vmem:[#allocation8 + $0x98] sm:$0xff] }
 0x6a5   :  { %v2364_v49 = vld [vmem:[#allocation8 + $0xb8] sm:$0xff] }
 0x6a6   :  { %4838 = vmatpush1.bf16.msra.mxu0 %v6451_v10  ;;  %4870 = vmatpush1.bf16.msra.mxu1 %v6454_v19 }
 0x6a7   :  { %4840 = vmatprep.subr.bf16.mxu0 %v6459_v32  ;;  %4872 = vmatprep.subr.bf16.mxu1 %v6461_v48 }
 0x6aa   :  { %4842 = vmatpush1.bf16.msra.mxu0 %v6463_v54  ;;  %4874 = vmatpush1.bf16.msra.mxu1 %v6466_v4 }
 0x6ab   :  { %4844 = vmatprep.subr.bf16.mxu0 %v6471_v22  ;;  %4876 = vmatprep.subr.bf16.mxu1 %v6473_v21 }
 0x6ae   :  { %4846 = vmatpush1.bf16.msra.mxu0 %v6475_v33  ;;  %4878 = vmatpush1.bf16.msra.mxu1 %v6478_v43 }
 0x6af   :  { %4848 = vmatprep.subr.bf16.mxu0 %v6482_v1  ;;  %4880 = vmatprep.subr.bf16.mxu1 %v6484_v8 }
 0x6b2   :  { %4850 = vmatpush1.bf16.msra.mxu0 %v6487_v16  ;;  %4882 = vmatpush1.bf16.msra.mxu1 %v6491_v36 }
 0x6b3   :  { %4852 = vmatprep.subr.bf16.mxu0 %v6493_v40  ;;  %4884 = vmatprep.subr.bf16.mxu1 %v6495_v9 }
 0x6b6   :  { %4854 = vmatpush1.bf16.msra.mxu0 %v6498_v15  ;;  %4886 = vmatpush1.bf16.msra.mxu1 %v6502_v17 }
 0x6b7   :  { %4888 = vmatprep.subr.bf16.mxu0 %v4887_v2  ;;  %4920 = vmatprep.subr.bf16.mxu1 %v4919_v6  ;;  %v4893_v2 = vpack.c.bf16 %v2353_v23, %v2349_v25  ;;  %v4925_v6 = vpack.c.bf16 %v2355_v57, %v2351_v63  ;;  %v4905_v25 = vpack.c.bf16 %v2377_v27, %v2373_v18  ;;  %v2687_v27 = vld [vmem:[#allocation9 + $0x10] sm:$0xff] }
 0x6b8   :  { %v4937_v23 = vpack.c.bf16 %v2379_v53, %v2375_v60  ;;  %v2698_v60 = vld [vmem:[#allocation9 + $0x68] sm:$0xff]  ;;  %v2696_v53 = vld [vmem:[#allocation9 + $0x58] sm:$0xff] }
 0x76b   :  { %v1994_v10 = vpop.f32.mrb[12].mxu0  ;;  %v2065_v19 = vpop.f32.mrb[12].mxu1 }
 0x76c   :  { %v5499_v32 = vadd.f32 %v1994_v10, %v6292_v35  ;;  %v1996_v48 = vpop.f32.mrb[13].mxu0  ;;  %v2067_v54 = vpop.f32.mrb[13].mxu1  ;;  %v5515_v33 = vadd.f32 %v2065_v19, %v6303_v51  ;;  %v2357_v10 = vld [vmem:[#allocation8 + $0x80] sm:$0xff] }
 0x76d   :  { %v5500_v4 = vadd.f32 %v1996_v48, %v6296_v38  ;;  %v5516_v43 = vadd.f32 %v2067_v54, %v6309_v59  ;;  %v2361_v19 = vld [vmem:[#allocation8 + $0xa0] sm:$0xff]  ;;  %v4927_v48 = vpack.c.bf16 %v2364_v49, %v2360_v42  ;;  %v2359_v54 = vld [vmem:[#allocation8 + $0x90] sm:$0xff]  ;;  %v2390_v42 = vld [vmem:[#allocation8 + $0x188] sm:$0xff] }
 0x76e   :  { %v4228_v22 = vmul.f32 -1.442695, %v5499_v32  ;;  %v4230_v1 = vmul.f32 -1.442695, %v5515_v33  ;;  %v4895_v32 = vpack.c.bf16 %v2362_v56, %v2358_v41  ;;  %v2368_v33 = vld [vmem:[#allocation8 + $0xd8] sm:$0xff]  ;;  %v2383_v41 = vld [vmem:[#allocation8 + $0x150] sm:$0xff] }
 0x76f   :  { %v4229_v21 = vmul.f32 -1.442695, %v5500_v4  ;;  %v2363_v4 = vld [vmem:[#allocation8 + $0xb0] sm:$0xff]  ;;  %v2394_v49 = vld [vmem:[#allocation8 + $0x1a8] sm:$0xff] }
 0x770   :  { %5720 = vpow2.f32 %v4228_v22  ;;  %v2366_v22 = vld [vmem:[#allocation8 + $0xc8] sm:$0xff]  ;;  %v2387_v56 = vld [vmem:[#allocation8 + $0x170] sm:$0xff] }
 0x771   :  { %5722 = vpow2.f32 %v4229_v21  ;;  %v2370_v21 = vld [vmem:[#allocation8 + $0xe8] sm:$0xff] }
 0x772   :  { %5724 = vtanh.f32 %v5516_v43  ;;  %v2372_v43 = vld [vmem:[#allocation8 + $0xf8] sm:$0xff] }
 0x773   :  { %5726 = vpow2.f32 %v4230_v1  ;;  %v4897_v1 = vpack.c.bf16 %v2361_v19, %v2357_v10  ;;  %v4941_v19 = vpack.c.bf16 %v2387_v56, %v2383_v41  ;;  %v2706_v41 = vld [vmem:[#allocation9 + $0xa8] sm:$0xff]  ;;  %v2704_v56 = vld [vmem:[#allocation9 + $0x98] sm:$0xff] }
 0x77a   :  { %v5721_v8 = vpop.eup %5720 }
 0x77b   :  { %v2079_v16 = vadd.f32 1.0, %v5721_v8  ;;  %v5723_v36 = vpop.eup %5722  ;;  %v4929_v8 = vpack.c.bf16 %v2363_v4, %v2359_v54  ;;  %v4911_v54 = vpack.c.bf16 %v2394_v49, %v2390_v42  ;;  %v2708_v49 = vld [vmem:[#allocation9 + $0xb8] sm:$0xff] }
 0x77c   :  { %v2080_v40 = vadd.f32 1.0, %v5723_v36  ;;  %v5725_v9 = vpop.eup %5724  ;;  %v2369_v36 = vld [vmem:[#allocation8 + $0xe0] sm:$0xff] }
 0x77d   :  { %5728 = vrcp.f32 %v2079_v16  ;;  %v5727_v15 = vpop.eup %5726  ;;  %v2365_v16 = vld [vmem:[#allocation8 + $0xc0] sm:$0xff] }
 0x77e   :  { %5730 = vrcp.f32 %v2080_v40  ;;  %v2081_v7 = vadd.f32 1.0, %v5727_v15  ;;  %v4899_v40 = vpack.c.bf16 %v2370_v21, %v2366_v22  ;;  %v2367_v15 = vld [vmem:[#allocation8 + $0xd0] sm:$0xff]  ;;  %v4901_v62 = vpack.c.bf16 %v2369_v36, %v2365_v16 }
 0x77f   :  { %v2391_v22 = vld [vmem:[#allocation8 + $0x190] sm:$0xff] }
 0x780   :  { %5732 = vrcp.f32 %v2081_v7  ;;  %v2376_v7 = vld [vmem:[#allocation8 + $0x118] sm:$0xff]  ;;  %v2395_v21 = vld [vmem:[#allocation8 + $0x1b0] sm:$0xff] }
 0x781   :  { %v4945_v36 = vpack.c.bf16 %v2395_v21, %v2391_v22  ;;  %v2714_v22 = vld [vmem:[#allocation9 + $0xe8] sm:$0xff]  ;;  %v2712_v21 = vld [vmem:[#allocation9 + $0xd8] sm:$0xff] }
 0x787   :  { %v5729_v17 = vpop.eup %5728 }
 0x788   :  { %v2090_v5 = vmul.f32 %v5729_v17, %v5725_v9  ;;  %v5731_v13 = vpop.eup %5730  ;;  %v4931_v9 = vpack.c.bf16 %v2372_v43, %v2368_v33  ;;  %v2371_v17 = vld [vmem:[#allocation8 + $0xf0] sm:$0xff]  ;;  %v2398_v33 = vld [vmem:[#allocation8 + $0x1c8] sm:$0xff] }
 0x789   :  { %v2089_v12 = vmul.f32 %v5731_v13, %v6604_v29  ;;  %v2378_v13 = vld [vmem:[#allocation8 + $0x128] sm:$0xff]  ;;  %v4933_v14 = vpack.c.bf16 %v2371_v17, %v2367_v15  ;;  %v2401_v17 = vld [vmem:[#allocation8 + $0x1e0] sm:$0xff] }
 0x78a   :  { %v5733_v46 = vpop.eup %5732  ;;  %v2402_v43 = vld [vmem:[#allocation8 + $0x1e8] sm:$0xff] }
 0x78b   :  { %v6642_v50 = vadd.f32 %v2090_v5, %v2089_v12  ;;  %v2374_v5 = vld [vmem:[#allocation8 + $0x108] sm:$0xff]  ;;  %v2380_v12 = vld [vmem:[#allocation8 + $0x138] sm:$0xff] }
 0x78c   :  { %v4903_v47 = vpack.c.bf16 %v2378_v13, %v2374_v5  ;;  %v4935_v28 = vpack.c.bf16 %v2380_v12, %v2376_v7  ;;  %v2399_v5 = vld [vmem:[#allocation8 + $0x1d0] sm:$0xff] }
 0x78d   :  { %5734 = vtanh.f32 %v6642_v50  ;;  %v2403_v13 = vld [vmem:[#allocation8 + $0x1f0] sm:$0xff] }
 0x78e   :  { %v4949_v12 = vpack.c.bf16 %v2403_v13, %v2399_v5  ;;  %v2722_v5 = vld [vmem:[#allocation9 + $0x128] sm:$0xff]  ;;  %v2720_v13 = vld [vmem:[#allocation9 + $0x118] sm:$0xff] }
 0x797   :  { %v5735_v61 = vpop.eup %5734 }
 0x798   :  { %v6645_v29 = vmul.f32 %v5735_v61, %v5733_v46  ;;  %v2382_v46 = vld [vmem:[#allocation8 + $0x148] sm:$0xff] }
 0x799   :  { %v2386_v61 = vld [vmem:[#allocation8 + $0x168] sm:$0xff] }
 0x79a   :  { %2230 = vmatmul.mubr.f32.vlgmr.msra.gmra.mrb[14].mxu0 %v6645_v29  ;;  %2301 = vmatmul.mubr.f32.vlgmr.msra.gmra.mrb[14].mxu1 %v6645_v29  ;;  %v4907_v63 = vpack.c.bf16 %v2386_v61, %v2382_v46  ;;  %v2700_v61 = vld [vmem:[#allocation9 + $0x78] sm:$0xff] }
 0x79b   :  { %4890 = vmatpush1.bf16.msra.mxu0 %v4889_v52  ;;  %4922 = vmatpush1.bf16.msra.mxu1 %v4921_v11  ;;  %v2384_v52 = vld [vmem:[#allocation8 + $0x158] sm:$0xff] }
 0x79c   :  { %4892 = vmatprep.subr.bf16.mxu0 %v4891_v26  ;;  %4924 = vmatprep.subr.bf16.mxu1 %v4923_v44  ;;  %v2388_v11 = vld [vmem:[#allocation8 + $0x178] sm:$0xff]  ;;  %v2381_v26 = vld [vmem:[#allocation8 + $0x140] sm:$0xff] }
 0x79d   :  { %2491 = vmatprep.mubr.f32.mxu0 %v5980_v0  ;;  %2604 = vmatprep.mubr.f32.mxu1 %v5980_v0  ;;  %v2385_v44 = vld [vmem:[#allocation8 + $0x160] sm:$0xff]  ;;  %v4939_v57 = vpack.c.bf16 %v2388_v11, %v2384_v52 }
 0x79e   :  { %v4909_v10 = vpack.c.bf16 %v2385_v44, %v2381_v26  ;;  %v2693_v52 = vld [vmem:[#allocation9 + $0x40] sm:$0xff]  ;;  %v2695_v26 = vld [vmem:[#allocation9 + $0x50] sm:$0xff] }
 0x79f   :  { %4894 = vmatpush1.bf16.msra.mxu0 %v4893_v2  ;;  %4926 = vmatpush1.bf16.msra.mxu1 %v4925_v6  ;;  %v2392_v2 = vld [vmem:[#allocation8 + $0x198] sm:$0xff]  ;;  %v2697_v11 = vld [vmem:[#allocation9 + $0x60] sm:$0xff]  ;;  %v2699_v44 = vld [vmem:[#allocation9 + $0x70] sm:$0xff] }
 0x7a0   :  { %4896 = vmatprep.subr.bf16.mxu0 %v4895_v32  ;;  %4928 = vmatprep.subr.bf16.mxu1 %v4927_v48  ;;  %v2396_v6 = vld [vmem:[#allocation8 + $0x1b8] sm:$0xff]  ;;  %v2389_v32 = vld [vmem:[#allocation8 + $0x180] sm:$0xff] }
 0x7a1   :  { %v2393_v48 = vld [vmem:[#allocation8 + $0x1a0] sm:$0xff]  ;;  %v4943_v4 = vpack.c.bf16 %v2396_v6, %v2392_v2 }
 0x7a2   :  { %v4913_v16 = vpack.c.bf16 %v2393_v48, %v2389_v32  ;;  %v2701_v2 = vld [vmem:[#allocation9 + $0x80] sm:$0xff]  ;;  %v2703_v32 = vld [vmem:[#allocation9 + $0x90] sm:$0xff] }
 0x7a3   :  { %4898 = vmatpush1.bf16.msra.mxu0 %v4897_v1  ;;  %4930 = vmatpush1.bf16.msra.mxu1 %v4929_v8  ;;  %v2400_v1 = vld [vmem:[#allocation8 + $0x1d8] sm:$0xff]  ;;  %v2705_v6 = vld [vmem:[#allocation9 + $0xa0] sm:$0xff]  ;;  %v2707_v48 = vld [vmem:[#allocation9 + $0xb0] sm:$0xff] }
 0x7a4   :  { %4900 = vmatprep.subr.bf16.mxu0 %v4899_v40  ;;  %4932 = vmatprep.subr.bf16.mxu1 %v4931_v9  ;;  %v2404_v8 = vld [vmem:[#allocation8 + $0x1f8] sm:$0xff]  ;;  %v2397_v40 = vld [vmem:[#allocation8 + $0x1c0] sm:$0xff]  ;;  %v4915_v9 = vpack.c.bf16 %v2402_v43, %v2398_v33 }
 0x7a5   :  { %v4947_v15 = vpack.c.bf16 %v2404_v8, %v2400_v1  ;;  %v4917_v7 = vpack.c.bf16 %v2401_v17, %v2397_v40  ;;  %v2716_v43 = vld [vmem:[#allocation9 + $0xf8] sm:$0xff]  ;;  %v2709_v1 = vld [vmem:[#allocation9 + $0xc0] sm:$0xff]  ;;  %v2711_v40 = vld [vmem:[#allocation9 + $0xd0] sm:$0xff] }
 0x7a6   :  { %v2713_v8 = vld [vmem:[#allocation9 + $0xe0] sm:$0xff]  ;;  %v2718_v17 = vld [vmem:[#allocation9 + $0x108] sm:$0xff] }
 0x7a7   :  { %4902 = vmatpush1.bf16.msra.mxu0 %v4901_v62  ;;  %4934 = vmatpush1.bf16.msra.mxu1 %v4933_v14  ;;  %v2685_v62 = vld [vmem:[#allocation9] sm:$0xff] }
 0x7a8   :  { %4904 = vmatprep.subr.bf16.mxu0 %v4903_v47  ;;  %4936 = vmatprep.subr.bf16.mxu1 %v4935_v28  ;;  %v2691_v47 = vld [vmem:[#allocation9 + $0x30] sm:$0xff]  ;;  %v2694_v28 = vld [vmem:[#allocation9 + $0x48] sm:$0xff] }
 0x7a9   :  { %v6691_v46 = vpack.c.bf16 %v2698_v60, %v2694_v28  ;;  %v2730_v28 = vld [vmem:[#allocation9 + $0x168] sm:$0xff]  ;;  %v2728_v60 = vld [vmem:[#allocation9 + $0x158] sm:$0xff] }
 0x7ab   :  { %4906 = vmatpush1.bf16.msra.mxu0 %v4905_v25  ;;  %4938 = vmatpush1.bf16.msra.mxu1 %v4937_v23  ;;  %v6693_v25 = vpack.c.bf16 %v2700_v61, %v2696_v53  ;;  %v6695_v23 = vpack.c.bf16 %v2697_v11, %v2693_v52  ;;  %v2732_v53 = vld [vmem:[#allocation9 + $0x178] sm:$0xff]  ;;  %v2725_v11 = vld [vmem:[#allocation9 + $0x140] sm:$0xff] }
 0x7ac   :  { %4908 = vmatprep.subr.bf16.mxu0 %v4907_v63  ;;  %4940 = vmatprep.subr.bf16.mxu1 %v4939_v57  ;;  %v6698_v63 = vpack.c.bf16 %v2699_v44, %v2695_v26  ;;  %v2702_v57 = vld [vmem:[#allocation9 + $0x88] sm:$0xff]  ;;  %v6740_v52 = vpack.c.bf16 %v2732_v53, %v2728_v60  ;;  %v2729_v26 = vld [vmem:[#allocation9 + $0x160] sm:$0xff]  ;;  %v2727_v44 = vld [vmem:[#allocation9 + $0x150] sm:$0xff] }
 0x7ad   :  { %v6703_v42 = vpack.c.bf16 %v2706_v41, %v2702_v57  ;;  %v6743_v57 = vpack.c.bf16 %v2729_v26, %v2725_v11  ;;  %v2731_v41 = vld [vmem:[#allocation9 + $0x170] sm:$0xff] }
 0x7af   :  { %4910 = vmatpush1.bf16.msra.mxu0 %v4909_v10  ;;  %4942 = vmatpush1.bf16.msra.mxu1 %v4941_v19  ;;  %v6705_v10 = vpack.c.bf16 %v2708_v49, %v2704_v56  ;;  %v6707_v19 = vpack.c.bf16 %v2705_v6, %v2701_v2  ;;  %v2734_v56 = vld [vmem:[#allocation9 + $0x188] sm:$0xff]  ;;  %v6747_v2 = vpack.c.bf16 %v2731_v41, %v2727_v44 }
 0x7b0   :  { %4912 = vmatprep.subr.bf16.mxu0 %v4911_v54  ;;  %4944 = vmatprep.subr.bf16.mxu1 %v4943_v4  ;;  %v6710_v54 = vpack.c.bf16 %v2707_v48, %v2703_v32  ;;  %v2710_v4 = vld [vmem:[#allocation9 + $0xc8] sm:$0xff]  ;;  %v2736_v32 = vld [vmem:[#allocation9 + $0x198] sm:$0xff] }
 0x7b1   :  { %v6715_v33 = vpack.c.bf16 %v2714_v22, %v2710_v4  ;;  %v2738_v49 = vld [vmem:[#allocation9 + $0x1a8] sm:$0xff]  ;;  %v2740_v48 = vld [vmem:[#allocation9 + $0x1b8] sm:$0xff]  ;;  %v2733_v4 = vld [vmem:[#allocation9 + $0x180] sm:$0xff] }
 0x7b2   :  { %v6749_v6 = vpack.c.bf16 %v2738_v49, %v2734_v56  ;;  %v6751_v22 = vpack.c.bf16 %v2740_v48, %v2736_v32 }
 0x7b3   :  { %4914 = vmatpush1.bf16.msra.mxu0 %v4913_v16  ;;  %4946 = vmatpush1.bf16.msra.mxu1 %v4945_v36  ;;  %v6717_v16 = vpack.c.bf16 %v2716_v43, %v2712_v21  ;;  %v6719_v36 = vpack.c.bf16 %v2713_v8, %v2709_v1  ;;  %v2737_v21 = vld [vmem:[#allocation9 + $0x1a0] sm:$0xff]  ;;  %v2735_v43 = vld [vmem:[#allocation9 + $0x190] sm:$0xff] }
 0x7b4   :  { %4916 = vmatprep.subr.bf16.mxu0 %v4915_v9  ;;  %4948 = vmatprep.subr.bf16.mxu1 %v4947_v15  ;;  %v2715_v9 = vld [vmem:[#allocation9 + $0xf0] sm:$0xff]  ;;  %v6754_v8 = vpack.c.bf16 %v2737_v21, %v2733_v4 }
 0x7b5   :  { %v6722_v15 = vpack.c.bf16 %v2715_v9, %v2711_v40  ;;  %v2739_v1 = vld [vmem:[#allocation9 + $0x1b0] sm:$0xff]  ;;  %v2742_v9 = vld [vmem:[#allocation9 + $0x1c8] sm:$0xff] }
 0x7b6   :  { %v6758_v40 = vpack.c.bf16 %v2739_v1, %v2735_v43 }
 0x7b7   :  { %4918 = vmatpush1.bf16.msra.mxu0 %v4917_v7  ;;  %4950 = vmatpush1.bf16.msra.mxu1 %v4949_v12  ;;  %v6727_v7 = vpack.c.bf16 %v2722_v5, %v2718_v17  ;;  %v2724_v12 = vld [vmem:[#allocation9 + $0x138] sm:$0xff]  ;;  %v2746_v17 = vld [vmem:[#allocation9 + $0x1e8] sm:$0xff] }
 0x7b8   :  { %v2744_v5 = vld [vmem:[#allocation9 + $0x1d8] sm:$0xff] }
 0x7ba   :  { %2492 = vmatmul.mubr.f32.vlgmr.msra.gmra.mrb[16].mxu0 %v6315_v39  ;;  %2605 = vmatmul.mubr.f32.vlgmr.msra.gmra.mrb[16].mxu1 %v6315_v39  ;;  %v2686_v39 = vld [vmem:[#allocation9 + $0x8] sm:$0xff] }
 0x7bb   :  { %2497 = vmatprep.mubr.f32.mxu0 %v5980_v0  ;;  %2610 = vmatprep.mubr.f32.mxu1 %v5980_v0 }
 0x7be   :  { %2498 = vmatmul.mubr.f32.gmra.mrb[18].mxu0 %v6359_v24  ;;  %2611 = vmatmul.mubr.f32.gmra.mrb[18].mxu1 %v6359_v24  ;;  %v2690_v24 = vld [vmem:[#allocation9 + $0x28] sm:$0xff] }
 0x7bf   :  { %2503 = vmatprep.mubr.f32.mxu0 %v5980_v0  ;;  %2616 = vmatprep.mubr.f32.mxu1 %v5980_v0 }
 0x7c2   :  { %2504 = vmatmul.mubr.f32.gmra.mrb[20].mxu0 %v6423_v20  ;;  %2617 = vmatmul.mubr.f32.gmra.mrb[20].mxu1 %v6423_v20  ;;  %v2688_v20 = vld [vmem:[#allocation9 + $0x18] sm:$0xff] }
 0x7c3   :  { %2509 = vmatprep.mubr.f32.mxu0 %v5980_v0  ;;  %2622 = vmatprep.mubr.f32.mxu1 %v5980_v0 }
 0x7c6   :  { %2510 = vmatmul.mubr.f32.gmra.mrb[22].mxu0 %v6517_v3  ;;  %2623 = vmatmul.mubr.f32.gmra.mrb[22].mxu1 %v6517_v3  ;;  %v6679_v3 = vpack.c.bf16 %v2690_v24, %v2686_v39  ;;  %v2717_v39 = vld [vmem:[#allocation9 + $0x100] sm:$0xff] }
 0x7c7   :  { %2515 = vmatprep.mubr.f32.mxu0 %v5980_v0  ;;  %2628 = vmatprep.mubr.f32.mxu1 %v5980_v0  ;;  %v2721_v24 = vld [vmem:[#allocation9 + $0x120] sm:$0xff] }
 0x7c8   :  { %4952 = vmatprep.subr.bf16.mxu0 %v6679_v3 }
 0x7ca   :  { %2516 = vmatmul.mubr.f32.gmra.mrb[24].mxu0 %v6563_v58  ;;  %2629 = vmatmul.mubr.f32.gmra.mrb[24].mxu1 %v6563_v58  ;;  %v2692_v58 = vld [vmem:[#allocation9 + $0x38] sm:$0xff] }
 0x7cb   :  { %2521 = vmatprep.mubr.f32.mxu0 %v5980_v0  ;;  %2634 = vmatprep.mubr.f32.mxu1 %v5980_v0  ;;  %v6681_v14 = vpack.c.bf16 %v2692_v58, %v2688_v20  ;;  %v6729_v20 = vpack.c.bf16 %v2724_v12, %v2720_v13  ;;  %v6731_v58 = vpack.c.bf16 %v2721_v24, %v2717_v39  ;;  %v2748_v12 = vld [vmem:[#allocation9 + $0x1f8] sm:$0xff]  ;;  %v2741_v39 = vld [vmem:[#allocation9 + $0x1c0] sm:$0xff] }
 0x7cc   :  { %v6763_v13 = vpack.c.bf16 %v2746_v17, %v2742_v9  ;;  %v2745_v24 = vld [vmem:[#allocation9 + $0x1e0] sm:$0xff] }
 0x7cd   :  { %4984 = vmatprep.subr.bf16.mxu1 %v6681_v14 }
 0x7ce   :  { %2522 = vmatmul.mubr.f32.gmra.mrb[26].mxu0 %v6607_v45  ;;  %2635 = vmatmul.mubr.f32.gmra.mrb[26].mxu1 %v6607_v45  ;;  %v2689_v45 = vld [vmem:[#allocation9 + $0x20] sm:$0xff] }
 0x7cf   :  { %2527 = vmatprep.mubr.f32.mxu0 %v5980_v0  ;;  %2640 = vmatprep.mubr.f32.mxu1 %v5980_v0  ;;  %v6683_v18 = vpack.c.bf16 %v2689_v45, %v2685_v62  ;;  %v2719_v62 = vld [vmem:[#allocation9 + $0x110] sm:$0xff] }
 0x7d0   :  { %v2723_v45 = vld [vmem:[#allocation9 + $0x130] sm:$0xff] }
 0x7d1   :  { %4954 = vmatpush1.bf16.msra.mxu0 %v6683_v18 }
 0x7d2   :  { %2528 = vmatmul.mubr.f32.gmra.mrb[28].mxu0 %v6645_v29  ;;  %2641 = vmatmul.mubr.f32.gmra.mrb[28].mxu1 %v6645_v29  ;;  %v6686_v29 = vpack.c.bf16 %v2691_v47, %v2687_v27  ;;  %v2726_v27 = vld [vmem:[#allocation9 + $0x148] sm:$0xff]  ;;  %v6734_v47 = vpack.c.bf16 %v2723_v45, %v2719_v62  ;;  %v6765_v62 = vpack.c.bf16 %v2748_v12, %v2744_v5 }
 0x7d3   :  { %2533 = vmatprep.mubr.f32.mxu0 %v5980_v0  ;;  %2646 = vmatprep.mubr.f32.mxu1 %v5980_v0  ;;  %v6738_v61 = vpack.c.bf16 %v2730_v28, %v2726_v27  ;;  %v6767_v45 = vpack.c.bf16 %v2745_v24, %v2741_v39  ;;  %v2743_v27 = vld [vmem:[#allocation9 + $0x1d0] sm:$0xff] }
 0x7d4   :  { %4986 = vmatpush1.bf16.msra.mxu1 %v6686_v29  ;;  %4956 = vmatprep.subr.bf16.mxu0 %v6691_v46  ;;  %v2747_v28 = vld [vmem:[#allocation9 + $0x1f0] sm:$0xff] }
 0x7d5   :  { %4988 = vmatprep.subr.bf16.mxu1 %v6693_v25  ;;  %4958 = vmatpush1.bf16.msra.mxu0 %v6695_v23  ;;  %v6770_v60 = vpack.c.bf16 %v2747_v28, %v2743_v27 }
 0x7d6   :  { %4960 = vmatprep.subr.bf16.mxu0 %v6703_v42 }
 0x7d8   :  { %4990 = vmatpush1.bf16.msra.mxu1 %v6698_v63 }
 0x7d9   :  { %4992 = vmatprep.subr.bf16.mxu1 %v6705_v10  ;;  %4962 = vmatpush1.bf16.msra.mxu0 %v6707_v19 }
 0x7da   :  { %4964 = vmatprep.subr.bf16.mxu0 %v6715_v33 }
 0x7dc   :  { %4994 = vmatpush1.bf16.msra.mxu1 %v6710_v54 }
 0x7dd   :  { %4996 = vmatprep.subr.bf16.mxu1 %v6717_v16  ;;  %4966 = vmatpush1.bf16.msra.mxu0 %v6719_v36 }
 0x7de   :  { %4968 = vmatprep.subr.bf16.mxu0 %v6727_v7 }
 0x7e0   :  { %4998 = vmatpush1.bf16.msra.mxu1 %v6722_v15 }
 0x7e1   :  { %5000 = vmatprep.subr.bf16.mxu1 %v6729_v20  ;;  %4970 = vmatpush1.bf16.msra.mxu0 %v6731_v58 }
 0x7e2   :  { %4972 = vmatprep.subr.bf16.mxu0 %v6738_v61 }
 0x7e4   :  { %5002 = vmatpush1.bf16.msra.mxu1 %v6734_v47 }
 0x7e5   :  { %5004 = vmatprep.subr.bf16.mxu1 %v6740_v52  ;;  %4974 = vmatpush1.bf16.msra.mxu0 %v6743_v57 }
 0x7e6   :  { %4976 = vmatprep.subr.bf16.mxu0 %v6749_v6 }
 0x7e8   :  { %5006 = vmatpush1.bf16.msra.mxu1 %v6747_v2 }
 0x7e9   :  { %5008 = vmatprep.subr.bf16.mxu1 %v6751_v22  ;;  %4978 = vmatpush1.bf16.msra.mxu0 %v6754_v8 }
 0x7ea   :  { %4980 = vmatprep.subr.bf16.mxu0 %v6763_v13 }
 0x7ec   :  { %5010 = vmatpush1.bf16.msra.mxu1 %v6758_v40 }
 0x7ed   :  { %5012 = vmatprep.subr.bf16.mxu1 %v6765_v62  ;;  %4982 = vmatpush1.bf16.msra.mxu0 %v6767_v45 }
 0x7ee   :  { %5016 = vmatprep.subr.bf16.mxu0 %v6679_v3 }
 0x7f0   :  { %5014 = vmatpush1.bf16.msra.mxu1 %v6770_v60 }
 0x7f1   :  { %5048 = vmatprep.subr.bf16.mxu1 %v6681_v14 }
 0x86d   :  { %v2231_v53 = vpop.f32.mrb[14].mxu0  ;;  %v2302_v11 = vpop.f32.mrb[14].mxu1 }
 0x86e   :  { %v5501_v26 = vadd.f32 %v2231_v53, %v6292_v35  ;;  %v2233_v44 = vpop.f32.mrb[15].mxu0  ;;  %v2304_v41 = vpop.f32.mrb[15].mxu1  ;;  %v5517_v48 = vadd.f32 %v2302_v11, %v6303_v51 }
 0x86f   :  { %v5502_v56 = vadd.f32 %v2233_v44, %v6296_v38  ;;  %v5518_v4 = vadd.f32 %v2304_v41, %v6309_v59 }
 0x870   :  { %v4231_v49 = vmul.f32 -1.442695, %v5501_v26  ;;  %v4233_v21 = vmul.f32 -1.442695, %v5517_v48 }
 0x871   :  { %v4232_v32 = vmul.f32 -1.442695, %v5502_v56 }
 0x872   :  { %5736 = vpow2.f32 %v4231_v49 }
 0x873   :  { %5738 = vpow2.f32 %v4232_v32 }
 0x874   :  { %5740 = vtanh.f32 %v5518_v4 }
 0x875   :  { %5742 = vpow2.f32 %v4233_v21 }
 0x87c   :  { %v5737_v43 = vpop.eup %5736 }
 0x87d   :  { %v2316_v1 = vadd.f32 1.0, %v5737_v43  ;;  %v5739_v9 = vpop.eup %5738 }
 0x87e   :  { %v2317_v35 = vadd.f32 1.0, %v5739_v9  ;;  %v5741_v17 = vpop.eup %5740 }
 0x87f   :  { %5744 = vrcp.f32 %v2316_v1  ;;  %v5743_v5 = vpop.eup %5742 }
 0x880   :  { %5746 = vrcp.f32 %v2317_v35  ;;  %v2318_v24 = vadd.f32 1.0, %v5743_v5 }
 0x882   :  { %5748 = vrcp.f32 %v2318_v24 }
 0x889   :  { %v5745_v38 = vpop.eup %5744 }
 0x88a   :  { %v2327_v12 = vmul.f32 %v5745_v38, %v5741_v17  ;;  %v5747_v39 = vpop.eup %5746 }
 0x88b   :  { %v2326_v27 = vmul.f32 %v5747_v39, %v6642_v50  ;;  %v2405_v50 = vld [vmem:[%s7162_s6] sm:$0xf] }
 0x88c   :  { %v5749_v59 = vpop.eup %5748  ;;  %v6825_v11 = vrot.slane %v2405_v50, %v163_v31  ;;  %v6829_v26 = vrot.slane %v2405_v50, %v167_v34  ;;  %v6835_v43 = vrot.slane %v2405_v50, %v171_v37  ;;  %v6839_v31 = vrot.slane %v2405_v50, %v175_v55 }
 0x88d   :  { %v2328_v51 = vadd.f32 %v2327_v12, %v2326_v27 }
 0x88f   :  { %5750 = vtanh.f32 %v2328_v51 }
 0x899   :  { %v5751_v28 = vpop.eup %5750 }
 0x89a   :  { %v2330_v53 = vmul.f32 %v5751_v28, %v5749_v59 }
 0x89c   :  { %2534 = vmatmul.mubr.f32.gmra.mrb[30].mxu0 %v2330_v53  ;;  %2647 = vmatmul.mubr.f32.gmra.mrb[30].mxu1 %v2330_v53 }
 0x89d   :  { %2817 = vmatprep.mubr.f32.mxu0 %v5980_v0  ;;  %2888 = vmatprep.mubr.f32.mxu1 %v5980_v0 }
 0x8a0   :  { %2818 = vmatmul.mubr.f32.vlgmr.msra.gmra.mrb[16].mxu0 %v5980_v0  ;;  %2889 = vmatmul.mubr.f32.vlgmr.msra.gmra.mrb[16].mxu1 %v5980_v0 }
 0x8a1   :  { %5018 = vmatpush1.bf16.msra.mxu0 %v6683_v18  ;;  %5050 = vmatpush1.bf16.msra.mxu1 %v6686_v29 }
 0x8a2   :  { %5020 = vmatprep.subr.bf16.mxu0 %v6691_v46  ;;  %5052 = vmatprep.subr.bf16.mxu1 %v6693_v25 }
 0x8a3   :  { %2987 = vmatprep.mubr.f32.mxu0 %v5980_v0  ;;  %3058 = vmatprep.mubr.f32.mxu1 %v5980_v0 }
 0x8a5   :  { %5022 = vmatpush1.bf16.msra.mxu0 %v6695_v23  ;;  %5054 = vmatpush1.bf16.msra.mxu1 %v6698_v63 }
 0x8a6   :  { %5024 = vmatprep.subr.bf16.mxu0 %v6703_v42  ;;  %5056 = vmatprep.subr.bf16.mxu1 %v6705_v10 }
 0x8a9   :  { %5026 = vmatpush1.bf16.msra.mxu0 %v6707_v19  ;;  %5058 = vmatpush1.bf16.msra.mxu1 %v6710_v54 }
 0x8aa   :  { %5028 = vmatprep.subr.bf16.mxu0 %v6715_v33  ;;  %5060 = vmatprep.subr.bf16.mxu1 %v6717_v16 }
 0x8ad   :  { %5030 = vmatpush1.bf16.msra.mxu0 %v6719_v36  ;;  %5062 = vmatpush1.bf16.msra.mxu1 %v6722_v15 }
 0x8ae   :  { %5032 = vmatprep.subr.bf16.mxu0 %v6727_v7  ;;  %5064 = vmatprep.subr.bf16.mxu1 %v6729_v20 }
 0x8b1   :  { %5034 = vmatpush1.bf16.msra.mxu0 %v6731_v58  ;;  %5066 = vmatpush1.bf16.msra.mxu1 %v6734_v47 }
 0x8b2   :  { %5036 = vmatprep.subr.bf16.mxu0 %v6738_v61  ;;  %5068 = vmatprep.subr.bf16.mxu1 %v6740_v52 }
 0x8b5   :  { %5038 = vmatpush1.bf16.msra.mxu0 %v6743_v57  ;;  %5070 = vmatpush1.bf16.msra.mxu1 %v6747_v2 }
 0x8b6   :  { %5040 = vmatprep.subr.bf16.mxu0 %v6749_v6  ;;  %5072 = vmatprep.subr.bf16.mxu1 %v6751_v22 }
 0x8b9   :  { %5042 = vmatpush1.bf16.msra.mxu0 %v6754_v8  ;;  %5074 = vmatpush1.bf16.msra.mxu1 %v6758_v40 }
 0x8ba   :  { %5044 = vmatprep.subr.bf16.mxu0 %v6763_v13  ;;  %5076 = vmatprep.subr.bf16.mxu1 %v6765_v62 }
 0x8bd   :  { %5046 = vmatpush1.bf16.msra.mxu0 %v6767_v45  ;;  %5078 = vmatpush1.bf16.msra.mxu1 %v6770_v60 }
 0x8be   :  { %5080 = vmatprep.subr.bf16.mxu0 %v6679_v3  ;;  %5112 = vmatprep.subr.bf16.mxu1 %v6681_v14 }
 0x973   :  { %v2819_v44 = vpop.f32.mrb[16].mxu0  ;;  %v2890_v41 = vpop.f32.mrb[16].mxu1 }
 0x974   :  { %v5519_v56 = vadd.f32 %v2819_v44, %v6825_v11  ;;  %v2821_v49 = vpop.f32.mrb[17].mxu0  ;;  %v2892_v32 = vpop.f32.mrb[17].mxu1  ;;  %v5535_v34 = vadd.f32 %v2890_v41, %v6835_v43 }
 0x975   :  { %v5520_v48 = vadd.f32 %v2821_v49, %v6829_v26  ;;  %v5536_v1 = vadd.f32 %v2892_v32, %v6839_v31 }
 0x976   :  { %v4234_v4 = vmul.f32 -1.442695, %v5519_v56  ;;  %v4236_v9 = vmul.f32 -1.442695, %v5535_v34 }
 0x977   :  { %v4235_v21 = vmul.f32 -1.442695, %v5520_v48 }
 0x978   :  { %5752 = vpow2.f32 %v4234_v4 }
 0x979   :  { %5754 = vpow2.f32 %v4235_v21 }
 0x97a   :  { %5756 = vtanh.f32 %v5536_v1 }
 0x97b   :  { %5758 = vpow2.f32 %v4236_v9 }
 0x982   :  { %v5753_v35 = vpop.eup %5752 }
 0x983   :  { %v2904_v17 = vadd.f32 1.0, %v5753_v35  ;;  %v5755_v5 = vpop.eup %5754 }
 0x984   :  { %v2905_v38 = vadd.f32 1.0, %v5755_v5  ;;  %v5757_v37 = vpop.eup %5756 }
 0x985   :  { %5760 = vrcp.f32 %v2904_v17  ;;  %v5759_v12 = vpop.eup %5758 }
 0x986   :  { %5762 = vrcp.f32 %v2905_v38  ;;  %v2906_v55 = vadd.f32 1.0, %v5759_v12 }
 0x988   :  { %5764 = vrcp.f32 %v2906_v55 }
 0x98f   :  { %v5761_v39 = vpop.eup %5760 }
 0x990   :  { %v2915_v24 = vmul.f32 %v5761_v39, %v5757_v37  ;;  %v5763_v30 = vpop.eup %5762 }
 0x991   :  { %v2914_v27 = vmul.f32 0.0, %v5763_v30 }
 0x992   :  { %v5765_v59 = vpop.eup %5764 }
 0x993   :  { %v6843_v51 = vadd.f32 %v2915_v24, %v2914_v27 }
 0x995   :  { %5766 = vtanh.f32 %v6843_v51 }
 0x99f   :  { %v5767_v28 = vpop.eup %5766 }
 0x9a0   :  { %v2918_v53 = vmul.f32 %v5767_v28, %v5765_v59 }
 0x9a2   :  { %2988 = vmatmul.mubr.f32.vlgmr.msra.gmra.mrb[18].mxu0 %v2918_v53  ;;  %3059 = vmatmul.mubr.f32.vlgmr.msra.gmra.mrb[18].mxu1 %v2918_v53 }
 0x9a3   :  { %5082 = vmatpush1.bf16.msra.mxu0 %v6683_v18  ;;  %5114 = vmatpush1.bf16.msra.mxu1 %v6686_v29 }
 0x9a4   :  { %5084 = vmatprep.subr.bf16.mxu0 %v6691_v46  ;;  %5116 = vmatprep.subr.bf16.mxu1 %v6693_v25 }
 0x9a5   :  { %3157 = vmatprep.mubr.f32.mxu0 %v5980_v0  ;;  %3228 = vmatprep.mubr.f32.mxu1 %v5980_v0 }
 0x9a7   :  { %5086 = vmatpush1.bf16.msra.mxu0 %v6695_v23  ;;  %5118 = vmatpush1.bf16.msra.mxu1 %v6698_v63 }
 0x9a8   :  { %5088 = vmatprep.subr.bf16.mxu0 %v6703_v42  ;;  %5120 = vmatprep.subr.bf16.mxu1 %v6705_v10 }
 0x9ab   :  { %5090 = vmatpush1.bf16.msra.mxu0 %v6707_v19  ;;  %5122 = vmatpush1.bf16.msra.mxu1 %v6710_v54 }
 0x9ac   :  { %5092 = vmatprep.subr.bf16.mxu0 %v6715_v33  ;;  %5124 = vmatprep.subr.bf16.mxu1 %v6717_v16 }
 0x9af   :  { %5094 = vmatpush1.bf16.msra.mxu0 %v6719_v36  ;;  %5126 = vmatpush1.bf16.msra.mxu1 %v6722_v15 }
 0x9b0   :  { %5096 = vmatprep.subr.bf16.mxu0 %v6727_v7  ;;  %5128 = vmatprep.subr.bf16.mxu1 %v6729_v20 }
 0x9b3   :  { %5098 = vmatpush1.bf16.msra.mxu0 %v6731_v58  ;;  %5130 = vmatpush1.bf16.msra.mxu1 %v6734_v47 }
 0x9b4   :  { %5100 = vmatprep.subr.bf16.mxu0 %v6738_v61  ;;  %5132 = vmatprep.subr.bf16.mxu1 %v6740_v52 }
 0x9b7   :  { %5102 = vmatpush1.bf16.msra.mxu0 %v6743_v57  ;;  %5134 = vmatpush1.bf16.msra.mxu1 %v6747_v2 }
 0x9b8   :  { %5104 = vmatprep.subr.bf16.mxu0 %v6749_v6  ;;  %5136 = vmatprep.subr.bf16.mxu1 %v6751_v22 }
 0x9bb   :  { %5106 = vmatpush1.bf16.msra.mxu0 %v6754_v8  ;;  %5138 = vmatpush1.bf16.msra.mxu1 %v6758_v40 }
 0x9bc   :  { %5108 = vmatprep.subr.bf16.mxu0 %v6763_v13  ;;  %5140 = vmatprep.subr.bf16.mxu1 %v6765_v62 }
 0x9bf   :  { %5110 = vmatpush1.bf16.msra.mxu0 %v6767_v45  ;;  %5142 = vmatpush1.bf16.msra.mxu1 %v6770_v60 }
 0x9c0   :  { %5144 = vmatprep.subr.bf16.mxu0 %v6679_v3  ;;  %5176 = vmatprep.subr.bf16.mxu1 %v6681_v14 }
 0xa75   :  { %v2989_v50 = vpop.f32.mrb[18].mxu0  ;;  %v3060_v44 = vpop.f32.mrb[18].mxu1 }
 0xa76   :  { %v5521_v41 = vadd.f32 %v2989_v50, %v6825_v11  ;;  %v2991_v56 = vpop.f32.mrb[19].mxu0  ;;  %v3062_v49 = vpop.f32.mrb[19].mxu1  ;;  %v5537_v21 = vadd.f32 %v3060_v44, %v6835_v43 }
 0xa77   :  { %v5522_v32 = vadd.f32 %v2991_v56, %v6829_v26  ;;  %v5538_v34 = vadd.f32 %v3062_v49, %v6839_v31 }
 0xa78   :  { %v4237_v48 = vmul.f32 -1.442695, %v5521_v41  ;;  %v4239_v1 = vmul.f32 -1.442695, %v5537_v21 }
 0xa79   :  { %v4238_v4 = vmul.f32 -1.442695, %v5522_v32 }
 0xa7a   :  { %5768 = vpow2.f32 %v4237_v48 }
 0xa7b   :  { %5770 = vpow2.f32 %v4238_v4 }
 0xa7c   :  { %5772 = vtanh.f32 %v5538_v34 }
 0xa7d   :  { %5774 = vpow2.f32 %v4239_v1 }
 0xa84   :  { %v5769_v9 = vpop.eup %5768 }
 0xa85   :  { %v3074_v35 = vadd.f32 1.0, %v5769_v9  ;;  %v5771_v17 = vpop.eup %5770 }
 0xa86   :  { %v3075_v5 = vadd.f32 1.0, %v5771_v17  ;;  %v5773_v38 = vpop.eup %5772 }
 0xa87   :  { %5776 = vrcp.f32 %v3074_v35  ;;  %v5775_v37 = vpop.eup %5774 }
 0xa88   :  { %5778 = vrcp.f32 %v3075_v5  ;;  %v3076_v30 = vadd.f32 1.0, %v5775_v37 }
 0xa8a   :  { %5780 = vrcp.f32 %v3076_v30 }
 0xa91   :  { %v5777_v12 = vpop.eup %5776 }
 0xa92   :  { %v3085_v39 = vmul.f32 %v5777_v12, %v5773_v38  ;;  %v5779_v24 = vpop.eup %5778 }
 0xa93   :  { %v3084_v55 = vmul.f32 %v5779_v24, %v6843_v51 }
 0xa94   :  { %v5781_v59 = vpop.eup %5780 }
 0xa95   :  { %v6885_v27 = vadd.f32 %v3085_v39, %v3084_v55 }
 0xa97   :  { %5782 = vtanh.f32 %v6885_v27 }
 0xaa1   :  { %v5783_v28 = vpop.eup %5782 }
 0xaa2   :  { %v3088_v53 = vmul.f32 %v5783_v28, %v5781_v59 }
 0xaa4   :  { %3158 = vmatmul.mubr.f32.vlgmr.msra.gmra.mrb[20].mxu0 %v3088_v53  ;;  %3229 = vmatmul.mubr.f32.vlgmr.msra.gmra.mrb[20].mxu1 %v3088_v53 }
 0xaa5   :  { %5146 = vmatpush1.bf16.msra.mxu0 %v6683_v18  ;;  %5178 = vmatpush1.bf16.msra.mxu1 %v6686_v29 }
 0xaa6   :  { %5148 = vmatprep.subr.bf16.mxu0 %v6691_v46  ;;  %5180 = vmatprep.subr.bf16.mxu1 %v6693_v25 }
 0xaa7   :  { %3327 = vmatprep.mubr.f32.mxu0 %v5980_v0  ;;  %3398 = vmatprep.mubr.f32.mxu1 %v5980_v0 }
 0xaa9   :  { %5150 = vmatpush1.bf16.msra.mxu0 %v6695_v23  ;;  %5182 = vmatpush1.bf16.msra.mxu1 %v6698_v63 }
 0xaaa   :  { %5152 = vmatprep.subr.bf16.mxu0 %v6703_v42  ;;  %5184 = vmatprep.subr.bf16.mxu1 %v6705_v10 }
 0xaad   :  { %5154 = vmatpush1.bf16.msra.mxu0 %v6707_v19  ;;  %5186 = vmatpush1.bf16.msra.mxu1 %v6710_v54 }
 0xaae   :  { %5156 = vmatprep.subr.bf16.mxu0 %v6715_v33  ;;  %5188 = vmatprep.subr.bf16.mxu1 %v6717_v16 }
 0xab1   :  { %5158 = vmatpush1.bf16.msra.mxu0 %v6719_v36  ;;  %5190 = vmatpush1.bf16.msra.mxu1 %v6722_v15 }
 0xab2   :  { %5160 = vmatprep.subr.bf16.mxu0 %v6727_v7  ;;  %5192 = vmatprep.subr.bf16.mxu1 %v6729_v20 }
 0xab5   :  { %5162 = vmatpush1.bf16.msra.mxu0 %v6731_v58  ;;  %5194 = vmatpush1.bf16.msra.mxu1 %v6734_v47 }
 0xab6   :  { %5164 = vmatprep.subr.bf16.mxu0 %v6738_v61  ;;  %5196 = vmatprep.subr.bf16.mxu1 %v6740_v52 }
 0xab9   :  { %5166 = vmatpush1.bf16.msra.mxu0 %v6743_v57  ;;  %5198 = vmatpush1.bf16.msra.mxu1 %v6747_v2 }
 0xaba   :  { %5168 = vmatprep.subr.bf16.mxu0 %v6749_v6  ;;  %5200 = vmatprep.subr.bf16.mxu1 %v6751_v22 }
 0xabd   :  { %5170 = vmatpush1.bf16.msra.mxu0 %v6754_v8  ;;  %5202 = vmatpush1.bf16.msra.mxu1 %v6758_v40 }
 0xabe   :  { %5172 = vmatprep.subr.bf16.mxu0 %v6763_v13  ;;  %5204 = vmatprep.subr.bf16.mxu1 %v6765_v62 }
 0xac1   :  { %5174 = vmatpush1.bf16.msra.mxu0 %v6767_v45  ;;  %5206 = vmatpush1.bf16.msra.mxu1 %v6770_v60 }
 0xac2   :  { %5208 = vmatprep.subr.bf16.mxu0 %v6679_v3  ;;  %5240 = vmatprep.subr.bf16.mxu1 %v6681_v14 }
 0xb77   :  { %v3159_v51 = vpop.f32.mrb[20].mxu0  ;;  %v3230_v50 = vpop.f32.mrb[20].mxu1 }
 0xb78   :  { %v5523_v44 = vadd.f32 %v3159_v51, %v6825_v11  ;;  %v3161_v41 = vpop.f32.mrb[21].mxu0  ;;  %v3232_v56 = vpop.f32.mrb[21].mxu1  ;;  %v5539_v4 = vadd.f32 %v3230_v50, %v6835_v43 }
 0xb79   :  { %v5524_v49 = vadd.f32 %v3161_v41, %v6829_v26  ;;  %v5540_v21 = vadd.f32 %v3232_v56, %v6839_v31 }
 0xb7a   :  { %v4240_v32 = vmul.f32 -1.442695, %v5523_v44  ;;  %v4242_v34 = vmul.f32 -1.442695, %v5539_v4 }
 0xb7b   :  { %v4241_v48 = vmul.f32 -1.442695, %v5524_v49 }
 0xb7c   :  { %5784 = vpow2.f32 %v4240_v32 }
 0xb7d   :  { %5786 = vpow2.f32 %v4241_v48 }
 0xb7e   :  { %5788 = vtanh.f32 %v5540_v21 }
 0xb7f   :  { %5790 = vpow2.f32 %v4242_v34 }
 0xb86   :  { %v5785_v1 = vpop.eup %5784 }
 0xb87   :  { %v3244_v9 = vadd.f32 1.0, %v5785_v1  ;;  %v5787_v35 = vpop.eup %5786 }
 0xb88   :  { %v3245_v17 = vadd.f32 1.0, %v5787_v35  ;;  %v5789_v5 = vpop.eup %5788 }
 0xb89   :  { %5792 = vrcp.f32 %v3244_v9  ;;  %v5791_v38 = vpop.eup %5790 }
 0xb8a   :  { %5794 = vrcp.f32 %v3245_v17  ;;  %v3246_v24 = vadd.f32 1.0, %v5791_v38 }
 0xb8c   :  { %5796 = vrcp.f32 %v3246_v24 }
 0xb93   :  { %v5793_v37 = vpop.eup %5792 }
 0xb94   :  { %v3255_v12 = vmul.f32 %v5793_v37, %v5789_v5  ;;  %v5795_v39 = vpop.eup %5794 }
 0xb95   :  { %v3254_v30 = vmul.f32 %v5795_v39, %v6885_v27 }
 0xb96   :  { %v5797_v59 = vpop.eup %5796 }
 0xb97   :  { %v6927_v55 = vadd.f32 %v3255_v12, %v3254_v30 }
 0xb99   :  { %5798 = vtanh.f32 %v6927_v55 }
 0xba3   :  { %v5799_v28 = vpop.eup %5798 }
 0xba4   :  { %v3258_v53 = vmul.f32 %v5799_v28, %v5797_v59 }
 0xba6   :  { %3328 = vmatmul.mubr.f32.vlgmr.msra.gmra.mrb[22].mxu0 %v3258_v53  ;;  %3399 = vmatmul.mubr.f32.vlgmr.msra.gmra.mrb[22].mxu1 %v3258_v53 }
 0xba7   :  { %5210 = vmatpush1.bf16.msra.mxu0 %v6683_v18  ;;  %5242 = vmatpush1.bf16.msra.mxu1 %v6686_v29 }
 0xba8   :  { %5212 = vmatprep.subr.bf16.mxu0 %v6691_v46  ;;  %5244 = vmatprep.subr.bf16.mxu1 %v6693_v25 }
 0xba9   :  { %3497 = vmatprep.mubr.f32.mxu0 %v5980_v0  ;;  %3568 = vmatprep.mubr.f32.mxu1 %v5980_v0 }
 0xbab   :  { %5214 = vmatpush1.bf16.msra.mxu0 %v6695_v23  ;;  %5246 = vmatpush1.bf16.msra.mxu1 %v6698_v63 }
 0xbac   :  { %5216 = vmatprep.subr.bf16.mxu0 %v6703_v42  ;;  %5248 = vmatprep.subr.bf16.mxu1 %v6705_v10 }
 0xbaf   :  { %5218 = vmatpush1.bf16.msra.mxu0 %v6707_v19  ;;  %5250 = vmatpush1.bf16.msra.mxu1 %v6710_v54 }
 0xbb0   :  { %5220 = vmatprep.subr.bf16.mxu0 %v6715_v33  ;;  %5252 = vmatprep.subr.bf16.mxu1 %v6717_v16 }
 0xbb3   :  { %5222 = vmatpush1.bf16.msra.mxu0 %v6719_v36  ;;  %5254 = vmatpush1.bf16.msra.mxu1 %v6722_v15 }
 0xbb4   :  { %5224 = vmatprep.subr.bf16.mxu0 %v6727_v7  ;;  %5256 = vmatprep.subr.bf16.mxu1 %v6729_v20 }
 0xbb7   :  { %5226 = vmatpush1.bf16.msra.mxu0 %v6731_v58  ;;  %5258 = vmatpush1.bf16.msra.mxu1 %v6734_v47 }
 0xbb8   :  { %5228 = vmatprep.subr.bf16.mxu0 %v6738_v61  ;;  %5260 = vmatprep.subr.bf16.mxu1 %v6740_v52 }
 0xbbb   :  { %5230 = vmatpush1.bf16.msra.mxu0 %v6743_v57  ;;  %5262 = vmatpush1.bf16.msra.mxu1 %v6747_v2 }
 0xbbc   :  { %5232 = vmatprep.subr.bf16.mxu0 %v6749_v6  ;;  %5264 = vmatprep.subr.bf16.mxu1 %v6751_v22 }
 0xbbf   :  { %5234 = vmatpush1.bf16.msra.mxu0 %v6754_v8  ;;  %5266 = vmatpush1.bf16.msra.mxu1 %v6758_v40 }
 0xbc0   :  { %5236 = vmatprep.subr.bf16.mxu0 %v6763_v13  ;;  %5268 = vmatprep.subr.bf16.mxu1 %v6765_v62 }
 0xbc3   :  { %5238 = vmatpush1.bf16.msra.mxu0 %v6767_v45  ;;  %5270 = vmatpush1.bf16.msra.mxu1 %v6770_v60 }
 0xbc4   :  { %5272 = vmatprep.subr.bf16.mxu0 %v6679_v3  ;;  %5304 = vmatprep.subr.bf16.mxu1 %v6681_v14 }
 0xc79   :  { %v3329_v27 = vpop.f32.mrb[22].mxu0  ;;  %v3400_v51 = vpop.f32.mrb[22].mxu1 }
 0xc7a   :  { %v5525_v50 = vadd.f32 %v3329_v27, %v6825_v11  ;;  %v3331_v44 = vpop.f32.mrb[23].mxu0  ;;  %v3402_v41 = vpop.f32.mrb[23].mxu1  ;;  %v5541_v48 = vadd.f32 %v3400_v51, %v6835_v43 }
 0xc7b   :  { %v5526_v56 = vadd.f32 %v3331_v44, %v6829_v26  ;;  %v5542_v4 = vadd.f32 %v3402_v41, %v6839_v31 }
 0xc7c   :  { %v4243_v49 = vmul.f32 -1.442695, %v5525_v50  ;;  %v4245_v21 = vmul.f32 -1.442695, %v5541_v48 }
 0xc7d   :  { %v4244_v32 = vmul.f32 -1.442695, %v5526_v56 }
 0xc7e   :  { %5800 = vpow2.f32 %v4243_v49 }
 0xc7f   :  { %5802 = vpow2.f32 %v4244_v32 }
 0xc80   :  { %5804 = vtanh.f32 %v5542_v4 }
 0xc81   :  { %5806 = vpow2.f32 %v4245_v21 }
 0xc88   :  { %v5801_v34 = vpop.eup %5800 }
 0xc89   :  { %v3414_v1 = vadd.f32 1.0, %v5801_v34  ;;  %v5803_v9 = vpop.eup %5802 }
 0xc8a   :  { %v3415_v35 = vadd.f32 1.0, %v5803_v9  ;;  %v5805_v17 = vpop.eup %5804 }
 0xc8b   :  { %5808 = vrcp.f32 %v3414_v1  ;;  %v5807_v5 = vpop.eup %5806 }
 0xc8c   :  { %5810 = vrcp.f32 %v3415_v35  ;;  %v3416_v39 = vadd.f32 1.0, %v5807_v5 }
 0xc8e   :  { %5812 = vrcp.f32 %v3416_v39 }
 0xc95   :  { %v5809_v38 = vpop.eup %5808 }
 0xc96   :  { %v3425_v37 = vmul.f32 %v5809_v38, %v5805_v17  ;;  %v5811_v12 = vpop.eup %5810 }
 0xc97   :  { %v3424_v24 = vmul.f32 %v5811_v12, %v6927_v55 }
 0xc98   :  { %v5813_v59 = vpop.eup %5812 }
 0xc99   :  { %v6969_v30 = vadd.f32 %v3425_v37, %v3424_v24 }
 0xc9b   :  { %5814 = vtanh.f32 %v6969_v30 }
 0xca5   :  { %v5815_v28 = vpop.eup %5814 }
 0xca6   :  { %v3428_v53 = vmul.f32 %v5815_v28, %v5813_v59 }
 0xca8   :  { %3498 = vmatmul.mubr.f32.vlgmr.msra.gmra.mrb[24].mxu0 %v3428_v53  ;;  %3569 = vmatmul.mubr.f32.vlgmr.msra.gmra.mrb[24].mxu1 %v3428_v53 }
 0xca9   :  { %5274 = vmatpush1.bf16.msra.mxu0 %v6683_v18  ;;  %5306 = vmatpush1.bf16.msra.mxu1 %v6686_v29 }
 0xcaa   :  { %5276 = vmatprep.subr.bf16.mxu0 %v6691_v46  ;;  %5308 = vmatprep.subr.bf16.mxu1 %v6693_v25 }
 0xcab   :  { %3667 = vmatprep.mubr.f32.mxu0 %v5980_v0  ;;  %3738 = vmatprep.mubr.f32.mxu1 %v5980_v0 }
 0xcad   :  { %5278 = vmatpush1.bf16.msra.mxu0 %v6695_v23  ;;  %5310 = vmatpush1.bf16.msra.mxu1 %v6698_v63 }
 0xcae   :  { %5280 = vmatprep.subr.bf16.mxu0 %v6703_v42  ;;  %5312 = vmatprep.subr.bf16.mxu1 %v6705_v10 }
 0xcb1   :  { %5282 = vmatpush1.bf16.msra.mxu0 %v6707_v19  ;;  %5314 = vmatpush1.bf16.msra.mxu1 %v6710_v54 }
 0xcb2   :  { %5284 = vmatprep.subr.bf16.mxu0 %v6715_v33  ;;  %5316 = vmatprep.subr.bf16.mxu1 %v6717_v16 }
 0xcb5   :  { %5286 = vmatpush1.bf16.msra.mxu0 %v6719_v36  ;;  %5318 = vmatpush1.bf16.msra.mxu1 %v6722_v15 }
 0xcb6   :  { %5288 = vmatprep.subr.bf16.mxu0 %v6727_v7  ;;  %5320 = vmatprep.subr.bf16.mxu1 %v6729_v20 }
 0xcb9   :  { %5290 = vmatpush1.bf16.msra.mxu0 %v6731_v58  ;;  %5322 = vmatpush1.bf16.msra.mxu1 %v6734_v47 }
 0xcba   :  { %5292 = vmatprep.subr.bf16.mxu0 %v6738_v61  ;;  %5324 = vmatprep.subr.bf16.mxu1 %v6740_v52 }
 0xcbd   :  { %5294 = vmatpush1.bf16.msra.mxu0 %v6743_v57  ;;  %5326 = vmatpush1.bf16.msra.mxu1 %v6747_v2 }
 0xcbe   :  { %5296 = vmatprep.subr.bf16.mxu0 %v6749_v6  ;;  %5328 = vmatprep.subr.bf16.mxu1 %v6751_v22 }
 0xcc1   :  { %5298 = vmatpush1.bf16.msra.mxu0 %v6754_v8  ;;  %5330 = vmatpush1.bf16.msra.mxu1 %v6758_v40 }
 0xcc2   :  { %5300 = vmatprep.subr.bf16.mxu0 %v6763_v13  ;;  %5332 = vmatprep.subr.bf16.mxu1 %v6765_v62 }
 0xcc5   :  { %5302 = vmatpush1.bf16.msra.mxu0 %v6767_v45  ;;  %5334 = vmatpush1.bf16.msra.mxu1 %v6770_v60 }
 0xcc6   :  { %5336 = vmatprep.subr.bf16.mxu0 %v6679_v3  ;;  %5368 = vmatprep.subr.bf16.mxu1 %v6681_v14 }
 0xd7b   :  { %v3499_v55 = vpop.f32.mrb[24].mxu0  ;;  %v3570_v27 = vpop.f32.mrb[24].mxu1 }
 0xd7c   :  { %v5527_v51 = vadd.f32 %v3499_v55, %v6825_v11  ;;  %v3501_v50 = vpop.f32.mrb[25].mxu0  ;;  %v3572_v44 = vpop.f32.mrb[25].mxu1  ;;  %v5543_v32 = vadd.f32 %v3570_v27, %v6835_v43 }
 0xd7d   :  { %v5528_v41 = vadd.f32 %v3501_v50, %v6829_v26  ;;  %v5544_v48 = vadd.f32 %v3572_v44, %v6839_v31 }
 0xd7e   :  { %v4246_v56 = vmul.f32 -1.442695, %v5527_v51  ;;  %v4248_v4 = vmul.f32 -1.442695, %v5543_v32 }
 0xd7f   :  { %v4247_v49 = vmul.f32 -1.442695, %v5528_v41 }
 0xd80   :  { %5816 = vpow2.f32 %v4246_v56 }
 0xd81   :  { %5818 = vpow2.f32 %v4247_v49 }
 0xd82   :  { %5820 = vtanh.f32 %v5544_v48 }
 0xd83   :  { %5822 = vpow2.f32 %v4248_v4 }
 0xd8a   :  { %v5817_v21 = vpop.eup %5816 }
 0xd8b   :  { %v3584_v34 = vadd.f32 1.0, %v5817_v21  ;;  %v5819_v1 = vpop.eup %5818 }
 0xd8c   :  { %v3585_v9 = vadd.f32 1.0, %v5819_v1  ;;  %v5821_v35 = vpop.eup %5820 }
 0xd8d   :  { %5824 = vrcp.f32 %v3584_v34  ;;  %v5823_v17 = vpop.eup %5822 }
 0xd8e   :  { %5826 = vrcp.f32 %v3585_v9  ;;  %v3586_v12 = vadd.f32 1.0, %v5823_v17 }
 0xd90   :  { %5828 = vrcp.f32 %v3586_v12 }
 0xd97   :  { %v5825_v5 = vpop.eup %5824 }
 0xd98   :  { %v3595_v38 = vmul.f32 %v5825_v5, %v5821_v35  ;;  %v5827_v37 = vpop.eup %5826 }
 0xd99   :  { %v3594_v39 = vmul.f32 %v5827_v37, %v6969_v30 }
 0xd9a   :  { %v5829_v59 = vpop.eup %5828 }
 0xd9b   :  { %v7011_v24 = vadd.f32 %v3595_v38, %v3594_v39 }
 0xd9d   :  { %5830 = vtanh.f32 %v7011_v24 }
 0xda7   :  { %v5831_v28 = vpop.eup %5830 }
 0xda8   :  { %v3598_v53 = vmul.f32 %v5831_v28, %v5829_v59  ;;  %v4112_v28 = vld [vmem:[%s7163_s7 + $0x18] sm:$0xff] }
 0xdaa   :  { %3668 = vmatmul.mubr.f32.vlgmr.msra.gmra.mrb[26].mxu0 %v3598_v53  ;;  %3739 = vmatmul.mubr.f32.vlgmr.msra.gmra.mrb[26].mxu1 %v3598_v53 }
 0xdab   :  { %5338 = vmatpush1.bf16.msra.mxu0 %v6683_v18  ;;  %5370 = vmatpush1.bf16.msra.mxu1 %v6686_v29 }
 0xdac   :  { %5340 = vmatprep.subr.bf16.mxu0 %v6691_v46  ;;  %5372 = vmatprep.subr.bf16.mxu1 %v6693_v25 }
 0xdad   :  { %3837 = vmatprep.mubr.f32.mxu0 %v5980_v0  ;;  %3908 = vmatprep.mubr.f32.mxu1 %v5980_v0 }
 0xdaf   :  { %5342 = vmatpush1.bf16.msra.mxu0 %v6695_v23  ;;  %5374 = vmatpush1.bf16.msra.mxu1 %v6698_v63 }
 0xdb0   :  { %5344 = vmatprep.subr.bf16.mxu0 %v6703_v42  ;;  %5376 = vmatprep.subr.bf16.mxu1 %v6705_v10 }
 0xdb3   :  { %5346 = vmatpush1.bf16.msra.mxu0 %v6707_v19  ;;  %5378 = vmatpush1.bf16.msra.mxu1 %v6710_v54 }
 0xdb4   :  { %5348 = vmatprep.subr.bf16.mxu0 %v6715_v33  ;;  %5380 = vmatprep.subr.bf16.mxu1 %v6717_v16 }
 0xdb7   :  { %5350 = vmatpush1.bf16.msra.mxu0 %v6719_v36  ;;  %5382 = vmatpush1.bf16.msra.mxu1 %v6722_v15 }
 0xdb8   :  { %5352 = vmatprep.subr.bf16.mxu0 %v6727_v7  ;;  %5384 = vmatprep.subr.bf16.mxu1 %v6729_v20 }
 0xdbb   :  { %5354 = vmatpush1.bf16.msra.mxu0 %v6731_v58  ;;  %5386 = vmatpush1.bf16.msra.mxu1 %v6734_v47 }
 0xdbc   :  { %5356 = vmatprep.subr.bf16.mxu0 %v6738_v61  ;;  %5388 = vmatprep.subr.bf16.mxu1 %v6740_v52 }
 0xdbf   :  { %5358 = vmatpush1.bf16.msra.mxu0 %v6743_v57  ;;  %5390 = vmatpush1.bf16.msra.mxu1 %v6747_v2 }
 0xdc0   :  { %5360 = vmatprep.subr.bf16.mxu0 %v6749_v6  ;;  %5392 = vmatprep.subr.bf16.mxu1 %v6751_v22 }
 0xdc3   :  { %5362 = vmatpush1.bf16.msra.mxu0 %v6754_v8  ;;  %5394 = vmatpush1.bf16.msra.mxu1 %v6758_v40 }
 0xdc4   :  { %5364 = vmatprep.subr.bf16.mxu0 %v6763_v13  ;;  %5396 = vmatprep.subr.bf16.mxu1 %v6765_v62 }
 0xdc7   :  { %5366 = vmatpush1.bf16.msra.mxu0 %v6767_v45  ;;  %5398 = vmatpush1.bf16.msra.mxu1 %v6770_v60 }
 0xdc8   :  { %5400 = vmatprep.subr.bf16.mxu0 %v6679_v3  ;;  %5432 = vmatprep.subr.bf16.mxu1 %v6681_v14 }
 0xe7d   :  { %v3669_v30 = vpop.f32.mrb[26].mxu0  ;;  %v3740_v55 = vpop.f32.mrb[26].mxu1 }
 0xe7e   :  { %v5529_v27 = vadd.f32 %v3669_v30, %v6825_v11  ;;  %v3671_v51 = vpop.f32.mrb[27].mxu0  ;;  %v3742_v50 = vpop.f32.mrb[27].mxu1  ;;  %v5545_v49 = vadd.f32 %v3740_v55, %v6835_v43  ;;  %v4113_v30 = vld [vmem:[%s7163_s7 + $0x20] sm:$0xff]  ;;  %v4114_v55 = vld [vmem:[%s7163_s7 + $0x28] sm:$0xff] }
 0xe7f   :  { %v5530_v44 = vadd.f32 %v3671_v51, %v6829_v26  ;;  %v5546_v32 = vadd.f32 %v3742_v50, %v6839_v31  ;;  %v4115_v51 = vld [vmem:[%s7163_s7 + $0x30] sm:$0xff]  ;;  %v4116_v50 = vld [vmem:[%s7163_s7 + $0x38] sm:$0xff] }
 0xe80   :  { %v4249_v41 = vmul.f32 -1.442695, %v5529_v27  ;;  %v4251_v48 = vmul.f32 -1.442695, %v5545_v49  ;;  %v5470_v27 = vpack.c.bf16 %v4114_v55, %v4113_v30 }
 0xe81   :  { %v4250_v56 = vmul.f32 -1.442695, %v5530_v44  ;;  %v5473_v44 = vpack.c.bf16 %v4116_v50, %v4115_v51 }
 0xe82   :  { %5832 = vpow2.f32 %v4249_v41  ;;  %v4117_v41 = vld [vmem:[%s7163_s7 + $0x40] sm:$0xff] }
 0xe83   :  { %5834 = vpow2.f32 %v4250_v56  ;;  %v4118_v56 = vld [vmem:[%s7163_s7 + $0x48] sm:$0xff] }
 0xe84   :  { %5836 = vtanh.f32 %v5546_v32  ;;  %v5476_v49 = vpack.c.bf16 %v4118_v56, %v4117_v41  ;;  %v4119_v32 = vld [vmem:[%s7163_s7 + $0x50] sm:$0xff] }
 0xe85   :  { %5838 = vpow2.f32 %v4251_v48  ;;  %v4120_v48 = vld [vmem:[%s7163_s7 + $0x58] sm:$0xff] }
 0xe8c   :  { %v5833_v3 = vpop.eup %5832 }
 0xe8d   :  { %v3754_v4 = vadd.f32 1.0, %v5833_v3  ;;  %v5835_v14 = vpop.eup %5834  ;;  %v5479_v3 = vpack.c.bf16 %v4120_v48, %v4119_v32 }
 0xe8e   :  { %v3755_v21 = vadd.f32 1.0, %v5835_v14  ;;  %v5837_v34 = vpop.eup %5836  ;;  %v4122_v14 = vld [vmem:[%s7163_s7 + $0x68] sm:$0xff] }
 0xe8f   :  { %5840 = vrcp.f32 %v3754_v4  ;;  %v5839_v1 = vpop.eup %5838  ;;  %v4121_v4 = vld [vmem:[%s7163_s7 + $0x60] sm:$0xff] }
 0xe90   :  { %5842 = vrcp.f32 %v3755_v21  ;;  %v3756_v5 = vadd.f32 1.0, %v5839_v1  ;;  %v5482_v21 = vpack.c.bf16 %v4122_v14, %v4121_v4  ;;  %v4124_v1 = vld [vmem:[%s7163_s7 + $0x78] sm:$0xff] }
 0xe92   :  { %5844 = vrcp.f32 %v3756_v5 }
 0xe99   :  { %v5841_v9 = vpop.eup %5840 }
 0xe9a   :  { %v3765_v35 = vmul.f32 %v5841_v9, %v5837_v34  ;;  %v5843_v17 = vpop.eup %5842  ;;  %v4123_v34 = vld [vmem:[%s7163_s7 + $0x70] sm:$0xff] }
 0xe9b   :  { %v3764_v38 = vmul.f32 %v5843_v17, %v7011_v24  ;;  %v4111_v24 = vld [vmem:[%s7163_s7 + $0x10] sm:$0xff]  ;;  %v5485_v9 = vpack.c.bf16 %v4124_v1, %v4123_v34 }
 0xe9c   :  { %v5845_v12 = vpop.eup %5844  ;;  %v5467_v53 = vpack.c.bf16 %v4112_v28, %v4111_v24 }
 0xe9d   :  { %v7053_v37 = vadd.f32 %v3765_v35, %v3764_v38 }
 0xe9f   :  { %5846 = vtanh.f32 %v7053_v37 }
 0xea9   :  { %v5847_v39 = vpop.eup %5846 }
 0xeaa   :  { %v3768_v59 = vmul.f32 %v5847_v39, %v5845_v12 }
 0xeac   :  { %3838 = vmatmul.mubr.f32.vlgmr.msra.gmra.mrb[28].mxu0 %v3768_v59  ;;  %3909 = vmatmul.mubr.f32.vlgmr.msra.gmra.mrb[28].mxu1 %v3768_v59 }
 0xead   :  { %5402 = vmatpush1.bf16.msra.mxu0 %v6683_v18  ;;  %5434 = vmatpush1.bf16.msra.mxu1 %v6686_v29 }
 0xeae   :  { %5404 = vmatprep.subr.bf16.mxu0 %v6691_v46  ;;  %5436 = vmatprep.subr.bf16.mxu1 %v6693_v25 }
 0xeaf   :  { %4007 = vmatprep.mubr.f32.mxu0 %v5980_v0  ;;  %4078 = vmatprep.mubr.f32.mxu1 %v5980_v0 }
 0xeb1   :  { %5406 = vmatpush1.bf16.msra.mxu0 %v6695_v23  ;;  %5438 = vmatpush1.bf16.msra.mxu1 %v6698_v63 }
 0xeb2   :  { %5408 = vmatprep.subr.bf16.mxu0 %v6703_v42  ;;  %5440 = vmatprep.subr.bf16.mxu1 %v6705_v10 }
 0xeb5   :  { %5410 = vmatpush1.bf16.msra.mxu0 %v6707_v19  ;;  %5442 = vmatpush1.bf16.msra.mxu1 %v6710_v54 }
 0xeb6   :  { %5412 = vmatprep.subr.bf16.mxu0 %v6715_v33  ;;  %5444 = vmatprep.subr.bf16.mxu1 %v6717_v16 }
 0xeb9   :  { %5414 = vmatpush1.bf16.msra.mxu0 %v6719_v36  ;;  %5446 = vmatpush1.bf16.msra.mxu1 %v6722_v15 }
 0xeba   :  { %5416 = vmatprep.subr.bf16.mxu0 %v6727_v7  ;;  %5448 = vmatprep.subr.bf16.mxu1 %v6729_v20 }
 0xebd   :  { %5418 = vmatpush1.bf16.msra.mxu0 %v6731_v58  ;;  %5450 = vmatpush1.bf16.msra.mxu1 %v6734_v47 }
 0xebe   :  { %5420 = vmatprep.subr.bf16.mxu0 %v6738_v61  ;;  %5452 = vmatprep.subr.bf16.mxu1 %v6740_v52 }
 0xec1   :  { %5422 = vmatpush1.bf16.msra.mxu0 %v6743_v57  ;;  %5454 = vmatpush1.bf16.msra.mxu1 %v6747_v2 }
 0xec2   :  { %5424 = vmatprep.subr.bf16.mxu0 %v6749_v6  ;;  %5456 = vmatprep.subr.bf16.mxu1 %v6751_v22 }
 0xec5   :  { %5426 = vmatpush1.bf16.msra.mxu0 %v6754_v8  ;;  %5458 = vmatpush1.bf16.msra.mxu1 %v6758_v40 }
 0xec6   :  { %5428 = vmatprep.subr.bf16.mxu0 %v6763_v13  ;;  %5460 = vmatprep.subr.bf16.mxu1 %v6765_v62  ;;  %v4109_v13 = vld [vmem:[%s7163_s7] sm:$0xff]  ;;  %v4110_v62 = vld [vmem:[%s7163_s7 + $0x8] sm:$0xff] }
 0xec9   :  { %5430 = vmatpush1.bf16.msra.mxu0 %v6767_v45  ;;  %5462 = vmatpush1.bf16.msra.mxu1 %v6770_v60  ;;  %v5464_v45 = vpack.c.bf16 %v4110_v62, %v4109_v13  ;;  %v5981_v60 = vmov 0.0|0.0  }
 0xeca   :  { %5463 = vmatprep.subr.bf16.mxu0 %v5981_v60 }
 0xf7f   :  { %v3839_v18 = vpop.f32.mrb[28].mxu0  ;;  %v3910_v29 = vpop.f32.mrb[28].mxu1 }
 0xf80   :  { %v5531_v46 = vadd.f32 %v3839_v18, %v6825_v11  ;;  %v3841_v25 = vpop.f32.mrb[29].mxu0  ;;  %v3912_v23 = vpop.f32.mrb[29].mxu1  ;;  %v5547_v19 = vadd.f32 %v3910_v29, %v6835_v43 }
 0xf81   :  { %v5532_v63 = vadd.f32 %v3841_v25, %v6829_v26  ;;  %v5548_v54 = vadd.f32 %v3912_v23, %v6839_v31 }
 0xf82   :  { %v4252_v42 = vmul.f32 -1.442695, %v5531_v46  ;;  %v4254_v33 = vmul.f32 -1.442695, %v5547_v19 }
 0xf83   :  { %v4253_v10 = vmul.f32 -1.442695, %v5532_v63 }
 0xf84   :  { %5848 = vpow2.f32 %v4252_v42 }
 0xf85   :  { %5850 = vpow2.f32 %v4253_v10 }
 0xf86   :  { %5852 = vtanh.f32 %v5548_v54 }
 0xf87   :  { %5854 = vpow2.f32 %v4254_v33 }
 0xf8e   :  { %v5849_v16 = vpop.eup %5848 }
 0xf8f   :  { %v3924_v36 = vadd.f32 1.0, %v5849_v16  ;;  %v5851_v15 = vpop.eup %5850 }
 0xf90   :  { %v3925_v7 = vadd.f32 1.0, %v5851_v15  ;;  %v5853_v20 = vpop.eup %5852  ;;  %v4258_v15 = vld [vmem:[%s7164_s8] ss:$0 sm:$0xff] }
 0xf91   :  { %5856 = vrcp.f32 %v3924_v36  ;;  %v5855_v58 = vpop.eup %5854 }
 0xf92   :  { %5858 = vrcp.f32 %v3925_v7  ;;  %v3926_v57 = vadd.f32 1.0, %v5855_v58 }
 0xf94   :  { %5860 = vrcp.f32 %v3926_v57 }
 0xf9b   :  { %v5857_v47 = vpop.eup %5856 }
 0xf9c   :  { %v3935_v61 = vmul.f32 %v5857_v47, %v5853_v20  ;;  %v5859_v52 = vpop.eup %5858 }
 0xf9d   :  { %v3934_v2 = vmul.f32 %v5859_v52, %v7053_v37 }
 0xf9e   :  { %v5861_v22 = vpop.eup %5860 }
 0xf9f   :  { %v7093_v6 = vadd.f32 %v3935_v61, %v3934_v2 }
 0xfa1   :  { %5862 = vtanh.f32 %v7093_v6 }
 0xfab   :  { %v5863_v8 = vpop.eup %5862 }
 0xfac   :  { %v3938_v40 = vmul.f32 %v5863_v8, %v5861_v22 }
 0xfae   :  { %4008 = vmatmul.mubr.f32.vlgmr.msra.gmra.mrb[30].mxu0 %v3938_v40  ;;  %4079 = vmatmul.mubr.f32.vlgmr.msra.gmra.mrb[30].mxu1 %v3938_v40 }
 0xfaf   :  { %5465 = vmatpush3.bf16.msra.mxu0 %v5464_v45  ;;  %4308 = vmatprep.mubr.msk.f32.mxu0 %vm5982_vm0, %v5980_v0 }
 0xfb0   :  { %5466 = vmatprep.subr.bf16.mxu0 %v5981_v60 }
 0xfb3   :  { %5468 = vmatpush3.bf16.msra.mxu0 %v5467_v53 }
 0xfb4   :  { %5469 = vmatprep.subr.bf16.mxu0 %v5981_v60 }
 0xfb7   :  { %5471 = vmatpush3.bf16.msra.mxu0 %v5470_v27 }
 0xfb8   :  { %5472 = vmatprep.subr.bf16.mxu0 %v5981_v60 }
 0xfbb   :  { %5474 = vmatpush3.bf16.msra.mxu0 %v5473_v44 }
 0xfbc   :  { %5475 = vmatprep.subr.bf16.mxu0 %v5981_v60 }
 0xfbf   :  { %5477 = vmatpush3.bf16.msra.mxu0 %v5476_v49 }
 0xfc0   :  { %5478 = vmatprep.subr.bf16.mxu0 %v5981_v60 }
 0xfc3   :  { %5480 = vmatpush3.bf16.msra.mxu0 %v5479_v3 }
 0xfc4   :  { %5481 = vmatprep.subr.bf16.mxu0 %v5981_v60 }
 0xfc7   :  { %5483 = vmatpush3.bf16.msra.mxu0 %v5482_v21 }
 0xfc8   :  { %5484 = vmatprep.subr.bf16.mxu0 %v5981_v60 }
 0xfcb   :  { %5486 = vmatpush3.bf16.msra.mxu0 %v5485_v9 }
0x1081   :  { %v4009_v35 = vpop.f32.mrb[30].mxu0  ;;  %v4080_v17 = vpop.f32.mrb[30].mxu1 }
0x1082   :  { %v5533_v5 = vadd.f32 %v4009_v35, %v6825_v11  ;;  %v4011_v0 = vpop.f32.mrb[31].mxu0  ;;  %v4082_v38 = vpop.f32.mrb[31].mxu1  ;;  %v5549_v59 = vadd.f32 %v4080_v17, %v6835_v43 }
0x1083   :  { %v5534_v37 = vadd.f32 %v4011_v0, %v6829_v26  ;;  %v5550_v18 = vadd.f32 %v4082_v38, %v6839_v31 }
0x1084   :  { %v4255_v12 = vmul.f32 -1.442695, %v5533_v5  ;;  %v4257_v29 = vmul.f32 -1.442695, %v5549_v59 }
0x1085   :  { %v4256_v39 = vmul.f32 -1.442695, %v5534_v37 }
0x1086   :  { %5864 = vpow2.f32 %v4255_v12 }
0x1087   :  { %5866 = vpow2.f32 %v4256_v39 }
0x1088   :  { %5868 = vtanh.f32 %v5550_v18 }
0x1089   :  { %5870 = vpow2.f32 %v4257_v29 }
0x1090   :  { %v5865_v46 = vpop.eup %5864 }
0x1091   :  { %v4094_v25 = vadd.f32 1.0, %v5865_v46  ;;  %v5867_v23 = vpop.eup %5866 }
0x1092   :  { %v4095_v11 = vadd.f32 1.0, %v5867_v23  ;;  %v5869_v63 = vpop.eup %5868 }
0x1093   :  { %5872 = vrcp.f32 %v4094_v25  ;;  %v5871_v42 = vpop.eup %5870 }
0x1094   :  { %5874 = vrcp.f32 %v4095_v11  ;;  %v4096_v54 = vadd.f32 1.0, %v5871_v42 }
0x1096   :  { %5876 = vrcp.f32 %v4096_v54 }
0x109d   :  { %v5873_v26 = vpop.eup %5872 }
0x109e   :  { %v4105_v10 = vmul.f32 %v5873_v26, %v5869_v63  ;;  %v5875_v19 = vpop.eup %5874 }
0x109f   :  { %v4104_v33 = vmul.f32 %v5875_v19, %v7093_v6 }
0x10a0   :  { %v5877_v31 = vpop.eup %5876 }
0x10a1   :  { %v4106_v43 = vadd.f32 %v4105_v10, %v4104_v33 }
0x10a3   :  { %5878 = vtanh.f32 %v4106_v43 }
0x10ad   :  { %v5879_v16 = vpop.eup %5878 }
0x10ae   :  { %v4108_v36 = vmul.f32 %v5879_v16, %v5877_v31 }
0x10b0   :  { %4309 = vmatmul.mubr.f32.vlgmr.msra.gmra.mrb[32].mxu0 %v4108_v36 }
0x1183   :  { %v4198_v7 = vpop.f32.mrb[32].mxu0 }
0x1184   :  { %v4199_v20 = vadd.f32 %v4258_v15, %v4198_v7  ;;  %v4310_v58 = vpop.f32.mrb[33].mxu0 }
0x1186   :  { %4202 = vst [vmem:[%s7165_s9] sm:$0xff] %v4199_v20 }
0x1187   :  { %4207 = vsyncpa [#allocation5], 1 }
0x1188   :  { %4208 = vsyncpa [#allocation7], 1 }
0x1189   :  { %4209 = vsyncpa [#allocation10], 1 }

</bundles_post_ra>
